<compile_context>
chip_gen: v7x
topology: tpu7x:2x2x1
jax: 0.10.0
libtpu: 0.0.40
codegen_flags: <defaults>
</compile_context>

<pallas_src>
import numpy as np
import jax
import jax.numpy as jnp
from jax import lax
from jax.experimental import pallas as pl
from jax.experimental.pallas import tpu as pltpu

KH = 3  # conv kernel height (slides over the sequence axis); width = full hidden dim


def _bert_conv_kernel(x_ref, wc_ref, bc_ref, wl_ref, bl_ref, out_ref,
                      mx_ref, tail_ref):
    """Grid = (batch, seq_tiles).  One step = one sequence tile of one batch row.

    x_ref   : (1, L, TS, H)  bf16  sequence tile of the stacked BERT layers
    wc_ref  : (KH, L, OC, H) bf16  grouped conv weights, tap-major
    bc_ref  : (L, OC, 1)     f32   conv bias
    wl_ref  : (L, OC, NC)    f32   linear weight, group-major
    bl_ref  : (1, 1, NC)     f32   linear bias
    out_ref : (1, 1, NC)     f32   per-batch output block (resident across seq tiles)
    mx_ref  : (L, OC, 1)     f32   running max over conv output positions
    tail_ref: (KH-1, L, OC, 1) f32 partial conv outputs straddling the tile edge
    """
    j = pl.program_id(1)
    nj = pl.num_programs(1)

    x = x_ref[0]                       # (L, TS, H) bf16
    TS = x.shape[1]
    TT = TS - (KH - 1)                 # conv outputs fully inside this tile

    @pl.when(j == 0)
    def _init():
        mx_ref[...] = jnp.full_like(mx_ref, -jnp.inf)

    # One MXU matmul per tap on the *unshifted* tile:
    #   (L, OC, H) x (L, TS, H) -> (L, OC, TS), f32 accumulation,
    # long sequence axis lane-dense; x itself is never sliced/copied.
    p = [lax.dot_general(wc_ref[kh], x,
                         dimension_numbers=(((2,), (2,)), ((0,), (0,))),
                         preferred_element_type=jnp.float32)
         for kh in range(KH)]

    # Complete the KH-1 conv outputs that straddled the previous tile boundary.
    @pl.when(j > 0)
    def _complete_prev_tail():
        m = mx_ref[...]
        for d in range(KH - 1):
            c = tail_ref[d]                                  # (L, OC, 1)
            for kh in range(KH - 1 - d, KH):
                off = d + kh - (KH - 1)
                c = c + p[kh][:, :, off:off + 1]
            m = jnp.maximum(m, c)
        mx_ref[...] = m

    # Conv outputs fully inside this tile: shift-align the *narrow* (L,OC,*)
    # partials (tiny) instead of shifting x (huge), then fold into running max.
    acc = p[0][:, :, :TT]
    for kh in range(1, KH):
        acc = acc + p[kh][:, :, kh:kh + TT]
    mx_ref[...] = jnp.maximum(mx_ref[...],
                              jnp.max(acc, axis=-1, keepdims=True))

    # Save the partial conv outputs at the last KH-1 positions for the next tile
    # (they still need taps from the next tile; the final tile's tail maps to
    # positions >= S-(KH-1), which are not valid conv outputs, and is dropped).
    for d in range(KH - 1):
        i = TT + d
        t = p[0][:, :, i:i + 1]
        for kh in range(1, KH - 1 - d):
            t = t + p[kh][:, :, i + kh:i + kh + 1]
        tail_ref[d] = t

    # Finalize: bias after max (equivalent; bias constant along the max axis),
    # then the tiny linear head, and write the per-batch output block.
    @pl.when(j == nj - 1)
    def _finalize():
        feat = mx_ref[...] + bc_ref[...]                     # (L, OC, 1)
        prod = feat * wl_ref[...]                            # (L, OC, NC)
        s = jnp.sum(prod, axis=1, keepdims=True)             # (L, 1, NC)
        logits = jnp.sum(s, axis=0, keepdims=True)           # (1, 1, NC)
        out_ref[...] = (logits + bl_ref[...]).astype(out_ref.dtype)


def _pick_seq_tile(S, max_tile=256):
    """Largest sequence tile <= max_tile that divides S (prefer lane-aligned)."""
    if S <= max_tile:
        return S
    for ts in (256, 128):
        if ts <= max_tile and S % ts == 0:
            return ts
    ts = max_tile - max_tile % 8
    while ts >= 8:
        if S % ts == 0:
            return ts
        ts -= 8
    return S


def bert_conv_forward(encoded_stack, conv_w, conv_b, lin_w, lin_b, *, seq_tile=None):
    """Pallas forward for conv + seq-max + linear head.

    encoded_stack: (B, L, S, H) f32    (torch.stack(encoded_layers, 1))
    conv_w       : (L*OC, 1, KH, H)    (PyTorch Conv2d weight, groups=L)
    conv_b       : (L*OC,)
    lin_w        : (n_class, L*OC)     (PyTorch Linear weight)
    lin_b        : (n_class,)
    returns      : (B, n_class) pre-softmax logits
    """
    B, L, S, H = encoded_stack.shape
    n_class, LOC = lin_w.shape
    OC = LOC // L
    assert conv_w.shape == (LOC, 1, KH, H)
    assert S > KH - 1

    TS = _pick_seq_tile(S) if seq_tile is None else int(seq_tile)
    assert S % TS == 0 and TS > KH - 1 and (TS == S or TS % 8 == 0)
    n_tiles = S // TS

    # Plain-JAX glue: bf16 activations / conv weights (HBM-bound kernel),
    # tap-major / group-major parameter layouts.
    x_bf = encoded_stack.astype(jnp.bfloat16)
    wc = jnp.transpose(conv_w.reshape(L, OC, KH, H), (2, 0, 1, 3)).astype(jnp.bfloat16)
    bc = conv_b.reshape(L, OC, 1).astype(jnp.float32)
    wl = lin_w.T.reshape(L, OC, n_class).astype(jnp.float32)
    bl = lin_b.reshape(1, 1, n_class).astype(jnp.float32)

    out = pl.pallas_call(
        _bert_conv_kernel,
        out_shape=jax.ShapeDtypeStruct((B, 1, n_class), jnp.float32),
        grid_spec=pltpu.PrefetchScalarGridSpec(
            num_scalar_prefetch=0,
            grid=(B, n_tiles),
            in_specs=[
                pl.BlockSpec((1, L, TS, H), lambda b, j: (b, 0, j, 0)),
                pl.BlockSpec((KH, L, OC, H), lambda b, j: (0, 0, 0, 0)),
                pl.BlockSpec((L, OC, 1), lambda b, j: (0, 0, 0)),
                pl.BlockSpec((L, OC, n_class), lambda b, j: (0, 0, 0)),
                pl.BlockSpec((1, 1, n_class), lambda b, j: (0, 0, 0)),
            ],
            out_specs=pl.BlockSpec((1, 1, n_class), lambda b, j: (b, 0, 0)),
            scratch_shapes=[
                pltpu.VMEM((L, OC, 1), jnp.float32),          # running max
                pltpu.VMEM((KH - 1, L, OC, 1), jnp.float32),  # tile-edge carry
            ],
        ),
        compiler_params=pltpu.CompilerParams(
            dimension_semantics=("parallel", "arbitrary"),
            vmem_limit_bytes=32 * 1024 * 1024,
        ),
    )(x_bf, wc, bc, wl, bl)
    return out.reshape(B, n_class)


def ref_forward(encoded_stack, conv_w, conv_b, lin_w, lin_b):
    """Pure-JAX reference (matches the kernel's bf16 storage of x / conv weights)."""
    B, L, S, H = encoded_stack.shape
    LOC = conv_w.shape[0]
    OC = LOC // L
    T = S - (KH - 1)
    x = encoded_stack.astype(jnp.bfloat16).astype(jnp.float32)
    wc = conv_w.astype(jnp.bfloat16).astype(jnp.float32).reshape(L, OC, KH, H)
    conv = jnp.zeros((B, L, T, OC), jnp.float32)
    for kh in range(KH):
        conv = conv + jnp.einsum('blth,loh->blto',
                                 x[:, :, kh:kh + T, :], wc[:, :, kh, :])
    conv = conv + conv_b.reshape(1, L, 1, OC)
    feat = jnp.max(conv, axis=2).reshape(B, LOC)       # max over sequence positions
    return jnp.dot(feat, lin_w.T, precision=lax.Precision.HIGHEST) + lin_b[None, :]


if __name__ == "__main__":
    # Small stand-in shapes: batch=2, 12 BERT layers (fixed by groups=12),
    # seq=128, hidden=128 (stand-in for 768), out_channel=16, n_class=4.
    B, L, S, H = 2, 12, 128, 128
    OC, N_CLASS = 16, 4

    key = jax.random.PRNGKey(0)
    k1, k2, k3, k4, k5 = jax.random.split(key, 5)
    x = jax.random.normal(k1, (B, L, S, H), jnp.float32)
    conv_w = jax.random.normal(k2, (L * OC, 1, KH, H), jnp.float32) * 0.05
    conv_b = jax.random.normal(k3, (L * OC,), jnp.float32) * 0.05
    lin_w = jax.random.normal(k4, (N_CLASS, L * OC), jnp.float32) * 0.05
    lin_b = jax.random.normal(k5, (N_CLASS,), jnp.float32) * 0.05

    ref = ref_forward(x, conv_w, conv_b, lin_w, lin_b)

    # Run once with a single sequence tile (TS == S) and once with two tiles
    # (exercises the tile-boundary carry path used at real BERT shapes).
    for tile in (None, 64):
        out = bert_conv_forward(x, conv_w, conv_b, lin_w, lin_b, seq_tile=tile)
        out = jax.block_until_ready(out)
        np.testing.assert_allclose(np.asarray(out), np.asarray(ref),
                                   rtol=1e-2, atol=1e-2)

    print("KERNEL_OK")
</pallas_src>

<mosaic_0001>
module attributes {stable_mosaic.version = 11 : i64} {
  func.func @_bert_conv_kernel(%arg0: i32, %arg1: i32, %arg2: memref<1x12x128x128xbf16, #tpu.memory_space<vmem>>, %arg3: memref<3x12x16x128xbf16, #tpu.memory_space<vmem>>, %arg4: memref<12x16x1xf32, #tpu.memory_space<vmem>>, %arg5: memref<12x16x4xf32, #tpu.memory_space<vmem>>, %arg6: memref<1x1x4xf32, #tpu.memory_space<vmem>>, %arg7: memref<1x1x4xf32, #tpu.memory_space<vmem>>, %arg8: memref<12x16x1xf32, #tpu.memory_space<vmem>>, %arg9: memref<2x12x16x1xf32, #tpu.memory_space<vmem>>) attributes {dimension_semantics = [#tpu.dimension_semantics<parallel>, #tpu.dimension_semantics<arbitrary>], iteration_bounds = array<i64: 2, 1>, scalar_prefetch = 0 : i64, scratch_operands = 2 : i64, tpu.core_type = #tpu.core_type<tc>, window_params = [{transform_indices = @transform_0, window_bounds = array<i64: 1, 12, 128, 128>}, {pipeline_mode = #tpu.pipeline_mode<synchronous>, transform_indices = @transform_1, window_bounds = array<i64: 3, 12, 16, 128>}, {pipeline_mode = #tpu.pipeline_mode<synchronous>, transform_indices = @transform_2, window_bounds = array<i64: 12, 16, 1>}, {pipeline_mode = #tpu.pipeline_mode<synchronous>, transform_indices = @transform_3, window_bounds = array<i64: 12, 16, 4>}, {pipeline_mode = #tpu.pipeline_mode<synchronous>, transform_indices = @transform_4, window_bounds = array<i64: 1, 1, 4>}, {transform_indices = @transform_5, window_bounds = array<i64: 1, 1, 4>}]} {
    %c0 = arith.constant 0 : index
    %c0_0 = arith.constant 0 : index
    %c0_1 = arith.constant 0 : index
    %c0_2 = arith.constant 0 : index
    %0 = vector.load %arg2[%c0, %c0_0, %c0_1, %c0_2] : memref<1x12x128x128xbf16, #tpu.memory_space<vmem>>, vector<1x12x128x128xbf16>
    %1 = vector.shape_cast %0 : vector<1x12x128x128xbf16> to vector<12x128x128xbf16>
    %c0_i32 = arith.constant 0 : i32
    %2 = arith.cmpi eq, %arg1, %c0_i32 : i32
    %3 = arith.extui %2 : i1 to i32
    %c0_i32_3 = arith.constant 0 : i32
    %4 = arith.cmpi ne, %3, %c0_i32_3 : i32
    scf.if %4 {
      %cst_35 = arith.constant 0xFF800000 : f32
      %40 = vector.broadcast %cst_35 : f32 to vector<12x16x1xf32>
      %c0_36 = arith.constant 0 : index
      %c0_37 = arith.constant 0 : index
      %c0_38 = arith.constant 0 : index
      %41 = vector.load %arg8[%c0_36, %c0_37, %c0_38] : memref<12x16x1xf32, #tpu.memory_space<vmem>>, vector<12x16x1xf32>
      tpu.vector_store %arg8[%c0_36, %c0_37, %c0_38], %40 {strides = array<i32>} : memref<12x16x1xf32, #tpu.memory_space<vmem>>, vector<12x16x1xf32>,
    } else {
    }
    %c0_4 = arith.constant 0 : index
    %c0_5 = arith.constant 0 : index
    %c0_6 = arith.constant 0 : index
    %c0_7 = arith.constant 0 : index
    %5 = vector.load %arg3[%c0_4, %c0_5, %c0_6, %c0_7] : memref<3x12x16x128xbf16, #tpu.memory_space<vmem>>, vector<1x12x16x128xbf16>
    %6 = vector.shape_cast %5 : vector<1x12x16x128xbf16> to vector<12x16x128xbf16>
    %cst = arith.constant dense<0.000000e+00> : vector<12x16x128xf32>
    %7 = tpu.matmul %6, %1, %cst {dimension_numbers = #tpu.dot_dimension_numbers<[2], [2], [1], [1], [0, 0, 0, 1, 1, 1], [0], [0]>} : vector<12x16x128xbf16>, vector<12x128x128xbf16>, vector<12x16x128xf32> -> vector<12x16x128xf32>
    %c1 = arith.constant 1 : index
    %c0_8 = arith.constant 0 : index
    %c0_9 = arith.constant 0 : index
    %c0_10 = arith.constant 0 : index
    %8 = vector.load %arg3[%c1, %c0_8, %c0_9, %c0_10] : memref<3x12x16x128xbf16, #tpu.memory_space<vmem>>, vector<1x12x16x128xbf16>
    %9 = vector.shape_cast %8 : vector<1x12x16x128xbf16> to vector<12x16x128xbf16>
    %cst_11 = arith.constant dense<0.000000e+00> : vector<12x16x128xf32>
    %10 = tpu.matmul %9, %1, %cst_11 {dimension_numbers = #tpu.dot_dimension_numbers<[2], [2], [1], [1], [0, 0, 0, 1, 1, 1], [0], [0]>} : vector<12x16x128xbf16>, vector<12x128x128xbf16>, vector<12x16x128xf32> -> vector<12x16x128xf32>
    %c2 = arith.constant 2 : index
    %c0_12 = arith.constant 0 : index
    %c0_13 = arith.constant 0 : index
    %c0_14 = arith.constant 0 : index
    %11 = vector.load %arg3[%c2, %c0_12, %c0_13, %c0_14] : memref<3x12x16x128xbf16, #tpu.memory_space<vmem>>, vector<1x12x16x128xbf16>
    %12 = vector.shape_cast %11 : vector<1x12x16x128xbf16> to vector<12x16x128xbf16>
    %cst_15 = arith.constant dense<0.000000e+00> : vector<12x16x128xf32>
    %13 = tpu.matmul %12, %1, %cst_15 {dimension_numbers = #tpu.dot_dimension_numbers<[2], [2], [1], [1], [0, 0, 0, 1, 1, 1], [0], [0]>} : vector<12x16x128xbf16>, vector<12x128x128xbf16>, vector<12x16x128xf32> -> vector<12x16x128xf32>
    %c0_i32_16 = arith.constant 0 : i32
    %14 = arith.cmpi sgt, %arg1, %c0_i32_16 : i32
    %15 = arith.extui %14 : i1 to i32
    %c0_i32_17 = arith.constant 0 : i32
    %16 = arith.cmpi ne, %15, %c0_i32_17 : i32
    scf.if %16 {
      %c0_35 = arith.constant 0 : index
      %c0_36 = arith.constant 0 : index
      %c0_37 = arith.constant 0 : index
      %40 = vector.load %arg8[%c0_35, %c0_36, %c0_37] : memref<12x16x1xf32, #tpu.memory_space<vmem>>, vector<12x16x1xf32>
      %c0_38 = arith.constant 0 : index
      %c0_39 = arith.constant 0 : index
      %c0_40 = arith.constant 0 : index
      %c0_41 = arith.constant 0 : index
      %41 = vector.load %arg9[%c0_38, %c0_39, %c0_40, %c0_41] : memref<2x12x16x1xf32, #tpu.memory_space<vmem>>, vector<1x12x16x1xf32>
      %42 = vector.shape_cast %41 : vector<1x12x16x1xf32> to vector<12x16x1xf32>
      %43 = vector.extract_strided_slice %13 {offsets = [0, 0, 0], sizes = [12, 16, 1], strides = [1, 1, 1]} : vector<12x16x128xf32> to vector<12x16x1xf32>
      %44 = arith.addf %42, %43 : vector<12x16x1xf32>
      %45 = arith.maximumf %40, %44 : vector<12x16x1xf32>
      %c1_42 = arith.constant 1 : index
      %c0_43 = arith.constant 0 : index
      %c0_44 = arith.constant 0 : index
      %c0_45 = arith.constant 0 : index
      %46 = vector.load %arg9[%c1_42, %c0_43, %c0_44, %c0_45] : memref<2x12x16x1xf32, #tpu.memory_space<vmem>>, vector<1x12x16x1xf32>
      %47 = vector.shape_cast %46 : vector<1x12x16x1xf32> to vector<12x16x1xf32>
      %48 = vector.extract_strided_slice %10 {offsets = [0, 0, 0], sizes = [12, 16, 1], strides = [1, 1, 1]} : vector<12x16x128xf32> to vector<12x16x1xf32>
      %49 = arith.addf %47, %48 : vector<12x16x1xf32>
      %50 = vector.extract_strided_slice %13 {offsets = [0, 0, 1], sizes = [12, 16, 1], strides = [1, 1, 1]} : vector<12x16x128xf32> to vector<12x16x1xf32>
      %51 = arith.addf %49, %50 : vector<12x16x1xf32>
      %52 = arith.maximumf %45, %51 : vector<12x16x1xf32>
      %c0_46 = arith.constant 0 : index
      %c0_47 = arith.constant 0 : index
      %c0_48 = arith.constant 0 : index
      %53 = vector.load %arg8[%c0_46, %c0_47, %c0_48] : memref<12x16x1xf32, #tpu.memory_space<vmem>>, vector<12x16x1xf32>
      tpu.vector_store %arg8[%c0_46, %c0_47, %c0_48], %52 {strides = array<i32>} : memref<12x16x1xf32, #tpu.memory_space<vmem>>, vector<12x16x1xf32>,
    } else {
    }
    %17 = vector.extract_strided_slice %7 {offsets = [0, 0, 0], sizes = [12, 16, 126], strides = [1, 1, 1]} : vector<12x16x128xf32> to vector<12x16x126xf32>
    %18 = vector.extract_strided_slice %10 {offsets = [0, 0, 1], sizes = [12, 16, 126], strides = [1, 1, 1]} : vector<12x16x128xf32> to vector<12x16x126xf32>
    %19 = arith.addf %17, %18 : vector<12x16x126xf32>
    %20 = vector.extract_strided_slice %13 {offsets = [0, 0, 2], sizes = [12, 16, 126], strides = [1, 1, 1]} : vector<12x16x128xf32> to vector<12x16x126xf32>
    %21 = arith.addf %19, %20 : vector<12x16x126xf32>
    %c0_18 = arith.constant 0 : index
    %c0_19 = arith.constant 0 : index
    %c0_20 = arith.constant 0 : index
    %22 = vector.load %arg8[%c0_18, %c0_19, %c0_20] : memref<12x16x1xf32, #tpu.memory_space<vmem>>, vector<12x16x1xf32>
    %cst_21 = arith.constant dense<0xFF800000> : vector<12x16xf32>
    %23 = vector.multi_reduction <maximumf>, %21, %cst_21 [2] : vector<12x16x126xf32> to vector<12x16xf32>
    %24 = vector.shape_cast %23 : vector<12x16xf32> to vector<12x16x1xf32>
    %25 = arith.maximumf %22, %24 : vector<12x16x1xf32>
    %c0_22 = arith.constant 0 : index
    %c0_23 = arith.constant 0 : index
    %c0_24 = arith.constant 0 : index
    %26 = vector.load %arg8[%c0_22, %c0_23, %c0_24] : memref<12x16x1xf32, #tpu.memory_space<vmem>>, vector<12x16x1xf32>
    tpu.vector_store %arg8[%c0_22, %c0_23, %c0_24], %25 {strides = array<i32>} : memref<12x16x1xf32, #tpu.memory_space<vmem>>, vector<12x16x1xf32>,
    %27 = vector.extract_strided_slice %7 {offsets = [0, 0, 126], sizes = [12, 16, 1], strides = [1, 1, 1]} : vector<12x16x128xf32> to vector<12x16x1xf32>
    %28 = vector.extract_strided_slice %10 {offsets = [0, 0, 127], sizes = [12, 16, 1], strides = [1, 1, 1]} : vector<12x16x128xf32> to vector<12x16x1xf32>
    %29 = arith.addf %27, %28 : vector<12x16x1xf32>
    %c0_25 = arith.constant 0 : index
    %c0_26 = arith.constant 0 : index
    %c0_27 = arith.constant 0 : index
    %c0_28 = arith.constant 0 : index
    %30 = vector.load %arg9[%c0_25, %c0_26, %c0_27, %c0_28] : memref<2x12x16x1xf32, #tpu.memory_space<vmem>>, vector<1x12x16x1xf32>
    %31 = vector.shape_cast %30 : vector<1x12x16x1xf32> to vector<12x16x1xf32>
    %32 = vector.shape_cast %29 : vector<12x16x1xf32> to vector<1x12x16x1xf32>
    tpu.vector_store %arg9[%c0_25, %c0_26, %c0_27, %c0_28], %32 {strides = array<i32>} : memref<2x12x16x1xf32, #tpu.memory_space<vmem>>, vector<1x12x16x1xf32>,
    %33 = vector.extract_strided_slice %7 {offsets = [0, 0, 127], sizes = [12, 16, 1], strides = [1, 1, 1]} : vector<12x16x128xf32> to vector<12x16x1xf32>
    %c1_29 = arith.constant 1 : index
    %c0_30 = arith.constant 0 : index
    %c0_31 = arith.constant 0 : index
    %c0_32 = arith.constant 0 : index
    %34 = vector.load %arg9[%c1_29, %c0_30, %c0_31, %c0_32] : memref<2x12x16x1xf32, #tpu.memory_space<vmem>>, vector<1x12x16x1xf32>
    %35 = vector.shape_cast %34 : vector<1x12x16x1xf32> to vector<12x16x1xf32>
    %36 = vector.shape_cast %33 : vector<12x16x1xf32> to vector<1x12x16x1xf32>
    tpu.vector_store %arg9[%c1_29, %c0_30, %c0_31, %c0_32], %36 {strides = array<i32>} : memref<2x12x16x1xf32, #tpu.memory_space<vmem>>, vector<1x12x16x1xf32>,
    %c0_i32_33 = arith.constant 0 : i32
    %37 = arith.cmpi eq, %arg1, %c0_i32_33 : i32
    %38 = arith.extui %37 : i1 to i32
    %c0_i32_34 = arith.constant 0 : i32
    %39 = arith.cmpi ne, %38, %c0_i32_34 : i32
    scf.if %39 {
      %c0_35 = arith.constant 0 : index
      %c0_36 = arith.constant 0 : index
      %c0_37 = arith.constant 0 : index
      %40 = vector.load %arg8[%c0_35, %c0_36, %c0_37] : memref<12x16x1xf32, #tpu.memory_space<vmem>>, vector<12x16x1xf32>
      %c0_38 = arith.constant 0 : index
      %c0_39 = arith.constant 0 : index
      %c0_40 = arith.constant 0 : index
      %41 = vector.load %arg4[%c0_38, %c0_39, %c0_40] : memref<12x16x1xf32, #tpu.memory_space<vmem>>, vector<12x16x1xf32>
      %42 = arith.addf %40, %41 : vector<12x16x1xf32>
      %c0_41 = arith.constant 0 : index
      %c0_42 = arith.constant 0 : index
      %c0_43 = arith.constant 0 : index
      %43 = vector.load %arg5[%c0_41, %c0_42, %c0_43] : memref<12x16x4xf32, #tpu.memory_space<vmem>>, vector<12x16x4xf32>
      %44 = vector.broadcast %42 : vector<12x16x1xf32> to vector<12x16x4xf32>
      %45 = arith.mulf %44, %43 : vector<12x16x4xf32>
      %cst_44 = arith.constant dense<0.000000e+00> : vector<12x4xf32>
      %46 = vector.multi_reduction <add>, %45, %cst_44 [1] : vector<12x16x4xf32> to vector<12x4xf32>
      %47 = vector.shape_cast %46 : vector<12x4xf32> to vector<12x1x4xf32>
      %cst_45 = arith.constant dense<0.000000e+00> : vector<1x4xf32>
      %48 = vector.multi_reduction <add>, %47, %cst_45 [0] : vector<12x1x4xf32> to vector<1x4xf32>
      %49 = vector.shape_cast %48 : vector<1x4xf32> to vector<1x1x4xf32>
      %c0_46 = arith.constant 0 : index
      %c0_47 = arith.constant 0 : index
      %c0_48 = arith.constant 0 : index
      %50 = vector.load %arg6[%c0_46, %c0_47, %c0_48] : memref<1x1x4xf32, #tpu.memory_space<vmem>>, vector<1x1x4xf32>
      %51 = arith.addf %49, %50 : vector<1x1x4xf32>
      %c0_49 = arith.constant 0 : index
      %c0_50 = arith.constant 0 : index
      %c0_51 = arith.constant 0 : index
      %52 = vector.load %arg7[%c0_49, %c0_50, %c0_51] : memref<1x1x4xf32, #tpu.memory_space<vmem>>, vector<1x1x4xf32>
      tpu.vector_store %arg7[%c0_49, %c0_50, %c0_51], %51 {strides = array<i32>} : memref<1x1x4xf32, #tpu.memory_space<vmem>>, vector<1x1x4xf32>,
    } else {
    }
    return
  }
  func.func @transform_0(%arg0: i32, %arg1: i32) -> (i32, i32, i32, i32) {
    %c0_i32 = arith.constant 0 : i32
    %c0_i32_0 = arith.constant 0 : i32
    %c0_i32_1 = arith.constant 0 : i32
    return %arg0, %c0_i32, %arg1, %c0_i32_0 : i32, i32, i32, i32
  }
  func.func @transform_1(%arg0: i32, %arg1: i32) -> (i32, i32, i32, i32) {
    %c0_i32 = arith.constant 0 : i32
    %c0_i32_0 = arith.constant 0 : i32
    %c0_i32_1 = arith.constant 0 : i32
    %c0_i32_2 = arith.constant 0 : i32
    %c0_i32_3 = arith.constant 0 : i32
    return %c0_i32, %c0_i32_0, %c0_i32_1, %c0_i32_2 : i32, i32, i32, i32
  }
  func.func @transform_2(%arg0: i32, %arg1: i32) -> (i32, i32, i32) {
    %c0_i32 = arith.constant 0 : i32
    %c0_i32_0 = arith.constant 0 : i32
    %c0_i32_1 = arith.constant 0 : i32
    %c0_i32_2 = arith.constant 0 : i32
    return %c0_i32, %c0_i32_0, %c0_i32_1 : i32, i32, i32
  }
  func.func @transform_3(%arg0: i32, %arg1: i32) -> (i32, i32, i32) {
    %c0_i32 = arith.constant 0 : i32
    %c0_i32_0 = arith.constant 0 : i32
    %c0_i32_1 = arith.constant 0 : i32
    %c0_i32_2 = arith.constant 0 : i32
    return %c0_i32, %c0_i32_0, %c0_i32_1 : i32, i32, i32
  }
  func.func @transform_4(%arg0: i32, %arg1: i32) -> (i32, i32, i32) {
    %c0_i32 = arith.constant 0 : i32
    %c0_i32_0 = arith.constant 0 : i32
    %c0_i32_1 = arith.constant 0 : i32
    %c0_i32_2 = arith.constant 0 : i32
    return %c0_i32, %c0_i32_0, %c0_i32_1 : i32, i32, i32
  }
  func.func @transform_5(%arg0: i32, %arg1: i32) -> (i32, i32, i32) {
    %c0_i32 = arith.constant 0 : i32
    %c0_i32_0 = arith.constant 0 : i32
    %c0_i32_1 = arith.constant 0 : i32
    return %arg0, %c0_i32, %c0_i32_0 : i32, i32, i32
  }
}

</mosaic_0001>

<bundles_post_ra>
// kernel: tpu_custom_call.1
= control target key start
LH: loop header
LB: loop body
LE: loop exit
PB: predicated region body
PF: predicated region fallthrough
CT: control target
= control target key end

     0   :  { %10 = vsyncpa [#allocation5], 0  ;;  %s7694_s0 = inlined_call_operand.hbm [shape: bf16[2,12,128,128], index: 0, kind: input, shape index: {}]   ;;  %s7695_s1 = inlined_call_operand.vmem [shape: bf16[3,12,16,128], index: 1, kind: input, shape index: {}]   ;;  %s7696_s2 = inlined_call_operand.vmem [shape: f32[12,16,1], index: 2, kind: input, shape index: {}]   ;;  %s7697_s3 = inlined_call_operand.vmem [shape: f32[12,16,4], index: 3, kind: input, shape index: {}]   ;;  %s7698_s4 = inlined_call_operand.vmem [shape: f32[1,1,4], index: 4, kind: input, shape index: {}]   ;;  %s7699_s5 = inlined_call_operand.hbm [shape: f32[2,1,4], index: 5, kind: output, shape index: {}]  }
   0x1   :  { %12 = vsyncpa [#allocation5 + $0x1], 0 }
   0x2   :  { %13 = vsyncpa [#allocation6], 0 }
   0x3   :  { %15 = vsyncpa [#allocation6 + $0x1], 0  ;;  %s5931_s18 = smov 0   ;;  %s5933_s19 = smov 0  }
   0x4   :  { %s5935_s20 = smov 0   ;;  %s5937_s21 = smov 0  }
   0x5   :  { %s5939_s22 = smov 0   ;;  %s5941_s23 = smov 0  }
   0x6 LB: > { %s4237_s24 = sadd.s32 4294967295, %s5887_s23   ;;  %s4238_s25 = sadd.s32 4294967294, %s5887_s23   ;;  %s5887_s23 = sphi %s5941_s23, %s21_s23   ;;  %s5883_s22 = sphi %s5939_s22, %s7852_s22   ;;  %s5879_s21 = sphi %s5937_s21, %s7851_s21   ;;  %s5875_s20 = sphi %s5935_s20, %s7850_s20   ;;  %s5871_s19 = sphi %s5933_s19, %s7849_s19   ;;  %s5867_s18 = sphi %s5931_s18, %s7848_s18  }
   0x7   : > { %s33_s26 = sadd.s32 1, %s5883_s22  ;;  %s42_s27 = sadd.s32 1, %s5875_s20 }
   0x8   : > { %p35_p0 = scmp.ge.s32.totalorder %s33_s26, 2  ;;  %p49_p1 = scmp.ne.s32.totalorder %s5875_s20, %s5871_s19 }
   0x9   : > { %p50_p2 = scmp.eq.s32.totalorder %s5887_s23, 0  ;;  %p55_p3 = scmp.ne.s32.totalorder %s5871_s19, %s5867_s18 }
   0xa   : > { %s7854_s26 = smov (%p35_p0, %s33_s26), 0  ;;  %p56_p5 = scmp.eq.s32.totalorder %s4237_s24, 0 }
   0xb   : > { %p5972_p4 = por %p50_p2, %p49_p1  ;;  %s37_s29 = ssub.s32 %s5883_s22, %s7854_s26 }
   0xc   : > { %p163_p6 = scmp.eq.s32.totalorder %s4237_s24, 1  ;;  %p40_p7 = scmp.eq.s32.totalorder %s37_s29, 0 }
   0xd   : > { %p5978_p8 = por %p56_p5, %p55_p3  ;;  %p169_p10 = scmp.eq.s32.totalorder %s4238_s25, 1 }
   0xe   : > { %p5982_p9 = por %p163_p6, %p49_p1  ;;  %p5485_p13 = scmp.lt.s32.totalorder %s5887_s23, 2 }
   0xf   : > { %s5987_s7 = scalar_select %p40_p7, %s5875_s20, %s42_s27  }
  0x10   : > { %s7749_s6 = scalar_select %p5982_p9, 1, 0 }
  0x11   : > { %p5989_p11 = por %p169_p10, %p55_p3  ;;  %s201_s9 = sand.u32 1, %s5875_s20  }
  0x12   : > { %s5470_s10 = smul.u32 768, %s201_s9  ;;  %p5999_p0 = pnand %p5485_p13, %p5972_p4 }
  0x13   : > { %s7750_s8 = scalar_select %p5989_p11, 1, 0 }
  0x14   : > { %s5471_s11 = smul.u32 12288, %s5883_s22  ;;  %s205_s16 = scalar_lea.vmem [#allocation4], %s5470_s10 }
  0x15   : > { %s214_s17 = sshll.u32 %s205_s16, 4  ;;  %s6011_s24 = scalar_lea.sflag [#allocation5], %s201_s9  ;;  %s6008_s17 = int_to_ptr.vmem [resolvable:$true] %s214_s17 }
  0x16   : > { %s6006_s15 = scalar_lea.hbm %s7694_s0, %s5471_s11  ;;  %p5777_p3 = pneg %p5999_p0 }
  0x17   : > { %s5775_s25 = scalar_lea.hbm %s6006_s15, 12288  ;;  %s5780_s29 = scalar_lea.hbm %s7694_s0, 24576 }
  0x18   : > { %p5776_p2 = scmp.ne.s32.totalorder %s6006_s15, %s5775_s25  ;;  %p5781_p6 = scmp.lt.u32.totalorder %s6006_s15, %s7694_s0 }
  0x19   : > { %p5782_p7 = scmp.lt.u32.totalorder %s5780_s29, %s5775_s25  ;;  %p5784_p13 = scmp.lt.u32.totalorder %s5775_s25, %s6006_s15 }
  0x1a   : > { %p5778_p4 = pnand %p5777_p3, %p5776_p2 }
  0x1b   : > { %p5783_p10 = por %p5782_p7, %p5781_p6 }
  0x1c   : > { %p5779_p5 = pneg %p5778_p4 }
  0x1d   : > { %p5785_p12 = por %p5784_p13, %p5783_p10 }
  0x1f   : > { %p5786_p1 = pnand %p5785_p12, %p5779_p5 }
  0x21   : > { %5789 = shalt.err (!%p5786_p1)
}
  0x22   : > { %s5790_s9 = scalar_lea.vmem %s6008_s17, 12288  ;;  %s5889_s13 = smov [#allocation4]  }
  0x23   : > { %p5791_p2 = scmp.ne.s32.totalorder %s6008_s17, %s5790_s9  ;;  %s5795_s14 = sshll.u32 %s5889_s13, 4  ;;  %s5796_s14 = int_to_ptr.vmem [resolvable:$false] %s5795_s14 }
  0x24   : > { %s5797_s16 = scalar_lea.vmem %s5796_s14, 24576  ;;  %p5798_p9 = scmp.lt.s32.totalorder %s6008_s17, %s5796_s14 }
  0x25   : > { %p5793_p4 = pnand %p5791_p2, %p5777_p3  ;;  %p5799_p6 = scmp.lt.s32.totalorder %s5797_s16, %s5790_s9 }
  0x27   : > { %p5794_p11 = pneg %p5793_p4  ;;  %p5800_p7 = por %p5799_p6, %p5798_p9 }
  0x29   : > { %p5801_p10 = pnand %p5800_p7, %p5794_p11 }
  0x2b   : > { %5804 = shalt.err (!%p5801_p10)
}
  0x2c   : > { %s5890_s25 = smov 64   ;;  %s5891_s27 = smov 4  }
  0x2d   : > { %5480 = dma.hbm_to_vmem [thread:$0]  (!%p5999_p0), %s6006_s15, 12288, %s6008_s17, %s6011_s24, %s5890_s25, %s5890_s25, %s5891_s27  }
  0x2e   : > { %p222_p12 = scmp.lt.s32.totalorder %s5887_s23, 3  ;;  %p7752_p1 = scmp.ge.s32.totalorder %s5887_s23, 1 }
  0x30   : > { %p223_p3 = pnand %p7752_p1, %p222_p12 }
  0x32   : > { %226 = sbr.rel (%p223_p3) target bundleno = 1920 (0x780), region = 40 }
  0x39   : > { %s6043_s28 = sand.u32 1, %s5871_s19  }
  0x3a   : > { %s5472_s29 = smul.u32 768, %s6043_s28  ;;  %s229_s11 = scalar_lea.sflag [#allocation5], %s6043_s28 }
  0x3c   : > { %s6047_s10 = scalar_lea.vmem [#allocation4], %s5472_s29 }
  0x3d   : > { %5858 = dma.done.wait (%p5978_p8), %s229_s11, 12288  }
  0x3e   : > { %5860 = vsyncadd (%p5978_p8), %s229_s11, 4294955008  ;;  %v5892_v0 = vmov 0.0   ;;  %vm5893_vm0 = vmmov 0   ;;  %v5547_v1 = vld [vmem:[%s6047_s10] sm:$0xff]   ;;  %v5549_v3 = vld [vmem:[%s6047_s10 + $0x8] sm:$0xff]   ;;  %s5894_s12 = smov 127  }
  0x3f   : > { %4750 = vmatprep.subr.bf16.mxu0 %v5892_v0  ;;  %4770 = vmatprep.subr.bf16.mxu1 %v5892_v0  ;;  %v5548_v2 = vld [vmem:[%s6047_s10 + $0x40] sm:$0xff]   ;;  %v5550_v4 = vld [vmem:[%s6047_s10 + $0x48] sm:$0xff]   ;;  %v5551_v5 = vld [vmem:[%s6047_s10 + $0x10] sm:$0xff]   ;;  %s5895_s27 = smov 2   ;;  %vm456_vm1 = vcmask 7168   ;;  %s5896_s17 = smov 126  }
  0x40   : > { %4766 = vmatprep.mubr.msk.bf16.mxu0 %vm5893_vm0, %v5892_v0  ;;  %4786 = vmatprep.mubr.msk.bf16.mxu1 %vm5893_vm0, %v5892_v0  ;;  %v5552_v6 = vld [vmem:[%s6047_s10 + $0x50] sm:$0xff]   ;;  %v5553_v7 = vld [vmem:[%s6047_s10 + $0x18] sm:$0xff]   ;;  %v5555_v9 = vld [vmem:[%s6047_s10 + $0x20] sm:$0xff]   ;;  %vm3405_vm2 = vcmask 1031168   ;;  %vm4011_vm3 = vcmask 31744   ;;  %s4423_s15 = sshll.u32 %s5879_s21, 4 }
  0x41   : > { %4751 = vmatpush3.bf16.xpose.msra.mxu0 %v5547_v1  ;;  %4771 = vmatpush3.bf16.xpose.msra.mxu1 %v5548_v2  ;;  %v5554_v8 = vld [vmem:[%s6047_s10 + $0x58] sm:$0xff]   ;;  %v5556_v10 = vld [vmem:[%s6047_s10 + $0x60] sm:$0xff]   ;;  %v5557_v11 = vld [vmem:[%s6047_s10 + $0x28] sm:$0xff]   ;;  %vm4145_vm4 = vcmask 24576   ;;  %s7645_s14 = scalar_lea.hbm %s7699_s5, %s4423_s15  ;;  %p7845_p9 = scmp.ne.s32.totalorder %s7749_s6, 0 }
  0x42   : > { %4752 = vmatprep.subr.bf16.mxu0 %v5892_v0  ;;  %4772 = vmatprep.subr.bf16.mxu1 %v5892_v0  ;;  %v5558_v12 = vld [vmem:[%s6047_s10 + $0x68] sm:$0xff]   ;;  %v6084_v13 = vld [vmem:[%s6047_s10 + $0x30] sm:$0xff]   ;;  %v6094_v15 = vld [vmem:[%s6047_s10 + $0x38] sm:$0xff]   ;;  %s5900_s21 = smov [#allocation7]  }
  0x43   : > { %v6087_v14 = vld [vmem:[%s6047_s10 + $0x70] sm:$0xff]   ;;  %v6097_v16 = vld [vmem:[%s6047_s10 + $0x78] sm:$0xff]   ;;  %v5563_v17 = vld [vmem:[%s7695_s1] sm:$0xff]   ;;  %s5809_s25 = sshll.u32 %s5900_s21, 4  ;;  %s5810_s25 = int_to_ptr.vmem [resolvable:$false] %s5809_s25 }
  0x44   : > { %v5564_v18 = vld [vmem:[%s7695_s1 + $0x8] sm:$0xff]   ;;  %v6110_v19 = vld [vmem:[%s6047_s10 + $0x80] sm:$0xff]   ;;  %v6134_v23 = vld [vmem:[%s6047_s10 + $0x90] sm:$0xff]   ;;  %s5811_s29 = scalar_lea.vmem %s5810_s25, 32 }
  0x45   : > { %v6113_v20 = vld [vmem:[%s6047_s10 + $0xc0] sm:$0xff]   ;;  %v6120_v21 = vld [vmem:[%s6047_s10 + $0x88] sm:$0xff]   ;;  %v6137_v24 = vld [vmem:[%s6047_s10 + $0xd0] sm:$0xff]  }
  0x46   : > { %v6125_v22 = vld [vmem:[%s6047_s10 + $0xc8] sm:$0xff]   ;;  %v6144_v25 = vld [vmem:[%s6047_s10 + $0x98] sm:$0xff]   ;;  %v6154_v27 = vld [vmem:[%s6047_s10 + $0xa0] sm:$0xff]  }
  0x47   : > { %v6147_v26 = vld [vmem:[%s6047_s10 + $0xd8] sm:$0xff]   ;;  %v6157_v28 = vld [vmem:[%s6047_s10 + $0xe0] sm:$0xff]   ;;  %v6164_v29 = vld [vmem:[%s6047_s10 + $0xa8] sm:$0xff]  }
  0x48   : > { %v6167_v30 = vld [vmem:[%s6047_s10 + $0xe8] sm:$0xff]   ;;  %v6174_v31 = vld [vmem:[%s6047_s10 + $0xb0] sm:$0xff]   ;;  %v6184_v33 = vld [vmem:[%s6047_s10 + $0xb8] sm:$0xff]  }
  0x49   : > { %4753 = vmatpush3.bf16.xpose.msra.mxu0 %v5549_v3  ;;  %4773 = vmatpush3.bf16.xpose.msra.mxu1 %v5550_v4  ;;  %v6177_v32 = vld [vmem:[%s6047_s10 + $0xf0] sm:$0xff]   ;;  %v6187_v34 = vld [vmem:[%s6047_s10 + $0xf8] sm:$0xff]   ;;  %v6200_v37 = vld [vmem:[%s6047_s10 + $0x100] sm:$0xff]  }
  0x4a   : > { %4754 = vmatprep.subr.bf16.mxu0 %v5892_v0  ;;  %4774 = vmatprep.subr.bf16.mxu1 %v5892_v0  ;;  %v5581_v35 = vld [vmem:[%s7695_s1 + $0x10] sm:$0xff]   ;;  %v5582_v36 = vld [vmem:[%s7695_s1 + $0x18] sm:$0xff]   ;;  %v6203_v38 = vld [vmem:[%s6047_s10 + $0x140] sm:$0xff]  }
  0x4b   : > { %v6214_v39 = vld [vmem:[%s6047_s10 + $0x108] sm:$0xff]   ;;  %v6224_v41 = vld [vmem:[%s6047_s10 + $0x110] sm:$0xff]   ;;  %v6234_v43 = vld [vmem:[%s6047_s10 + $0x118] sm:$0xff]  }
  0x4c   : > { %v6217_v40 = vld [vmem:[%s6047_s10 + $0x148] sm:$0xff]   ;;  %v6227_v42 = vld [vmem:[%s6047_s10 + $0x150] sm:$0xff]   ;;  %v6237_v44 = vld [vmem:[%s6047_s10 + $0x158] sm:$0xff]  }
  0x4d   : > { %v6244_v45 = vld [vmem:[%s6047_s10 + $0x120] sm:$0xff]   ;;  %v6254_v47 = vld [vmem:[%s6047_s10 + $0x128] sm:$0xff]   ;;  %v6264_v49 = vld [vmem:[%s6047_s10 + $0x130] sm:$0xff]  }
  0x4e   : > { %v6247_v46 = vld [vmem:[%s6047_s10 + $0x160] sm:$0xff]   ;;  %v6257_v48 = vld [vmem:[%s6047_s10 + $0x168] sm:$0xff]   ;;  %v6267_v50 = vld [vmem:[%s6047_s10 + $0x170] sm:$0xff]  }
  0x4f   : > { %v6274_v51 = vld [vmem:[%s6047_s10 + $0x138] sm:$0xff]   ;;  %v5599_v53 = vld [vmem:[%s7695_s1 + $0x20] sm:$0xff]   ;;  %v5600_v54 = vld [vmem:[%s7695_s1 + $0x28] sm:$0xff]  }
  0x50   : > { %v6277_v52 = vld [vmem:[%s6047_s10 + $0x178] sm:$0xff]   ;;  %v6290_v55 = vld [vmem:[%s6047_s10 + $0x180] sm:$0xff]   ;;  %v6304_v57 = vld [vmem:[%s6047_s10 + $0x188] sm:$0xff]  }
  0x51   : > { %4755 = vmatpush3.bf16.xpose.msra.mxu0 %v5551_v5  ;;  %4775 = vmatpush3.bf16.xpose.msra.mxu1 %v5552_v6  ;;  %v6293_v56 = vld [vmem:[%s6047_s10 + $0x1c0] sm:$0xff]   ;;  %v6307_v58 = vld [vmem:[%s6047_s10 + $0x1c8] sm:$0xff]   ;;  %v6314_v59 = vld [vmem:[%s6047_s10 + $0x190] sm:$0xff]  }
  0x52   : > { %4756 = vmatprep.subr.bf16.mxu0 %v5892_v0  ;;  %4776 = vmatprep.subr.bf16.mxu1 %v5892_v0  ;;  %v6317_v60 = vld [vmem:[%s6047_s10 + $0x1d0] sm:$0xff]   ;;  %v6324_v61 = vld [vmem:[%s6047_s10 + $0x198] sm:$0xff]   ;;  %v6334_v63 = vld [vmem:[%s6047_s10 + $0x1a0] sm:$0xff]  }
  0x53   : > { %v6327_v62 = vld [vmem:[%s6047_s10 + $0x1d8] sm:$0xff]   ;;  %v6337_v1 = vld [vmem:[%s6047_s10 + $0x1e0] sm:$0xff]   ;;  %v6344_v2 = vld [vmem:[%s6047_s10 + $0x1a8] sm:$0xff]  }
  0x54   : > { %v6347_v3 = vld [vmem:[%s6047_s10 + $0x1e8] sm:$0xff]   ;;  %v6354_v4 = vld [vmem:[%s6047_s10 + $0x1b0] sm:$0xff]   ;;  %v6364_v6 = vld [vmem:[%s6047_s10 + $0x1b8] sm:$0xff]  }
  0x55   : > { %v6357_v5 = vld [vmem:[%s6047_s10 + $0x1f0] sm:$0xff]  }
  0x59   : > { %4757 = vmatpush3.bf16.xpose.msra.mxu0 %v5553_v7  ;;  %4777 = vmatpush3.bf16.xpose.msra.mxu1 %v5554_v8  ;;  %v6367_v7 = vld [vmem:[%s6047_s10 + $0x1f8] sm:$0xff]   ;;  %v5617_v8 = vld [vmem:[%s7695_s1 + $0x30] sm:$0xff]  }
  0x5a   : > { %4758 = vmatprep.subr.bf16.mxu0 %v5892_v0  ;;  %4778 = vmatprep.subr.bf16.mxu1 %v5892_v0 }
  0x61   : > { %4759 = vmatpush3.bf16.xpose.msra.mxu0 %v5555_v9  ;;  %4779 = vmatpush3.bf16.xpose.msra.mxu1 %v5556_v10  ;;  %v5618_v9 = vld [vmem:[%s7695_s1 + $0x38] sm:$0xff]   ;;  %v6380_v10 = vld [vmem:[%s6047_s10 + $0x200] sm:$0xff]  }
  0x62   : > { %4760 = vmatprep.subr.bf16.mxu0 %v5892_v0  ;;  %4780 = vmatprep.subr.bf16.mxu1 %v5892_v0 }
  0x69   : > { %4761 = vmatpush3.bf16.xpose.msra.mxu0 %v5557_v11  ;;  %4781 = vmatpush3.bf16.xpose.msra.mxu1 %v5558_v12  ;;  %v6383_v11 = vld [vmem:[%s6047_s10 + $0x240] sm:$0xff]   ;;  %v6394_v12 = vld [vmem:[%s6047_s10 + $0x208] sm:$0xff]  }
  0x6a   : > { %4762 = vmatprep.subr.bf16.mxu0 %v5892_v0  ;;  %4782 = vmatprep.subr.bf16.mxu1 %v5892_v0  ;;  %7753 = vst [vmem:[#allocation10_spill] sm:$0xff] %v6383_v11  ;;  %7754 = vst [vmem:[#allocation11_spill] sm:$0xff] %v6394_v12 }
  0x71   : > { %4763 = vmatpush3.bf16.xpose.msra.mxu0 %v6084_v13  ;;  %4783 = vmatpush3.bf16.xpose.msra.mxu1 %v6087_v14 }
  0x72   : > { %4764 = vmatprep.subr.bf16.mxu0 %v5892_v0  ;;  %4784 = vmatprep.subr.bf16.mxu1 %v5892_v0 }
  0x79   : > { %4765 = vmatpush3.bf16.xpose.msra.mxu0 %v6094_v15  ;;  %4785 = vmatpush3.bf16.xpose.msra.mxu1 %v6097_v16 }
  0x7a   : > { %4790 = vmatprep.subr.bf16.mxu0 %v5892_v0  ;;  %4810 = vmatprep.subr.bf16.mxu1 %v5892_v0 }
  0x80   : > { %4767 = vmatmul.mubr.bf16.vlgmr.msra.gmra.mrb[0].mxu0 %v5563_v17  ;;  %4787 = vmatmul.mubr.bf16.vlgmr.msra.gmra.mrb[0].mxu1 %v5564_v18  ;;  %v6397_v17 = vld [vmem:[%s6047_s10 + $0x248] sm:$0xff]   ;;  %v6404_v18 = vld [vmem:[%s6047_s10 + $0x210] sm:$0xff]  }
  0x81   : > { %4791 = vmatpush3.bf16.xpose.msra.mxu0 %v6110_v19  ;;  %4811 = vmatpush3.bf16.xpose.msra.mxu1 %v6113_v20  ;;  %7755 = vst [vmem:[#allocation12_spill] sm:$0xff] %v6397_v17  ;;  %7756 = vst [vmem:[#allocation13_spill] sm:$0xff] %v6404_v18 }
  0x82   : > { %4792 = vmatprep.subr.bf16.mxu0 %v5892_v0  ;;  %4812 = vmatprep.subr.bf16.mxu1 %v5892_v0 }
  0x83   : > { %4806 = vmatprep.mubr.msk.bf16.mxu0 %vm5893_vm0, %v5892_v0  ;;  %4826 = vmatprep.mubr.msk.bf16.mxu1 %vm5893_vm0, %v5892_v0 }
  0x89   : > { %4793 = vmatpush3.bf16.xpose.msra.mxu0 %v6120_v21  ;;  %4813 = vmatpush3.bf16.xpose.msra.mxu1 %v6125_v22 }
  0x8a   : > { %4794 = vmatprep.subr.bf16.mxu0 %v5892_v0  ;;  %4814 = vmatprep.subr.bf16.mxu1 %v5892_v0 }
  0x91   : > { %4795 = vmatpush3.bf16.xpose.msra.mxu0 %v6134_v23  ;;  %4815 = vmatpush3.bf16.xpose.msra.mxu1 %v6137_v24 }
  0x92   : > { %4796 = vmatprep.subr.bf16.mxu0 %v5892_v0  ;;  %4816 = vmatprep.subr.bf16.mxu1 %v5892_v0 }
  0x99   : > { %4797 = vmatpush3.bf16.xpose.msra.mxu0 %v6144_v25  ;;  %4817 = vmatpush3.bf16.xpose.msra.mxu1 %v6147_v26 }
  0x9a   : > { %4798 = vmatprep.subr.bf16.mxu0 %v5892_v0  ;;  %4818 = vmatprep.subr.bf16.mxu1 %v5892_v0 }
  0xa1   : > { %4799 = vmatpush3.bf16.xpose.msra.mxu0 %v6154_v27  ;;  %4819 = vmatpush3.bf16.xpose.msra.mxu1 %v6157_v28 }
  0xa2   : > { %4800 = vmatprep.subr.bf16.mxu0 %v5892_v0  ;;  %4820 = vmatprep.subr.bf16.mxu1 %v5892_v0 }
  0xa9   : > { %4801 = vmatpush3.bf16.xpose.msra.mxu0 %v6164_v29  ;;  %4821 = vmatpush3.bf16.xpose.msra.mxu1 %v6167_v30 }
  0xaa   : > { %4802 = vmatprep.subr.bf16.mxu0 %v5892_v0  ;;  %4822 = vmatprep.subr.bf16.mxu1 %v5892_v0 }
  0xb1   : > { %4803 = vmatpush3.bf16.xpose.msra.mxu0 %v6174_v31  ;;  %4823 = vmatpush3.bf16.xpose.msra.mxu1 %v6177_v32 }
  0xb2   : > { %4804 = vmatprep.subr.bf16.mxu0 %v5892_v0  ;;  %4824 = vmatprep.subr.bf16.mxu1 %v5892_v0 }
  0xb9   : > { %4805 = vmatpush3.bf16.xpose.msra.mxu0 %v6184_v33  ;;  %4825 = vmatpush3.bf16.xpose.msra.mxu1 %v6187_v34 }
  0xba   : > { %4830 = vmatprep.subr.bf16.mxu0 %v5892_v0  ;;  %4850 = vmatprep.subr.bf16.mxu1 %v5892_v0 }
  0xc0   : > { %4807 = vmatmul.mubr.bf16.vlgmr.msra.gmra.mrb[4].mxu0 %v5581_v35  ;;  %4827 = vmatmul.mubr.bf16.vlgmr.msra.gmra.mrb[4].mxu1 %v5582_v36  ;;  %v6407_v35 = vld [vmem:[%s6047_s10 + $0x250] sm:$0xff]  }
  0xc1   : > { %4831 = vmatpush3.bf16.xpose.msra.mxu0 %v6200_v37  ;;  %4851 = vmatpush3.bf16.xpose.msra.mxu1 %v6203_v38  ;;  %7757 = vst [vmem:[#allocation14_spill] sm:$0xff] %v6407_v35 }
  0xc2   : > { %4832 = vmatprep.subr.bf16.mxu0 %v5892_v0  ;;  %4852 = vmatprep.subr.bf16.mxu1 %v5892_v0 }
  0xc3   : > { %4846 = vmatprep.mubr.msk.bf16.mxu0 %vm5893_vm0, %v5892_v0  ;;  %4866 = vmatprep.mubr.msk.bf16.mxu1 %vm5893_vm0, %v5892_v0 }
  0xc9   : > { %4833 = vmatpush3.bf16.xpose.msra.mxu0 %v6214_v39  ;;  %4853 = vmatpush3.bf16.xpose.msra.mxu1 %v6217_v40 }
  0xca   : > { %4834 = vmatprep.subr.bf16.mxu0 %v5892_v0  ;;  %4854 = vmatprep.subr.bf16.mxu1 %v5892_v0 }
  0xd1   : > { %4835 = vmatpush3.bf16.xpose.msra.mxu0 %v6224_v41  ;;  %4855 = vmatpush3.bf16.xpose.msra.mxu1 %v6227_v42 }
  0xd2   : > { %4836 = vmatprep.subr.bf16.mxu0 %v5892_v0  ;;  %4856 = vmatprep.subr.bf16.mxu1 %v5892_v0 }
  0xd9   : > { %4837 = vmatpush3.bf16.xpose.msra.mxu0 %v6234_v43  ;;  %4857 = vmatpush3.bf16.xpose.msra.mxu1 %v6237_v44 }
  0xda   : > { %4838 = vmatprep.subr.bf16.mxu0 %v5892_v0  ;;  %4858 = vmatprep.subr.bf16.mxu1 %v5892_v0 }
  0xe1   : > { %4839 = vmatpush3.bf16.xpose.msra.mxu0 %v6244_v45  ;;  %4859 = vmatpush3.bf16.xpose.msra.mxu1 %v6247_v46 }
  0xe2   : > { %4840 = vmatprep.subr.bf16.mxu0 %v5892_v0  ;;  %4860 = vmatprep.subr.bf16.mxu1 %v5892_v0 }
  0xe9   : > { %4841 = vmatpush3.bf16.xpose.msra.mxu0 %v6254_v47  ;;  %4861 = vmatpush3.bf16.xpose.msra.mxu1 %v6257_v48 }
  0xea   : > { %4842 = vmatprep.subr.bf16.mxu0 %v5892_v0  ;;  %4862 = vmatprep.subr.bf16.mxu1 %v5892_v0 }
  0xf1   : > { %4843 = vmatpush3.bf16.xpose.msra.mxu0 %v6264_v49  ;;  %4863 = vmatpush3.bf16.xpose.msra.mxu1 %v6267_v50 }
  0xf2   : > { %4844 = vmatprep.subr.bf16.mxu0 %v5892_v0  ;;  %4864 = vmatprep.subr.bf16.mxu1 %v5892_v0 }
  0xf9   : > { %4845 = vmatpush3.bf16.xpose.msra.mxu0 %v6274_v51  ;;  %4865 = vmatpush3.bf16.xpose.msra.mxu1 %v6277_v52 }
  0xfa   : > { %4870 = vmatprep.subr.bf16.mxu0 %v5892_v0  ;;  %4890 = vmatprep.subr.bf16.mxu1 %v5892_v0 }
 0x100   : > { %4847 = vmatmul.mubr.bf16.vlgmr.msra.gmra.mrb[8].mxu0 %v5599_v53  ;;  %4867 = vmatmul.mubr.bf16.vlgmr.msra.gmra.mrb[8].mxu1 %v5600_v54 }
 0x101   : > { %4871 = vmatpush3.bf16.xpose.msra.mxu0 %v6290_v55  ;;  %4891 = vmatpush3.bf16.xpose.msra.mxu1 %v6293_v56 }
 0x102   : > { %4872 = vmatprep.subr.bf16.mxu0 %v5892_v0  ;;  %4892 = vmatprep.subr.bf16.mxu1 %v5892_v0 }
 0x103   : > { %4886 = vmatprep.mubr.msk.bf16.mxu0 %vm5893_vm0, %v5892_v0  ;;  %4906 = vmatprep.mubr.msk.bf16.mxu1 %vm5893_vm0, %v5892_v0 }
 0x109   : > { %4873 = vmatpush3.bf16.xpose.msra.mxu0 %v6304_v57  ;;  %4893 = vmatpush3.bf16.xpose.msra.mxu1 %v6307_v58 }
 0x10a   : > { %4874 = vmatprep.subr.bf16.mxu0 %v5892_v0  ;;  %4894 = vmatprep.subr.bf16.mxu1 %v5892_v0 }
 0x111   : > { %4875 = vmatpush3.bf16.xpose.msra.mxu0 %v6314_v59  ;;  %4895 = vmatpush3.bf16.xpose.msra.mxu1 %v6317_v60 }
 0x112   : > { %4876 = vmatprep.subr.bf16.mxu0 %v5892_v0  ;;  %4896 = vmatprep.subr.bf16.mxu1 %v5892_v0 }
 0x119   : > { %4877 = vmatpush3.bf16.xpose.msra.mxu0 %v6324_v61  ;;  %4897 = vmatpush3.bf16.xpose.msra.mxu1 %v6327_v62 }
 0x11a   : > { %4878 = vmatprep.subr.bf16.mxu0 %v5892_v0  ;;  %4898 = vmatprep.subr.bf16.mxu1 %v5892_v0 }
 0x121   : > { %4879 = vmatpush3.bf16.xpose.msra.mxu0 %v6334_v63  ;;  %4899 = vmatpush3.bf16.xpose.msra.mxu1 %v6337_v1 }
 0x122   : > { %4880 = vmatprep.subr.bf16.mxu0 %v5892_v0  ;;  %4900 = vmatprep.subr.bf16.mxu1 %v5892_v0 }
 0x129   : > { %4881 = vmatpush3.bf16.xpose.msra.mxu0 %v6344_v2  ;;  %4901 = vmatpush3.bf16.xpose.msra.mxu1 %v6347_v3 }
 0x12a   : > { %4882 = vmatprep.subr.bf16.mxu0 %v5892_v0  ;;  %4902 = vmatprep.subr.bf16.mxu1 %v5892_v0 }
 0x131   : > { %4883 = vmatpush3.bf16.xpose.msra.mxu0 %v6354_v4  ;;  %4903 = vmatpush3.bf16.xpose.msra.mxu1 %v6357_v5 }
 0x132   : > { %4884 = vmatprep.subr.bf16.mxu0 %v5892_v0  ;;  %4904 = vmatprep.subr.bf16.mxu1 %v5892_v0 }
 0x139   : > { %4885 = vmatpush3.bf16.xpose.msra.mxu0 %v6364_v6  ;;  %4905 = vmatpush3.bf16.xpose.msra.mxu1 %v6367_v7 }
 0x13a   : > { %4910 = vmatprep.subr.bf16.mxu0 %v5892_v0  ;;  %4930 = vmatprep.subr.bf16.mxu1 %v5892_v0 }
 0x140   : > { %4887 = vmatmul.mubr.bf16.vlgmr.msra.gmra.mrb[12].mxu0 %v5617_v8  ;;  %4907 = vmatmul.mubr.bf16.vlgmr.msra.gmra.mrb[12].mxu1 %v5618_v9 }
 0x141   : > { %4911 = vmatpush3.bf16.xpose.msra.mxu0 %v6380_v10  ;;  %4931 = vmatpush3.bf16.xpose.msra.mxu1 %v6383_v11 }
 0x142   : > { %4912 = vmatprep.subr.bf16.mxu0 %v5892_v0  ;;  %4932 = vmatprep.subr.bf16.mxu1 %v5892_v0 }
 0x143   : > { %4926 = vmatprep.mubr.msk.bf16.mxu0 %vm5893_vm0, %v5892_v0  ;;  %4946 = vmatprep.mubr.msk.bf16.mxu1 %vm5893_vm0, %v5892_v0 }
 0x149   : > { %4913 = vmatpush3.bf16.xpose.msra.mxu0 %v6394_v12  ;;  %4933 = vmatpush3.bf16.xpose.msra.mxu1 %v6397_v17  ;;  %v6420_v17 = vld [vmem:[%s6047_s10 + $0x218] sm:$0xff]  }
 0x14a   : > { %4914 = vmatprep.subr.bf16.mxu0 %v5892_v0  ;;  %4934 = vmatprep.subr.bf16.mxu1 %v5892_v0  ;;  %7761 = vst [vmem:[#allocation18_spill] sm:$0xff] %v6420_v17  ;;  %v6425_v12 = vld [vmem:[%s6047_s10 + $0x258] sm:$0xff]  }
 0x14b   : > { %7763 = vst [vmem:[#allocation20_spill] sm:$0xff] %v6425_v12 }
 0x151   : > { %4915 = vmatpush3.bf16.xpose.msra.mxu0 %v6404_v18  ;;  %4935 = vmatpush3.bf16.xpose.msra.mxu1 %v6407_v35 }
 0x152   : > { %4916 = vmatprep.subr.bf16.mxu0 %v5892_v0  ;;  %4936 = vmatprep.subr.bf16.mxu1 %v5892_v0 }
 0x153   : > { %v6412_v36 = vpop.f32.mrb[0].mxu0  ;;  %v6415_v54 = vpop.f32.mrb[0].mxu1 }
 0x154   : > { %7758 = vst [vmem:[#allocation15_spill] sm:$0xff] %v6412_v36  ;;  %v4768_v53 = vpop.f32.mrb[1].mxu0  ;;  %7759 = vst [vmem:[#allocation16_spill] sm:$0xff] %v6415_v54  ;;  %v4788_v9 = vpop.f32.mrb[1].mxu1  ;;  %v6462_v54 = vld [vmem:[%s6047_s10 + $0x238] sm:$0xff]  }
 0x155   : > { %v6417_v8 = vpop.f32.mrb[2].mxu0  ;;  %v6422_v35 = vpop.f32.mrb[2].mxu1  ;;  %v6432_v53 = vld [vmem:[%s6047_s10 + $0x220] sm:$0xff]   ;;  %7770 = vst [vmem:[#allocation27_spill] sm:$0xff] %v6462_v54  ;;  %v6465_v36 = vld [vmem:[%s6047_s10 + $0x278] sm:$0xff]  }
 0x156   : > { %7760 = vst [vmem:[#allocation17_spill] sm:$0xff] %v6417_v8  ;;  %v4769_v18 = vpop.f32.mrb[3].mxu0  ;;  %7762 = vst [vmem:[#allocation19_spill] sm:$0xff] %v6422_v35  ;;  %v4789_v11 = vpop.f32.mrb[3].mxu1  ;;  %v6435_v9 = vld [vmem:[%s6047_s10 + $0x260] sm:$0xff]   ;;  %v6452_v35 = vld [vmem:[%s6047_s10 + $0x230] sm:$0xff]  }
 0x157   : > { %7764 = vst [vmem:[#allocation21_spill] sm:$0xff] %v6432_v53  ;;  %7765 = vst [vmem:[#allocation22_spill] sm:$0xff] %v6435_v9  ;;  %v6442_v11 = vld [vmem:[%s6047_s10 + $0x228] sm:$0xff]   ;;  %v6455_v8 = vld [vmem:[%s6047_s10 + $0x270] sm:$0xff]  }
 0x158   : > { %7766 = vst [vmem:[#allocation23_spill] sm:$0xff] %v6442_v11  ;;  %v6445_v18 = vld [vmem:[%s6047_s10 + $0x268] sm:$0xff]   ;;  %7768 = vst [vmem:[#allocation25_spill] sm:$0xff] %v6452_v35 }
 0x159   : > { %4917 = vmatpush3.bf16.xpose.msra.mxu0 %v6420_v17  ;;  %4937 = vmatpush3.bf16.xpose.msra.mxu1 %v6425_v12  ;;  %7767 = vst [vmem:[#allocation24_spill] sm:$0xff] %v6445_v18  ;;  %7769 = vst [vmem:[#allocation26_spill] sm:$0xff] %v6455_v8  ;;  %v6523_v12 = vld [vmem:[%s6047_s10 + $0x2d8] sm:$0xff]  }
 0x15a   : > { %4918 = vmatprep.subr.bf16.mxu0 %v5892_v0  ;;  %4938 = vmatprep.subr.bf16.mxu1 %v5892_v0  ;;  %7771 = vst [vmem:[#allocation28_spill] sm:$0xff] %v6465_v36  ;;  %7782 = vst [vmem:[#allocation39_spill] sm:$0xff] %v6523_v12 }
 0x161   : > { %4919 = vmatpush3.bf16.xpose.msra.mxu0 %v6432_v53  ;;  %4939 = vmatpush3.bf16.xpose.msra.mxu1 %v6435_v9  ;;  %v6518_v53 = vld [vmem:[%s6047_s10 + $0x298] sm:$0xff]  }
 0x162   : > { %4920 = vmatprep.subr.bf16.mxu0 %v5892_v0  ;;  %4940 = vmatprep.subr.bf16.mxu1 %v5892_v0 }
 0x169   : > { %4921 = vmatpush3.bf16.xpose.msra.mxu0 %v6442_v11  ;;  %4941 = vmatpush3.bf16.xpose.msra.mxu1 %v6445_v18  ;;  %v6478_v18 = vld [vmem:[%s6047_s10 + $0x280] sm:$0xff]   ;;  %v6495_v11 = vld [vmem:[%s6047_s10 + $0x2c8] sm:$0xff]  }
 0x16a   : > { %4922 = vmatprep.subr.bf16.mxu0 %v5892_v0  ;;  %4942 = vmatprep.subr.bf16.mxu1 %v5892_v0  ;;  %7772 = vst [vmem:[#allocation29_spill] sm:$0xff] %v6478_v18  ;;  %7775 = vst [vmem:[#allocation32_spill] sm:$0xff] %v6495_v11 }
 0x171   : > { %4923 = vmatpush3.bf16.xpose.msra.mxu0 %v6452_v35  ;;  %4943 = vmatpush3.bf16.xpose.msra.mxu1 %v6455_v8  ;;  %v5635_v8 = vld [vmem:[%s7695_s1 + $0x40] sm:$0xff]   ;;  %v5636_v35 = vld [vmem:[%s7695_s1 + $0x48] sm:$0xff]  }
 0x172   : > { %4924 = vmatprep.subr.bf16.mxu0 %v5892_v0  ;;  %4944 = vmatprep.subr.bf16.mxu1 %v5892_v0 }
 0x179   : > { %4925 = vmatpush3.bf16.xpose.msra.mxu0 %v6462_v54  ;;  %4945 = vmatpush3.bf16.xpose.msra.mxu1 %v6465_v36  ;;  %v6481_v54 = vld [vmem:[%s6047_s10 + $0x2c0] sm:$0xff]   ;;  %v6492_v36 = vld [vmem:[%s6047_s10 + $0x288] sm:$0xff]  }
 0x17a   : > { %4950 = vmatprep.subr.bf16.mxu0 %v5892_v0  ;;  %4970 = vmatprep.subr.bf16.mxu1 %v5892_v0  ;;  %7773 = vst [vmem:[#allocation30_spill] sm:$0xff] %v6481_v54  ;;  %7774 = vst [vmem:[#allocation31_spill] sm:$0xff] %v6492_v36 }
 0x180   : > { %4927 = vmatmul.mubr.bf16.vlgmr.msra.gmra.mrb[16].mxu0 %v5635_v8  ;;  %4947 = vmatmul.mubr.bf16.vlgmr.msra.gmra.mrb[16].mxu1 %v5636_v35  ;;  %v6502_v35 = vld [vmem:[%s6047_s10 + $0x290] sm:$0xff]  }
 0x181   : > { %4951 = vmatpush3.bf16.xpose.msra.mxu0 %v6478_v18  ;;  %4971 = vmatpush3.bf16.xpose.msra.mxu1 %v6481_v54  ;;  %7776 = vst [vmem:[#allocation33_spill] sm:$0xff] %v6502_v35  ;;  %v6505_v8 = vld [vmem:[%s6047_s10 + $0x2d0] sm:$0xff]  }
 0x182   : > { %4952 = vmatprep.subr.bf16.mxu0 %v5892_v0  ;;  %4972 = vmatprep.subr.bf16.mxu1 %v5892_v0  ;;  %7777 = vst [vmem:[#allocation34_spill] sm:$0xff] %v6505_v8 }
 0x183   : > { %4966 = vmatprep.mubr.msk.bf16.mxu0 %vm5893_vm0, %v5892_v0  ;;  %4986 = vmatprep.mubr.msk.bf16.mxu1 %vm5893_vm0, %v5892_v0 }
 0x189   : > { %4953 = vmatpush3.bf16.xpose.msra.mxu0 %v6492_v36  ;;  %4973 = vmatpush3.bf16.xpose.msra.mxu1 %v6495_v11 }
 0x18a   : > { %4954 = vmatprep.subr.bf16.mxu0 %v5892_v0  ;;  %4974 = vmatprep.subr.bf16.mxu1 %v5892_v0 }
 0x191   : > { %4955 = vmatpush3.bf16.xpose.msra.mxu0 %v6502_v35  ;;  %4975 = vmatpush3.bf16.xpose.msra.mxu1 %v6505_v8 }
 0x192   : > { %4956 = vmatprep.subr.bf16.mxu0 %v5892_v0  ;;  %4976 = vmatprep.subr.bf16.mxu1 %v5892_v0 }
 0x193   : > { %v6510_v54 = vpop.f32.mrb[4].mxu0  ;;  %v6513_v36 = vpop.f32.mrb[4].mxu1 }
 0x194   : > { %7778 = vst [vmem:[#allocation35_spill] sm:$0xff] %v6510_v54  ;;  %v4808_v11 = vpop.f32.mrb[5].mxu0  ;;  %7779 = vst [vmem:[#allocation36_spill] sm:$0xff] %v6513_v36  ;;  %v4828_v9 = vpop.f32.mrb[5].mxu1  ;;  %v6553_v36 = vld [vmem:[%s6047_s10 + $0x2f0] sm:$0xff]   ;;  %v6563_v54 = vld [vmem:[%s6047_s10 + $0x2f8] sm:$0xff]  }
 0x195   : > { %v6515_v18 = vpop.f32.mrb[6].mxu0  ;;  %v6520_v8 = vpop.f32.mrb[6].mxu1  ;;  %v6530_v9 = vld [vmem:[%s6047_s10 + $0x2a0] sm:$0xff]   ;;  %7788 = vst [vmem:[#allocation45_spill] sm:$0xff] %v6553_v36  ;;  %7790 = vst [vmem:[#allocation47_spill] sm:$0xff] %v6563_v54 }
 0x196   : > { %7780 = vst [vmem:[#allocation37_spill] sm:$0xff] %v6515_v18  ;;  %v4809_v35 = vpop.f32.mrb[7].mxu0  ;;  %7781 = vst [vmem:[#allocation38_spill] sm:$0xff] %v6520_v8  ;;  %v4829_v17 = vpop.f32.mrb[7].mxu1  ;;  %v6533_v11 = vld [vmem:[%s6047_s10 + $0x2e0] sm:$0xff]   ;;  %v6550_v8 = vld [vmem:[%s6047_s10 + $0x2b0] sm:$0xff]  }
 0x197   : > { %7783 = vst [vmem:[#allocation40_spill] sm:$0xff] %v6530_v9  ;;  %7784 = vst [vmem:[#allocation41_spill] sm:$0xff] %v6533_v11  ;;  %v6540_v17 = vld [vmem:[%s6047_s10 + $0x2a8] sm:$0xff]   ;;  %v6560_v18 = vld [vmem:[%s6047_s10 + $0x2b8] sm:$0xff]  }
 0x198   : > { %7785 = vst [vmem:[#allocation42_spill] sm:$0xff] %v6540_v17  ;;  %v6543_v35 = vld [vmem:[%s6047_s10 + $0x2e8] sm:$0xff]   ;;  %7787 = vst [vmem:[#allocation44_spill] sm:$0xff] %v6550_v8 }
 0x199   : > { %4957 = vmatpush3.bf16.xpose.msra.mxu0 %v6518_v53  ;;  %4977 = vmatpush3.bf16.xpose.msra.mxu1 %v6523_v12  ;;  %7786 = vst [vmem:[#allocation43_spill] sm:$0xff] %v6543_v35  ;;  %7789 = vst [vmem:[#allocation46_spill] sm:$0xff] %v6560_v18  ;;  %v6618_v12 = vld [vmem:[%s6047_s10 + $0x18] sm:$0xff]  }
 0x19a   : > { %4958 = vmatprep.subr.bf16.mxu0 %v5892_v0  ;;  %4978 = vmatprep.subr.bf16.mxu1 %v5892_v0 }
 0x1a1   : > { %4959 = vmatpush3.bf16.xpose.msra.mxu0 %v6530_v9  ;;  %4979 = vmatpush3.bf16.xpose.msra.mxu1 %v6533_v11 }
 0x1a2   : > { %4960 = vmatprep.subr.bf16.mxu0 %v5892_v0  ;;  %4980 = vmatprep.subr.bf16.mxu1 %v5892_v0 }
 0x1a9   : > { %4961 = vmatpush3.bf16.xpose.msra.mxu0 %v6540_v17  ;;  %4981 = vmatpush3.bf16.xpose.msra.mxu1 %v6543_v35 }
 0x1aa   : > { %4962 = vmatprep.subr.bf16.mxu0 %v5892_v0  ;;  %4982 = vmatprep.subr.bf16.mxu1 %v5892_v0 }
 0x1b1   : > { %4963 = vmatpush3.bf16.xpose.msra.mxu0 %v6550_v8  ;;  %4983 = vmatpush3.bf16.xpose.msra.mxu1 %v6553_v36  ;;  %v5653_v36 = vld [vmem:[%s7695_s1 + $0x50] sm:$0xff]   ;;  %v5654_v8 = vld [vmem:[%s7695_s1 + $0x58] sm:$0xff]  }
 0x1b2   : > { %4964 = vmatprep.subr.bf16.mxu0 %v5892_v0  ;;  %4984 = vmatprep.subr.bf16.mxu1 %v5892_v0 }
 0x1b9   : > { %4965 = vmatpush3.bf16.xpose.msra.mxu0 %v6560_v18  ;;  %4985 = vmatpush3.bf16.xpose.msra.mxu1 %v6563_v54  ;;  %v6576_v18 = vld [vmem:[%s6047_s10] sm:$0xff]  }
 0x1ba   : > { %4990 = vmatprep.subr.bf16.mxu0 %v5892_v0  ;;  %5010 = vmatprep.subr.bf16.mxu1 %v5892_v0  ;;  %7791 = vst [vmem:[#allocation48_spill] sm:$0xff] %v6576_v18  ;;  %v6580_v54 = vld [vmem:[%s6047_s10 + $0x40] sm:$0xff]  }
 0x1bb   : > { %7792 = vst [vmem:[#allocation49_spill] sm:$0xff] %v6580_v54 }
 0x1c0   : > { %4967 = vmatmul.mubr.bf16.vlgmr.msra.gmra.mrb[20].mxu0 %v5653_v36  ;;  %4987 = vmatmul.mubr.bf16.vlgmr.msra.gmra.mrb[20].mxu1 %v5654_v8  ;;  %v6590_v36 = vld [vmem:[%s6047_s10 + $0x8] sm:$0xff]  }
 0x1c1   : > { %4991 = vmatpush3.bf16.xpose.msra.mxu0 %v6576_v18  ;;  %5011 = vmatpush3.bf16.xpose.msra.mxu1 %v6580_v54  ;;  %7793 = vst [vmem:[#allocation50_spill] sm:$0xff] %v6590_v36  ;;  %v6594_v8 = vld [vmem:[%s6047_s10 + $0x48] sm:$0xff]   ;;  %v6600_v54 = vld [vmem:[%s6047_s10 + $0x10] sm:$0xff]  }
 0x1c2   : > { %4992 = vmatprep.subr.bf16.mxu0 %v5892_v0  ;;  %5012 = vmatprep.subr.bf16.mxu1 %v5892_v0  ;;  %7794 = vst [vmem:[#allocation51_spill] sm:$0xff] %v6594_v8  ;;  %7795 = vst [vmem:[#allocation52_spill] sm:$0xff] %v6600_v54  ;;  %v6604_v18 = vld [vmem:[%s6047_s10 + $0x50] sm:$0xff]  }
 0x1c3   : > { %5006 = vmatprep.mubr.msk.bf16.mxu0 %vm5893_vm0, %v5892_v0  ;;  %5026 = vmatprep.mubr.msk.bf16.mxu1 %vm5893_vm0, %v5892_v0  ;;  %7796 = vst [vmem:[#allocation53_spill] sm:$0xff] %v6604_v18 }
 0x1c9   : > { %4993 = vmatpush3.bf16.xpose.msra.mxu0 %v6590_v36  ;;  %5013 = vmatpush3.bf16.xpose.msra.mxu1 %v6594_v8 }
 0x1ca   : > { %4994 = vmatprep.subr.bf16.mxu0 %v5892_v0  ;;  %5014 = vmatprep.subr.bf16.mxu1 %v5892_v0 }
 0x1d1   : > { %4995 = vmatpush3.bf16.xpose.msra.mxu0 %v6600_v54  ;;  %5015 = vmatpush3.bf16.xpose.msra.mxu1 %v6604_v18 }
 0x1d2   : > { %4996 = vmatprep.subr.bf16.mxu0 %v5892_v0  ;;  %5016 = vmatprep.subr.bf16.mxu1 %v5892_v0 }
 0x1d3   : > { %v6608_v36 = vpop.f32.mrb[8].mxu0  ;;  %v6611_v35 = vpop.f32.mrb[8].mxu1 }
 0x1d4   : > { %7797 = vst [vmem:[#allocation54_spill] sm:$0xff] %v6608_v36  ;;  %v4848_v8 = vpop.f32.mrb[9].mxu0  ;;  %v4868_v11 = vpop.f32.mrb[9].mxu1  ;;  %v6622_v36 = vld [vmem:[%s6047_s10 + $0x58] sm:$0xff]  }
 0x1d5   : > { %v6613_v17 = vpop.f32.mrb[10].mxu0  ;;  %v6615_v9 = vpop.f32.mrb[10].mxu1  ;;  %v6628_v8 = vld [vmem:[%s6047_s10 + $0x20] sm:$0xff]   ;;  %v6642_v11 = vld [vmem:[%s6047_s10 + $0x68] sm:$0xff]  }
 0x1d6   : > { %v4849_v54 = vpop.f32.mrb[11].mxu0  ;;  %7798 = vst [vmem:[#allocation55_spill] sm:$0xff] %v6615_v9  ;;  %v4869_v18 = vpop.f32.mrb[11].mxu1  ;;  %v5655_v9 = vld [vmem:[%s7695_s1 + $0x60] sm:$0xff]  }
 0x1d7   : > { %v6632_v54 = vld [vmem:[%s6047_s10 + $0x60] sm:$0xff]   ;;  %v6638_v18 = vld [vmem:[%s6047_s10 + $0x28] sm:$0xff]  }
 0x1d9   : > { %4997 = vmatpush3.bf16.xpose.msra.mxu0 %v6618_v12  ;;  %5017 = vmatpush3.bf16.xpose.msra.mxu1 %v6622_v36 }
 0x1da   : > { %4998 = vmatprep.subr.bf16.mxu0 %v5892_v0  ;;  %5018 = vmatprep.subr.bf16.mxu1 %v5892_v0 }
 0x1e1   : > { %4999 = vmatpush3.bf16.xpose.msra.mxu0 %v6628_v8  ;;  %5019 = vmatpush3.bf16.xpose.msra.mxu1 %v6632_v54 }
 0x1e2   : > { %5000 = vmatprep.subr.bf16.mxu0 %v5892_v0  ;;  %5020 = vmatprep.subr.bf16.mxu1 %v5892_v0 }
 0x1e9   : > { %5001 = vmatpush3.bf16.xpose.msra.mxu0 %v6638_v18  ;;  %5021 = vmatpush3.bf16.xpose.msra.mxu1 %v6642_v11 }
 0x1ea   : > { %5002 = vmatprep.subr.bf16.mxu0 %v5892_v0  ;;  %5022 = vmatprep.subr.bf16.mxu1 %v5892_v0 }
 0x1f1   : > { %5003 = vmatpush3.bf16.xpose.msra.mxu0 %v6084_v13  ;;  %5023 = vmatpush3.bf16.xpose.msra.mxu1 %v6087_v14  ;;  %v5656_v13 = vld [vmem:[%s7695_s1 + $0x68] sm:$0xff]  }
 0x1f2   : > { %5004 = vmatprep.subr.bf16.mxu0 %v5892_v0  ;;  %5024 = vmatprep.subr.bf16.mxu1 %v5892_v0 }
 0x1f9   : > { %5005 = vmatpush3.bf16.xpose.msra.mxu0 %v6094_v15  ;;  %5025 = vmatpush3.bf16.xpose.msra.mxu1 %v6097_v16 }
 0x1fa   : > { %5030 = vmatprep.subr.bf16.mxu0 %v5892_v0  ;;  %5050 = vmatprep.subr.bf16.mxu1 %v5892_v0 }
 0x200   : > { %5007 = vmatmul.mubr.bf16.vlgmr.msra.gmra.mrb[24].mxu0 %v5655_v9  ;;  %5027 = vmatmul.mubr.bf16.vlgmr.msra.gmra.mrb[24].mxu1 %v5656_v13  ;;  %v5663_v13 = vld [vmem:[%s7695_s1 + $0xa0] sm:$0xff]  }
 0x201   : > { %5031 = vmatpush3.bf16.xpose.msra.mxu0 %v6110_v19  ;;  %5051 = vmatpush3.bf16.xpose.msra.mxu1 %v6113_v20 }
 0x202   : > { %5032 = vmatprep.subr.bf16.mxu0 %v5892_v0  ;;  %5052 = vmatprep.subr.bf16.mxu1 %v5892_v0 }
 0x203   : > { %5046 = vmatprep.mubr.msk.bf16.mxu0 %vm5893_vm0, %v5892_v0  ;;  %5066 = vmatprep.mubr.msk.bf16.mxu1 %vm5893_vm0, %v5892_v0 }
 0x209   : > { %5033 = vmatpush3.bf16.xpose.msra.mxu0 %v6120_v21  ;;  %5053 = vmatpush3.bf16.xpose.msra.mxu1 %v6125_v22 }
 0x20a   : > { %5034 = vmatprep.subr.bf16.mxu0 %v5892_v0  ;;  %5054 = vmatprep.subr.bf16.mxu1 %v5892_v0 }
 0x211   : > { %5035 = vmatpush3.bf16.xpose.msra.mxu0 %v6134_v23  ;;  %5055 = vmatpush3.bf16.xpose.msra.mxu1 %v6137_v24  ;;  %v5657_v23 = vld [vmem:[%s7695_s1 + $0x70] sm:$0xff]   ;;  %v5658_v24 = vld [vmem:[%s7695_s1 + $0x78] sm:$0xff]  }
 0x212   : > { %5036 = vmatprep.subr.bf16.mxu0 %v5892_v0  ;;  %5056 = vmatprep.subr.bf16.mxu1 %v5892_v0 }
 0x213   : > { %v6676_v14 = vpop.f32.mrb[12].mxu0  ;;  %v6679_v16 = vpop.f32.mrb[12].mxu1 }
 0x214   : > { %v4888_v15 = vpop.f32.mrb[13].mxu0  ;;  %v4908_v20 = vpop.f32.mrb[13].mxu1 }
 0x215   : > { %v6681_v19 = vpop.f32.mrb[14].mxu0  ;;  %v6683_v22 = vpop.f32.mrb[14].mxu1  ;;  %v5664_v15 = vld [vmem:[%s7695_s1 + $0xa8] sm:$0xff]   ;;  %v7814_v20 = vld [vmem:[#allocation29_spill] sm:$0xff] }
 0x216   : > { %v4889_v21 = vpop.f32.mrb[15].mxu0  ;;  %v4909_v9 = vpop.f32.mrb[15].mxu1 }
 0x217   : > { %v7815_v21 = vld [vmem:[#allocation30_spill] sm:$0xff]  ;;  %v7816_v9 = vld [vmem:[#allocation31_spill] sm:$0xff] }
 0x219   : > { %5037 = vmatpush3.bf16.xpose.msra.mxu0 %v6144_v25  ;;  %5057 = vmatpush3.bf16.xpose.msra.mxu1 %v6147_v26 }
 0x21a   : > { %5038 = vmatprep.subr.bf16.mxu0 %v5892_v0  ;;  %5058 = vmatprep.subr.bf16.mxu1 %v5892_v0 }
 0x221   : > { %5039 = vmatpush3.bf16.xpose.msra.mxu0 %v6154_v27  ;;  %5059 = vmatpush3.bf16.xpose.msra.mxu1 %v6157_v28 }
 0x222   : > { %5040 = vmatprep.subr.bf16.mxu0 %v5892_v0  ;;  %5060 = vmatprep.subr.bf16.mxu1 %v5892_v0 }
 0x229   : > { %5041 = vmatpush3.bf16.xpose.msra.mxu0 %v6164_v29  ;;  %5061 = vmatpush3.bf16.xpose.msra.mxu1 %v6167_v30 }
 0x22a   : > { %5042 = vmatprep.subr.bf16.mxu0 %v5892_v0  ;;  %5062 = vmatprep.subr.bf16.mxu1 %v5892_v0 }
 0x231   : > { %5043 = vmatpush3.bf16.xpose.msra.mxu0 %v6174_v31  ;;  %5063 = vmatpush3.bf16.xpose.msra.mxu1 %v6177_v32 }
 0x232   : > { %5044 = vmatprep.subr.bf16.mxu0 %v5892_v0  ;;  %5064 = vmatprep.subr.bf16.mxu1 %v5892_v0 }
 0x239   : > { %5045 = vmatpush3.bf16.xpose.msra.mxu0 %v6184_v33  ;;  %5065 = vmatpush3.bf16.xpose.msra.mxu1 %v6187_v34  ;;  %v5659_v33 = vld [vmem:[%s7695_s1 + $0x80] sm:$0xff]   ;;  %v5660_v34 = vld [vmem:[%s7695_s1 + $0x88] sm:$0xff]  }
 0x23a   : > { %5070 = vmatprep.subr.bf16.mxu0 %v5892_v0  ;;  %5090 = vmatprep.subr.bf16.mxu1 %v5892_v0 }
 0x240   : > { %5047 = vmatmul.mubr.bf16.vlgmr.msra.gmra.mrb[28].mxu0 %v5657_v23  ;;  %5067 = vmatmul.mubr.bf16.vlgmr.msra.gmra.mrb[28].mxu1 %v5658_v24  ;;  %v7817_v23 = vld [vmem:[#allocation32_spill] sm:$0xff]  ;;  %v7818_v24 = vld [vmem:[#allocation33_spill] sm:$0xff] }
 0x241   : > { %5071 = vmatpush3.bf16.xpose.msra.mxu0 %v6200_v37  ;;  %5091 = vmatpush3.bf16.xpose.msra.mxu1 %v6203_v38 }
 0x242   : > { %5072 = vmatprep.subr.bf16.mxu0 %v5892_v0  ;;  %5092 = vmatprep.subr.bf16.mxu1 %v5892_v0 }
 0x243   : > { %5086 = vmatprep.mubr.msk.bf16.mxu0 %vm5893_vm0, %v5892_v0  ;;  %5106 = vmatprep.mubr.msk.bf16.mxu1 %vm5893_vm0, %v5892_v0 }
 0x249   : > { %5073 = vmatpush3.bf16.xpose.msra.mxu0 %v6214_v39  ;;  %5093 = vmatpush3.bf16.xpose.msra.mxu1 %v6217_v40 }
 0x24a   : > { %5074 = vmatprep.subr.bf16.mxu0 %v5892_v0  ;;  %5094 = vmatprep.subr.bf16.mxu1 %v5892_v0 }
 0x251   : > { %5075 = vmatpush3.bf16.xpose.msra.mxu0 %v6224_v41  ;;  %5095 = vmatpush3.bf16.xpose.msra.mxu1 %v6227_v42 }
 0x252   : > { %5076 = vmatprep.subr.bf16.mxu0 %v5892_v0  ;;  %5096 = vmatprep.subr.bf16.mxu1 %v5892_v0 }
 0x253   : > { %v6726_v25 = vpop.f32.mrb[16].mxu0  ;;  %v6729_v27 = vpop.f32.mrb[16].mxu1 }
 0x254   : > { %v4928_v26 = vpop.f32.mrb[17].mxu0  ;;  %v4948_v29 = vpop.f32.mrb[17].mxu1 }
 0x255   : > { %v6731_v28 = vpop.f32.mrb[18].mxu0  ;;  %v6733_v31 = vpop.f32.mrb[18].mxu1  ;;  %v7819_v26 = vld [vmem:[#allocation34_spill] sm:$0xff] }
 0x256   : > { %v4929_v30 = vpop.f32.mrb[19].mxu0  ;;  %v4949_v32 = vpop.f32.mrb[19].mxu1 }
 0x259   : > { %5077 = vmatpush3.bf16.xpose.msra.mxu0 %v6234_v43  ;;  %5097 = vmatpush3.bf16.xpose.msra.mxu1 %v6237_v44 }
 0x25a   : > { %5078 = vmatprep.subr.bf16.mxu0 %v5892_v0  ;;  %5098 = vmatprep.subr.bf16.mxu1 %v5892_v0 }
 0x261   : > { %5079 = vmatpush3.bf16.xpose.msra.mxu0 %v6244_v45  ;;  %5099 = vmatpush3.bf16.xpose.msra.mxu1 %v6247_v46  ;;  %v5661_v45 = vld [vmem:[%s7695_s1 + $0x90] sm:$0xff]   ;;  %v5662_v46 = vld [vmem:[%s7695_s1 + $0x98] sm:$0xff]  }
 0x262   : > { %5080 = vmatprep.subr.bf16.mxu0 %v5892_v0  ;;  %5100 = vmatprep.subr.bf16.mxu1 %v5892_v0 }
 0x269   : > { %5081 = vmatpush3.bf16.xpose.msra.mxu0 %v6254_v47  ;;  %5101 = vmatpush3.bf16.xpose.msra.mxu1 %v6257_v48  ;;  %v7799_v47 = vld [vmem:[#allocation10_spill] sm:$0xff]  ;;  %v7800_v48 = vld [vmem:[#allocation11_spill] sm:$0xff] }
 0x26a   : > { %5082 = vmatprep.subr.bf16.mxu0 %v5892_v0  ;;  %5102 = vmatprep.subr.bf16.mxu1 %v5892_v0 }
 0x271   : > { %5083 = vmatpush3.bf16.xpose.msra.mxu0 %v6264_v49  ;;  %5103 = vmatpush3.bf16.xpose.msra.mxu1 %v6267_v50  ;;  %v7801_v49 = vld [vmem:[#allocation12_spill] sm:$0xff]  ;;  %v7802_v50 = vld [vmem:[#allocation13_spill] sm:$0xff] }
 0x272   : > { %5084 = vmatprep.subr.bf16.mxu0 %v5892_v0  ;;  %5104 = vmatprep.subr.bf16.mxu1 %v5892_v0 }
 0x279   : > { %5085 = vmatpush3.bf16.xpose.msra.mxu0 %v6274_v51  ;;  %5105 = vmatpush3.bf16.xpose.msra.mxu1 %v6277_v52  ;;  %v7803_v51 = vld [vmem:[#allocation14_spill] sm:$0xff] }
 0x27a   : > { %5110 = vmatprep.subr.bf16.mxu0 %v5892_v0  ;;  %5130 = vmatprep.subr.bf16.mxu1 %v5892_v0 }
 0x280   : > { %5087 = vmatmul.mubr.bf16.vlgmr.msra.gmra.mrb[32].mxu0 %v5659_v33  ;;  %5107 = vmatmul.mubr.bf16.vlgmr.msra.gmra.mrb[32].mxu1 %v5660_v34 }
 0x281   : > { %5111 = vmatpush3.bf16.xpose.msra.mxu0 %v6290_v55  ;;  %5131 = vmatpush3.bf16.xpose.msra.mxu1 %v6293_v56 }
 0x282   : > { %5112 = vmatprep.subr.bf16.mxu0 %v5892_v0  ;;  %5132 = vmatprep.subr.bf16.mxu1 %v5892_v0 }
 0x283   : > { %5126 = vmatprep.mubr.msk.bf16.mxu0 %vm5893_vm0, %v5892_v0  ;;  %5146 = vmatprep.mubr.msk.bf16.mxu1 %vm5893_vm0, %v5892_v0 }
 0x289   : > { %5113 = vmatpush3.bf16.xpose.msra.mxu0 %v6304_v57  ;;  %5133 = vmatpush3.bf16.xpose.msra.mxu1 %v6307_v58 }
 0x28a   : > { %5114 = vmatprep.subr.bf16.mxu0 %v5892_v0  ;;  %5134 = vmatprep.subr.bf16.mxu1 %v5892_v0 }
 0x291   : > { %5115 = vmatpush3.bf16.xpose.msra.mxu0 %v6314_v59  ;;  %5135 = vmatpush3.bf16.xpose.msra.mxu1 %v6317_v60 }
 0x292   : > { %5116 = vmatprep.subr.bf16.mxu0 %v5892_v0  ;;  %5136 = vmatprep.subr.bf16.mxu1 %v5892_v0 }
 0x293   : > { %v6776_v37 = vpop.f32.mrb[20].mxu0  ;;  %v6779_v39 = vpop.f32.mrb[20].mxu1 }
 0x294   : > { %v4968_v38 = vpop.f32.mrb[21].mxu0  ;;  %v4988_v41 = vpop.f32.mrb[21].mxu1 }
 0x295   : > { %v6781_v40 = vpop.f32.mrb[22].mxu0  ;;  %v6783_v43 = vpop.f32.mrb[22].mxu1 }
 0x296   : > { %v4969_v42 = vpop.f32.mrb[23].mxu0  ;;  %v4989_v44 = vpop.f32.mrb[23].mxu1 }
 0x297   : > { %v7820_v44 = vld [vmem:[#allocation39_spill] sm:$0xff] }
 0x299   : > { %5117 = vmatpush3.bf16.xpose.msra.mxu0 %v6324_v61  ;;  %5137 = vmatpush3.bf16.xpose.msra.mxu1 %v6327_v62  ;;  %v7804_v62 = vld [vmem:[#allocation18_spill] sm:$0xff] }
 0x29a   : > { %5118 = vmatprep.subr.bf16.mxu0 %v5892_v0  ;;  %5138 = vmatprep.subr.bf16.mxu1 %v5892_v0 }
 0x2a1   : > { %5119 = vmatpush3.bf16.xpose.msra.mxu0 %v6334_v63  ;;  %5139 = vmatpush3.bf16.xpose.msra.mxu1 %v6337_v1  ;;  %v7805_v63 = vld [vmem:[#allocation20_spill] sm:$0xff]  ;;  %v7806_v1 = vld [vmem:[#allocation21_spill] sm:$0xff] }
 0x2a2   : > { %5120 = vmatprep.subr.bf16.mxu0 %v5892_v0  ;;  %5140 = vmatprep.subr.bf16.mxu1 %v5892_v0 }
 0x2a9   : > { %5121 = vmatpush3.bf16.xpose.msra.mxu0 %v6344_v2  ;;  %5141 = vmatpush3.bf16.xpose.msra.mxu1 %v6347_v3  ;;  %v7807_v2 = vld [vmem:[#allocation22_spill] sm:$0xff]  ;;  %v7808_v3 = vld [vmem:[#allocation23_spill] sm:$0xff] }
 0x2aa   : > { %5122 = vmatprep.subr.bf16.mxu0 %v5892_v0  ;;  %5142 = vmatprep.subr.bf16.mxu1 %v5892_v0 }
 0x2b1   : > { %5123 = vmatpush3.bf16.xpose.msra.mxu0 %v6354_v4  ;;  %5143 = vmatpush3.bf16.xpose.msra.mxu1 %v6357_v5  ;;  %v7809_v4 = vld [vmem:[#allocation24_spill] sm:$0xff]  ;;  %v7810_v5 = vld [vmem:[#allocation25_spill] sm:$0xff] }
 0x2b2   : > { %5124 = vmatprep.subr.bf16.mxu0 %v5892_v0  ;;  %5144 = vmatprep.subr.bf16.mxu1 %v5892_v0 }
 0x2b9   : > { %5125 = vmatpush3.bf16.xpose.msra.mxu0 %v6364_v6  ;;  %5145 = vmatpush3.bf16.xpose.msra.mxu1 %v6367_v7  ;;  %v7811_v6 = vld [vmem:[#allocation26_spill] sm:$0xff]  ;;  %v7812_v7 = vld [vmem:[#allocation27_spill] sm:$0xff] }
 0x2ba   : > { %5150 = vmatprep.subr.bf16.mxu0 %v5892_v0  ;;  %5170 = vmatprep.subr.bf16.mxu1 %v5892_v0 }
 0x2c0   : > { %5127 = vmatmul.mubr.bf16.vlgmr.msra.gmra.mrb[36].mxu0 %v5661_v45  ;;  %5147 = vmatmul.mubr.bf16.vlgmr.msra.gmra.mrb[36].mxu1 %v5662_v46  ;;  %v7821_v45 = vld [vmem:[#allocation40_spill] sm:$0xff]  ;;  %v7822_v46 = vld [vmem:[#allocation41_spill] sm:$0xff] }
 0x2c1   : > { %5151 = vmatpush3.bf16.xpose.msra.mxu0 %v6380_v10  ;;  %5171 = vmatpush3.bf16.xpose.msra.mxu1 %v7799_v47  ;;  %v7813_v10 = vld [vmem:[#allocation28_spill] sm:$0xff]  ;;  %v7823_v47 = vld [vmem:[#allocation42_spill] sm:$0xff] }
 0x2c2   : > { %5152 = vmatprep.subr.bf16.mxu0 %v5892_v0  ;;  %5172 = vmatprep.subr.bf16.mxu1 %v5892_v0 }
 0x2c3   : > { %5166 = vmatprep.mubr.msk.bf16.mxu0 %vm5893_vm0, %v5892_v0  ;;  %5186 = vmatprep.mubr.msk.bf16.mxu1 %vm5893_vm0, %v5892_v0 }
 0x2c9   : > { %5153 = vmatpush3.bf16.xpose.msra.mxu0 %v7800_v48  ;;  %5173 = vmatpush3.bf16.xpose.msra.mxu1 %v7801_v49  ;;  %v7824_v48 = vld [vmem:[#allocation43_spill] sm:$0xff]  ;;  %v7826_v49 = vld [vmem:[#allocation45_spill] sm:$0xff] }
 0x2ca   : > { %5154 = vmatprep.subr.bf16.mxu0 %v5892_v0  ;;  %5174 = vmatprep.subr.bf16.mxu1 %v5892_v0 }
 0x2d1   : > { %5155 = vmatpush3.bf16.xpose.msra.mxu0 %v7802_v50  ;;  %5175 = vmatpush3.bf16.xpose.msra.mxu1 %v7803_v51  ;;  %v7827_v50 = vld [vmem:[#allocation46_spill] sm:$0xff]  ;;  %v7828_v51 = vld [vmem:[#allocation47_spill] sm:$0xff] }
 0x2d2   : > { %5156 = vmatprep.subr.bf16.mxu0 %v5892_v0  ;;  %5176 = vmatprep.subr.bf16.mxu1 %v5892_v0 }
 0x2d3   : > { %v1710_v52 = vpop.f32.mrb[24].mxu0  ;;  %v1757_v55 = vpop.f32.mrb[24].mxu1 }
 0x2d4   : > { %3165 = vrot.lane.b32.xlu0 %v1710_v52, %s5894_s12  ;;  %v5008_v56 = vpop.f32.mrb[25].mxu0  ;;  %3169 = vrot.lane.b32.xlu1 %v1757_v55, %s5894_s12  ;;  %v5028_v58 = vpop.f32.mrb[25].mxu1  ;;  %v5665_v52 = vld [vmem:[%s7695_s1 + $0xb0] sm:$0xff]   ;;  %v5666_v55 = vld [vmem:[%s7695_s1 + $0xb8] sm:$0xff]  }
 0x2d5   : > { %v1713_v57 = vpop.f32.mrb[26].mxu0  ;;  %v1760_v60 = vpop.f32.mrb[26].mxu1  ;;  %v7829_v56 = vld [vmem:[#allocation48_spill] sm:$0xff] }
 0x2d6   : > { %v5009_v59 = vpop.f32.mrb[27].mxu0  ;;  %v5029_v61 = vpop.f32.mrb[27].mxu1 }
 0x2d8   : > { %3167 = vrot.lane.b32.xlu0 %v1713_v57, %s5894_s12  ;;  %3171 = vrot.lane.b32.xlu1 %v1760_v60, %s5894_s12  ;;  %v7830_v57 = vld [vmem:[#allocation49_spill] sm:$0xff]  ;;  %v7831_v60 = vld [vmem:[#allocation15_spill] sm:$0xff] }
 0x2d9   : > { %5157 = vmatpush3.bf16.xpose.msra.mxu0 %v7804_v62  ;;  %5177 = vmatpush3.bf16.xpose.msra.mxu1 %v7805_v63  ;;  %v7832_v62 = vld [vmem:[#allocation50_spill] sm:$0xff]  ;;  %v7833_v63 = vld [vmem:[#allocation51_spill] sm:$0xff] }
 0x2da   : > { %5158 = vmatprep.subr.bf16.mxu0 %v5892_v0  ;;  %5178 = vmatprep.subr.bf16.mxu1 %v5892_v0 }
 0x2e1   : > { %5159 = vmatpush3.bf16.xpose.msra.mxu0 %v7806_v1  ;;  %5179 = vmatpush3.bf16.xpose.msra.mxu1 %v7807_v2  ;;  %v7834_v2 = vld [vmem:[#allocation16_spill] sm:$0xff] }
 0x2e2   : > { %5160 = vmatprep.subr.bf16.mxu0 %v5892_v0  ;;  %5180 = vmatprep.subr.bf16.mxu1 %v5892_v0 }
 0x2e9   : > { %5161 = vmatpush3.bf16.xpose.msra.mxu0 %v7808_v3  ;;  %5181 = vmatpush3.bf16.xpose.msra.mxu1 %v7809_v4  ;;  %v7835_v4 = vld [vmem:[#allocation17_spill] sm:$0xff] }
 0x2ea   : > { %5162 = vmatprep.subr.bf16.mxu0 %v5892_v0  ;;  %5182 = vmatprep.subr.bf16.mxu1 %v5892_v0 }
 0x2f1   : > { %5163 = vmatpush3.bf16.xpose.msra.mxu0 %v7810_v5  ;;  %5183 = vmatpush3.bf16.xpose.msra.mxu1 %v7811_v6 }
 0x2f2   : > { %5164 = vmatprep.subr.bf16.mxu0 %v5892_v0  ;;  %5184 = vmatprep.subr.bf16.mxu1 %v5892_v0 }
 0x2f9   : > { %5165 = vmatpush3.bf16.xpose.msra.mxu0 %v7812_v7  ;;  %5185 = vmatpush3.bf16.xpose.msra.mxu1 %v7813_v10  ;;  %v7836_v7 = vld [vmem:[#allocation19_spill] sm:$0xff] }
 0x2fa   : > { %5190 = vmatprep.subr.bf16.mxu0 %v5892_v0  ;;  %5210 = vmatprep.subr.bf16.mxu1 %v5892_v0 }
 0x300   : > { %5167 = vmatmul.mubr.bf16.vlgmr.msra.gmra.mrb[40].mxu0 %v5663_v13  ;;  %5187 = vmatmul.mubr.bf16.vlgmr.msra.gmra.mrb[40].mxu1 %v5664_v15  ;;  %v7837_v13 = vld [vmem:[#allocation52_spill] sm:$0xff]  ;;  %v7838_v15 = vld [vmem:[#allocation53_spill] sm:$0xff] }
 0x301   : > { %5191 = vmatpush3.bf16.xpose.msra.mxu0 %v7814_v20  ;;  %5211 = vmatpush3.bf16.xpose.msra.mxu1 %v7815_v21 }
 0x302   : > { %5192 = vmatprep.subr.bf16.mxu0 %v5892_v0  ;;  %5212 = vmatprep.subr.bf16.mxu1 %v5892_v0 }
 0x303   : > { %5206 = vmatprep.mubr.msk.bf16.mxu0 %vm5893_vm0, %v5892_v0  ;;  %5226 = vmatprep.mubr.msk.bf16.mxu1 %vm5893_vm0, %v5892_v0 }
 0x309   : > { %5193 = vmatpush3.bf16.xpose.msra.mxu0 %v7816_v9  ;;  %5213 = vmatpush3.bf16.xpose.msra.mxu1 %v7817_v23 }
 0x30a   : > { %5194 = vmatprep.subr.bf16.mxu0 %v5892_v0  ;;  %5214 = vmatprep.subr.bf16.mxu1 %v5892_v0 }
 0x311   : > { %5195 = vmatpush3.bf16.xpose.msra.mxu0 %v7818_v24  ;;  %5215 = vmatpush3.bf16.xpose.msra.mxu1 %v7819_v26 }
 0x312   : > { %5196 = vmatprep.subr.bf16.mxu0 %v5892_v0  ;;  %5216 = vmatprep.subr.bf16.mxu1 %v5892_v0 }
 0x313   : > { %v1804_v29 = vpop.f32.mrb[28].mxu0  ;;  %v1851_v32 = vpop.f32.mrb[28].mxu1 }
 0x314   : > { %3173 = vrot.lane.b32.xlu0 %v1804_v29, %s5894_s12  ;;  %v5048_v30 = vpop.f32.mrb[29].mxu0  ;;  %v5068_v34 = vpop.f32.mrb[29].mxu1 }
 0x315   : > { %v1807_v33 = vpop.f32.mrb[30].mxu0  ;;  %v1854_v41 = vpop.f32.mrb[30].mxu1 }
 0x316   : > { %3175 = vrot.lane.b32.xlu1 %v1807_v33, %s5894_s12  ;;  %v5049_v38 = vpop.f32.mrb[31].mxu0  ;;  %v5069_v42 = vpop.f32.mrb[31].mxu1  ;;  %v5696_v33 = vld [vmem:[%s6047_s10 + $0xc0] sm:$0xff]  }
 0x317   : > { %v7839_v38 = vld [vmem:[#allocation35_spill] sm:$0xff] }
 0x318   : > { %3177 = vrot.lane.b32.xlu0 %v1851_v32, %s5894_s12  ;;  %v5695_v32 = vld [vmem:[%s6047_s10 + $0x80] sm:$0xff]  }
 0x319   : > { %5197 = vmatpush3.bf16.xpose.msra.mxu0 %v6518_v53  ;;  %5217 = vmatpush3.bf16.xpose.msra.mxu1 %v7820_v44  ;;  %v7825_v53 = vld [vmem:[#allocation44_spill] sm:$0xff]  ;;  %v7840_v44 = vld [vmem:[#allocation37_spill] sm:$0xff] }
 0x31a   : > { %3179 = vrot.lane.b32.xlu1 %v1854_v41, %s5894_s12  ;;  %5198 = vmatprep.subr.bf16.mxu0 %v5892_v0 }
 0x31b   : > { %5218 = vmatprep.subr.bf16.mxu1 %v5892_v0 }
 0x321   : > { %5199 = vmatpush3.bf16.xpose.msra.mxu0 %v7821_v45  ;;  %5219 = vmatpush3.bf16.xpose.msra.mxu1 %v7822_v46  ;;  %v5697_v46 = vld [vmem:[%s6047_s10 + $0x88] sm:$0xff]  }
 0x322   : > { %5200 = vmatprep.subr.bf16.mxu0 %v5892_v0  ;;  %5220 = vmatprep.subr.bf16.mxu1 %v5892_v0 }
 0x329   : > { %5201 = vmatpush3.bf16.xpose.msra.mxu0 %v7823_v47  ;;  %5221 = vmatpush3.bf16.xpose.msra.mxu1 %v7824_v48  ;;  %v5698_v47 = vld [vmem:[%s6047_s10 + $0xc8] sm:$0xff]  }
 0x32a   : > { %5202 = vmatprep.subr.bf16.mxu0 %v5892_v0  ;;  %5222 = vmatprep.subr.bf16.mxu1 %v5892_v0 }
 0x331   : > { %5203 = vmatpush3.bf16.xpose.msra.mxu0 %v7825_v53  ;;  %5223 = vmatpush3.bf16.xpose.msra.mxu1 %v7826_v49  ;;  %v7841_v53 = vld [vmem:[#allocation36_spill] sm:$0xff] }
 0x332   : > { %5204 = vmatprep.subr.bf16.mxu0 %v5892_v0  ;;  %5224 = vmatprep.subr.bf16.mxu1 %v5892_v0 }
 0x339   : > { %5205 = vmatpush3.bf16.xpose.msra.mxu0 %v7827_v50  ;;  %5225 = vmatpush3.bf16.xpose.msra.mxu1 %v7828_v51  ;;  %v7842_v51 = vld [vmem:[#allocation38_spill] sm:$0xff] }
 0x33a   : > { %5230 = vmatprep.subr.bf16.mxu0 %v5892_v0  ;;  %5250 = vmatprep.subr.bf16.mxu1 %v5892_v0 }
 0x340   : > { %5207 = vmatmul.mubr.bf16.vlgmr.msra.gmra.mrb[44].mxu0 %v5665_v52  ;;  %5227 = vmatmul.mubr.bf16.vlgmr.msra.gmra.mrb[44].mxu1 %v5666_v55  ;;  %v5699_v55 = vld [vmem:[%s6047_s10 + $0x90] sm:$0xff]  }
 0x341   : > { %5231 = vmatpush3.bf16.xpose.msra.mxu0 %v7829_v56  ;;  %5251 = vmatpush3.bf16.xpose.msra.mxu1 %v7830_v57  ;;  %v5700_v56 = vld [vmem:[%s6047_s10 + $0xd0] sm:$0xff]  }
 0x342   : > { %5232 = vmatprep.subr.bf16.mxu0 %v5892_v0  ;;  %5252 = vmatprep.subr.bf16.mxu1 %v5892_v0 }
 0x343   : > { %5246 = vmatprep.mubr.msk.bf16.mxu0 %vm5893_vm0, %v5892_v0  ;;  %5266 = vmatprep.mubr.msk.bf16.mxu1 %vm5893_vm0, %v5892_v0 }
 0x346   : > { %v3166_v58 = vpop.permute.xlu0 %3165  ;;  %v3170_v59 = vpop.permute.xlu1 %3169 }
 0x347   : > { %v6912_v61 = vadd.f32 %v3166_v58, %v7831_v60  ;;  %v6920_v3 = vadd.f32 %v3170_v59, %v7834_v2 }
 0x349   : > { %5233 = vmatpush3.bf16.xpose.msra.mxu0 %v7832_v62  ;;  %3551 = vrot.lane.b32.xlu1 %v6912_v61, %s5895_s27 }
 0x34a   : > { %5253 = vmatpush3.bf16.xpose.msra.mxu1 %v7833_v63  ;;  %v3168_v1 = vpop.permute.xlu0 %3167  ;;  %5234 = vmatprep.subr.bf16.mxu0 %v5892_v0  ;;  %v3172_v6 = vpop.permute.xlu1 %3171 }
 0x34b   : > { %v6923_v5 = vadd.f32 %v3168_v1, %v7835_v4  ;;  %5254 = vmatprep.subr.bf16.mxu1 %v5892_v0  ;;  %v6931_v10 = vadd.f32 %v3172_v6, %v7836_v7 }
 0x34d   : > { %3553 = vrot.lane.b32.xlu0 %v6923_v5, %s5895_s27  ;;  %3555 = vrot.lane.b32.xlu1 %v6920_v3, %s5895_s27 }
 0x351   : > { %5235 = vmatpush3.bf16.xpose.msra.mxu0 %v7837_v13  ;;  %3557 = vrot.lane.b32.xlu1 %v6931_v10, %s5895_s27 }
 0x352   : > { %5255 = vmatpush3.bf16.xpose.msra.mxu1 %v7838_v15  ;;  %5236 = vmatprep.subr.bf16.mxu0 %v5892_v0  ;;  %v5701_v15 = vld [vmem:[%s6047_s10 + $0x98] sm:$0xff]  }
 0x353   : > { %v1898_v20 = vpop.f32.mrb[32].mxu0  ;;  %5256 = vmatprep.subr.bf16.mxu1 %v5892_v0  ;;  %v1945_v9 = vpop.f32.mrb[32].mxu1 }
 0x354   : > { %3181 = vrot.lane.b32.xlu0 %v1898_v20, %s5894_s12  ;;  %v5088_v21 = vpop.f32.mrb[33].mxu0  ;;  %v5108_v24 = vpop.f32.mrb[33].mxu1  ;;  %v5702_v20 = vld [vmem:[%s6047_s10 + $0xd8] sm:$0xff]  }
 0x355   : > { %v1901_v23 = vpop.f32.mrb[34].mxu0  ;;  %v1948_v29 = vpop.f32.mrb[34].mxu1  ;;  %v5703_v21 = vld [vmem:[%s6047_s10 + $0xa0] sm:$0xff]   ;;  %v5706_v24 = vld [vmem:[%s6047_s10 + $0xe8] sm:$0xff]  }
 0x356   : > { %3183 = vrot.lane.b32.xlu1 %v1901_v23, %s5894_s12  ;;  %v5089_v26 = vpop.f32.mrb[35].mxu0  ;;  %v5109_v30 = vpop.f32.mrb[35].mxu1  ;;  %v5705_v23 = vld [vmem:[%s6047_s10 + $0xa8] sm:$0xff]  }
 0x357   : > { %v5707_v26 = vld [vmem:[%s6047_s10 + $0xb0] sm:$0xff]   ;;  %v5709_v30 = vld [vmem:[%s6047_s10 + $0xb8] sm:$0xff]  }
 0x358   : > { %3185 = vrot.lane.b32.xlu0 %v1945_v9, %s5894_s12  ;;  %v5704_v9 = vld [vmem:[%s6047_s10 + $0xe0] sm:$0xff]  }
 0x359   : > { %5237 = vmatpush3.bf16.xpose.msra.mxu0 %v6618_v12  ;;  %v5691_v12 = vld [vmem:[%s6047_s10 + $0x30] sm:$0xff]  }
 0x35a   : > { %5257 = vmatpush3.bf16.xpose.msra.mxu1 %v6622_v36  ;;  %3187 = vrot.lane.b32.xlu1 %v1948_v29, %s5894_s12  ;;  %v5692_v36 = vld [vmem:[%s6047_s10 + $0x70] sm:$0xff]  }
 0x35b   : > { %5238 = vmatprep.subr.bf16.mxu0 %v5892_v0  ;;  %5258 = vmatprep.subr.bf16.mxu1 %v5892_v0  ;;  %v5708_v29 = vld [vmem:[%s6047_s10 + $0xf0] sm:$0xff]  }
 0x361   : > { %5239 = vmatpush3.bf16.xpose.msra.mxu0 %v6628_v8  ;;  %v5693_v8 = vld [vmem:[%s6047_s10 + $0x38] sm:$0xff]  }
 0x362   : > { %5259 = vmatpush3.bf16.xpose.msra.mxu1 %v6632_v54  ;;  %5240 = vmatprep.subr.bf16.mxu0 %v5892_v0  ;;  %v5694_v54 = vld [vmem:[%s6047_s10 + $0x78] sm:$0xff]  }
 0x363   : > { %5260 = vmatprep.subr.bf16.mxu1 %v5892_v0 }
 0x369   : > { %5241 = vmatpush3.bf16.xpose.msra.mxu0 %v6638_v18  ;;  %v5667_v18 = vld [vmem:[%s7695_s1 + $0xc0] sm:$0xff]  }
 0x36a   : > { %5261 = vmatpush3.bf16.xpose.msra.mxu1 %v6642_v11  ;;  %5242 = vmatprep.subr.bf16.mxu0 %v5892_v0  ;;  %v5668_v11 = vld [vmem:[%s7695_s1 + $0xc8] sm:$0xff]  }
 0x36b   : > { %5262 = vmatprep.subr.bf16.mxu1 %v5892_v0 }
 0x371   : > { %5243 = vmatpush3.bf16.xpose.msra.mxu0 %v5691_v12  ;;  %v5710_v12 = vld [vmem:[%s6047_s10 + $0xf8] sm:$0xff]  }
 0x372   : > { %5263 = vmatpush3.bf16.xpose.msra.mxu1 %v5692_v36  ;;  %5244 = vmatprep.subr.bf16.mxu0 %v5892_v0 }
 0x373   : > { %5264 = vmatprep.subr.bf16.mxu1 %v5892_v0 }
 0x379   : > { %5245 = vmatpush3.bf16.xpose.msra.mxu0 %v5693_v8  ;;  %v5669_v8 = vld [vmem:[%s7695_s1 + $0xd0] sm:$0xff]  }
 0x37a   : > { %5265 = vmatpush3.bf16.xpose.msra.mxu1 %v5694_v54  ;;  %5270 = vmatprep.subr.bf16.mxu0 %v5892_v0  ;;  %v5670_v54 = vld [vmem:[%s7695_s1 + $0xd8] sm:$0xff]  }
 0x37b   : > { %5290 = vmatprep.subr.bf16.mxu1 %v5892_v0 }
 0x380   : > { %5247 = vmatmul.mubr.bf16.vlgmr.msra.gmra.mrb[48].mxu0 %v5667_v18 }
 0x381   : > { %5271 = vmatpush3.bf16.xpose.msra.mxu0 %v5695_v32  ;;  %5267 = vmatmul.mubr.bf16.vlgmr.msra.gmra.mrb[48].mxu1 %v5668_v11  ;;  %v5711_v32 = vld [vmem:[%s6047_s10 + $0x100] sm:$0xff]  }
 0x382   : > { %5291 = vmatpush3.bf16.xpose.msra.mxu1 %v5696_v33  ;;  %5272 = vmatprep.subr.bf16.mxu0 %v5892_v0  ;;  %v5712_v33 = vld [vmem:[%s6047_s10 + $0x140] sm:$0xff]  }
 0x383   : > { %5292 = vmatprep.subr.bf16.mxu1 %v5892_v0  ;;  %5286 = vmatprep.mubr.msk.bf16.mxu0 %vm5893_vm0, %v5892_v0 }
 0x384   : > { %5306 = vmatprep.mubr.msk.bf16.mxu1 %vm5893_vm0, %v5892_v0 }
 0x386   : > { %v3174_v34 = vpop.permute.xlu0 %3173 }
 0x387   : > { %v6978_v41 = vadd.f32 %v3174_v34, %v7839_v38 }
 0x388   : > { %v3176_v42 = vpop.permute.xlu1 %3175 }
 0x389   : > { %v6981_v45 = vadd.f32 %v3176_v42, %v7840_v44  ;;  %5273 = vmatpush3.bf16.xpose.msra.mxu0 %v5697_v46  ;;  %3559 = vrot.lane.b32.xlu0 %v6978_v41, %s5895_s27  ;;  %v7843_v46 = vld [vmem:[#allocation54_spill] sm:$0xff] }
 0x38a   : > { %5293 = vmatpush3.bf16.xpose.msra.mxu1 %v5698_v47  ;;  %v3178_v48 = vpop.permute.xlu0 %3177  ;;  %5274 = vmatprep.subr.bf16.mxu0 %v5892_v0 }
 0x38b   : > { %v6989_v49 = vadd.f32 %v3178_v48, %v7841_v53  ;;  %3561 = vrot.lane.b32.xlu1 %v6981_v45, %s5895_s27  ;;  %5294 = vmatprep.subr.bf16.mxu1 %v5892_v0 }
 0x38c   : > { %v3180_v50 = vpop.permute.xlu1 %3179 }
 0x38d   : > { %v6995_v52 = vadd.f32 %v3180_v50, %v7842_v51  ;;  %3563 = vrot.lane.b32.xlu0 %v6989_v49, %s5895_s27 }
 0x38f   : > { %3565 = vrot.lane.b32.xlu1 %v6995_v52, %s5895_s27 }
 0x391   : > { %5275 = vmatpush3.bf16.xpose.msra.mxu0 %v5699_v55  ;;  %v5713_v55 = vld [vmem:[%s6047_s10 + $0x108] sm:$0xff]  }
 0x392   : > { %5295 = vmatpush3.bf16.xpose.msra.mxu1 %v5700_v56  ;;  %5276 = vmatprep.subr.bf16.mxu0 %v5892_v0 }
 0x393   : > { %v1992_v57 = vpop.f32.mrb[36].mxu0  ;;  %5296 = vmatprep.subr.bf16.mxu1 %v5892_v0  ;;  %v2039_v59 = vpop.f32.mrb[36].mxu1 }
 0x394   : > { %3189 = vrot.lane.b32.xlu0 %v1992_v57, %s5894_s12  ;;  %v5128_v58 = vpop.f32.mrb[37].mxu0  ;;  %v5148_v63 = vpop.f32.mrb[37].mxu1  ;;  %v5714_v57 = vld [vmem:[%s6047_s10 + $0x148] sm:$0xff]  }
 0x395   : > { %v1995_v62 = vpop.f32.mrb[38].mxu0  ;;  %v2042_v6 = vpop.f32.mrb[38].mxu1 }
 0x396   : > { %3191 = vrot.lane.b32.xlu1 %v1995_v62, %s5894_s12  ;;  %v5129_v1 = vpop.f32.mrb[39].mxu0  ;;  %v5149_v13 = vpop.f32.mrb[39].mxu1  ;;  %v7844_v62 = vld [vmem:[#allocation55_spill] sm:$0xff] }
 0x397   : > { %v5715_v1 = vld [vmem:[%s6047_s10 + $0x110] sm:$0xff]  }
 0x398   : > { %3193 = vrot.lane.b32.xlu0 %v2039_v59, %s5894_s12 }
 0x399   : > { %5277 = vmatpush3.bf16.xpose.msra.mxu0 %v5701_v15 }
 0x39a   : > { %5297 = vmatpush3.bf16.xpose.msra.mxu1 %v5702_v20  ;;  %3195 = vrot.lane.b32.xlu1 %v2042_v6, %s5894_s12  ;;  %v5716_v6 = vld [vmem:[%s6047_s10 + $0x150] sm:$0xff]  }
 0x39b   : > { %5278 = vmatprep.subr.bf16.mxu0 %v5892_v0  ;;  %5298 = vmatprep.subr.bf16.mxu1 %v5892_v0 }
 0x3a1   : > { %5279 = vmatpush3.bf16.xpose.msra.mxu0 %v5703_v21 }
 0x3a2   : > { %5299 = vmatpush3.bf16.xpose.msra.mxu1 %v5704_v9  ;;  %5280 = vmatprep.subr.bf16.mxu0 %v5892_v0 }
 0x3a3   : > { %5300 = vmatprep.subr.bf16.mxu1 %v5892_v0 }
 0x3a9   : > { %5281 = vmatpush3.bf16.xpose.msra.mxu0 %v5705_v23 }
 0x3aa   : > { %5301 = vmatpush3.bf16.xpose.msra.mxu1 %v5706_v24  ;;  %5282 = vmatprep.subr.bf16.mxu0 %v5892_v0 }
 0x3ab   : > { %5302 = vmatprep.subr.bf16.mxu1 %v5892_v0 }
 0x3b1   : > { %5283 = vmatpush3.bf16.xpose.msra.mxu0 %v5707_v26 }
 0x3b2   : > { %5303 = vmatpush3.bf16.xpose.msra.mxu1 %v5708_v29  ;;  %5284 = vmatprep.subr.bf16.mxu0 %v5892_v0  ;;  %v5717_v29 = vld [vmem:[%s6047_s10 + $0x118] sm:$0xff]  }
 0x3b3   : > { %5304 = vmatprep.subr.bf16.mxu1 %v5892_v0 }
 0x3b9   : > { %5285 = vmatpush3.bf16.xpose.msra.mxu0 %v5709_v30  ;;  %v5718_v30 = vld [vmem:[%s6047_s10 + $0x158] sm:$0xff]  }
 0x3ba   : > { %5305 = vmatpush3.bf16.xpose.msra.mxu1 %v5710_v12  ;;  %5310 = vmatprep.subr.bf16.mxu0 %v5892_v0  ;;  %v5719_v12 = vld [vmem:[%s6047_s10 + $0x120] sm:$0xff]  }
 0x3bb   : > { %v3552_v36 = vpop.permute.xlu1 %3551  ;;  %5330 = vmatprep.subr.bf16.mxu1 %v5892_v0 }
 0x3bc   : > { %v5720_v36 = vld [vmem:[%s6047_s10 + $0x160] sm:$0xff]  }
 0x3bf   : > { %v3554_v18 = vpop.permute.xlu0 %3553  ;;  %v3556_v11 = vpop.permute.xlu1 %3555 }
 0x3c0   : > { %5287 = vmatmul.mubr.bf16.vlgmr.msra.gmra.mrb[52].mxu0 %v5669_v8  ;;  %v5721_v8 = vld [vmem:[%s6047_s10 + $0x128] sm:$0xff]   ;;  %v5723_v18 = vld [vmem:[%s6047_s10 + $0x130] sm:$0xff]  }
 0x3c1   : > { %5307 = vmatmul.mubr.bf16.vlgmr.msra.gmra.mrb[52].mxu1 %v5670_v54  ;;  %5311 = vmatpush3.bf16.xpose.msra.mxu0 %v5711_v32  ;;  %v5722_v54 = vld [vmem:[%s6047_s10 + $0x168] sm:$0xff]   ;;  %v5724_v11 = vld [vmem:[%s6047_s10 + $0x170] sm:$0xff]   ;;  %v5725_v32 = vld [vmem:[%s6047_s10 + $0x138] sm:$0xff]  }
 0x3c2   : > { %5331 = vmatpush3.bf16.xpose.msra.mxu1 %v5712_v33  ;;  %5312 = vmatprep.subr.bf16.mxu0 %v5892_v0  ;;  %v5726_v33 = vld [vmem:[%s6047_s10 + $0x178] sm:$0xff]  }
 0x3c3   : > { %v3558_v34 = vpop.permute.xlu1 %3557  ;;  %5332 = vmatprep.subr.bf16.mxu1 %v5892_v0  ;;  %5326 = vmatprep.mubr.msk.bf16.mxu0 %vm5893_vm0, %v5892_v0 }
 0x3c4   : > { %5346 = vmatprep.mubr.msk.bf16.mxu1 %vm5893_vm0, %v5892_v0 }
 0x3c6   : > { %v3182_v42 = vpop.permute.xlu0 %3181 }
 0x3c7   : > { %v7044_v47 = vadd.f32 %v3182_v42, %v7843_v46  ;;  %v5671_v42 = vld [vmem:[%s7695_s1 + $0xe0] sm:$0xff]  }
 0x3c8   : > { %v3184_v48 = vpop.permute.xlu1 %3183 }
 0x3c9   : > { %v7047_v50 = vadd.f32 %v3184_v48, %v6613_v17  ;;  %3567 = vrot.lane.b32.xlu0 %v7044_v47, %s5895_s27  ;;  %5313 = vmatpush3.bf16.xpose.msra.mxu0 %v5713_v55  ;;  %v5672_v55 = vld [vmem:[%s7695_s1 + $0xe8] sm:$0xff]  }
 0x3ca   : > { %v3186_v56 = vpop.permute.xlu0 %3185  ;;  %5333 = vmatpush3.bf16.xpose.msra.mxu1 %v5714_v57  ;;  %5314 = vmatprep.subr.bf16.mxu0 %v5892_v0 }
 0x3cb   : > { %v7055_v58 = vadd.f32 %v3186_v56, %v6611_v35  ;;  %3569 = vrot.lane.b32.xlu1 %v7047_v50, %s5895_s27  ;;  %5334 = vmatprep.subr.bf16.mxu1 %v5892_v0 }
 0x3cc   : > { %v3188_v59 = vpop.permute.xlu1 %3187 }
 0x3cd   : > { %v7061_v63 = vadd.f32 %v3188_v59, %v7844_v62  ;;  %3571 = vrot.lane.b32.xlu0 %v7055_v58, %s5895_s27  ;;  %v5727_v59 = vld [vmem:[%s6047_s10 + $0x180] sm:$0xff]  }
 0x3cf   : > { %3573 = vrot.lane.b32.xlu1 %v7061_v63, %s5895_s27 }
 0x3d1   : > { %5315 = vmatpush3.bf16.xpose.msra.mxu0 %v5715_v1  ;;  %v5728_v1 = vld [vmem:[%s6047_s10 + $0x1c0] sm:$0xff]  }
 0x3d2   : > { %5335 = vmatpush3.bf16.xpose.msra.mxu1 %v5716_v6  ;;  %5316 = vmatprep.subr.bf16.mxu0 %v5892_v0 }
 0x3d3   : > { %v2086_v13 = vpop.f32.mrb[40].mxu0  ;;  %5336 = vmatprep.subr.bf16.mxu1 %v5892_v0  ;;  %v2133_v20 = vpop.f32.mrb[40].mxu1 }
 0x3d4   : > { %3197 = vrot.lane.b32.xlu0 %v2086_v13, %s5894_s12  ;;  %v5168_v15 = vpop.f32.mrb[41].mxu0  ;;  %v5188_v9 = vpop.f32.mrb[41].mxu1 }
 0x3d5   : > { %v2089_v21 = vpop.f32.mrb[42].mxu0  ;;  %v2136_v24 = vpop.f32.mrb[42].mxu1 }
 0x3d6   : > { %3199 = vrot.lane.b32.xlu1 %v2089_v21, %s5894_s12  ;;  %v5169_v23 = vpop.f32.mrb[43].mxu0  ;;  %v5189_v26 = vpop.f32.mrb[43].mxu1  ;;  %v5729_v21 = vld [vmem:[%s6047_s10 + $0x188] sm:$0xff]  }
 0x3d7   : > { %v5730_v23 = vld [vmem:[%s6047_s10 + $0x1c8] sm:$0xff]  }
 0x3d8   : > { %3201 = vrot.lane.b32.xlu0 %v2133_v20, %s5894_s12 }
 0x3d9   : > { %5317 = vmatpush3.bf16.xpose.msra.mxu0 %v5717_v29 }
 0x3da   : > { %3203 = vrot.lane.b32.xlu1 %v2136_v24, %s5894_s12  ;;  %5337 = vmatpush3.bf16.xpose.msra.mxu1 %v5718_v30  ;;  %v5731_v30 = vld [vmem:[%s6047_s10 + $0x190] sm:$0xff]  }
 0x3db   : > { %5318 = vmatprep.subr.bf16.mxu0 %v5892_v0  ;;  %5338 = vmatprep.subr.bf16.mxu1 %v5892_v0 }
 0x3e1   : > { %5319 = vmatpush3.bf16.xpose.msra.mxu0 %v5719_v12  ;;  %v5732_v12 = vld [vmem:[%s6047_s10 + $0x1d0] sm:$0xff]  }
 0x3e2   : > { %5339 = vmatpush3.bf16.xpose.msra.mxu1 %v5720_v36  ;;  %5320 = vmatprep.subr.bf16.mxu0 %v5892_v0 }
 0x3e3   : > { %5340 = vmatprep.subr.bf16.mxu1 %v5892_v0 }
 0x3e9   : > { %5321 = vmatpush3.bf16.xpose.msra.mxu0 %v5721_v8 }
 0x3ea   : > { %5341 = vmatpush3.bf16.xpose.msra.mxu1 %v5722_v54  ;;  %5322 = vmatprep.subr.bf16.mxu0 %v5892_v0 }
 0x3eb   : > { %5342 = vmatprep.subr.bf16.mxu1 %v5892_v0 }
 0x3f1   : > { %5323 = vmatpush3.bf16.xpose.msra.mxu0 %v5723_v18 }
 0x3f2   : > { %5343 = vmatpush3.bf16.xpose.msra.mxu1 %v5724_v11  ;;  %5324 = vmatprep.subr.bf16.mxu0 %v5892_v0 }
 0x3f3   : > { %5344 = vmatprep.subr.bf16.mxu1 %v5892_v0 }
 0x3f9   : > { %5325 = vmatpush3.bf16.xpose.msra.mxu0 %v5725_v32 }
 0x3fa   : > { %5345 = vmatpush3.bf16.xpose.msra.mxu1 %v5726_v33  ;;  %5350 = vmatprep.subr.bf16.mxu0 %v5892_v0 }
 0x3fb   : > { %v3560_v34 = vpop.permute.xlu0 %3559  ;;  %5370 = vmatprep.subr.bf16.mxu1 %v5892_v0 }
 0x3fd   : > { %v3562_v48 = vpop.permute.xlu1 %3561 }
 0x3fe   : > { %v5734_v48 = vld [vmem:[%s6047_s10 + $0x1d8] sm:$0xff]  }
 0x3ff   : > { %v3564_v56 = vpop.permute.xlu0 %3563 }
 0x400   : > { %5327 = vmatmul.mubr.bf16.vlgmr.msra.gmra.mrb[56].mxu0 %v5671_v42  ;;  %v5733_v42 = vld [vmem:[%s6047_s10 + $0x198] sm:$0xff]   ;;  %v5736_v56 = vld [vmem:[%s6047_s10 + $0x1e0] sm:$0xff]  }
 0x401   : > { %v3566_v57 = vpop.permute.xlu1 %3565  ;;  %5347 = vmatmul.mubr.bf16.vlgmr.msra.gmra.mrb[56].mxu1 %v5672_v55  ;;  %5351 = vmatpush3.bf16.xpose.msra.mxu0 %v5727_v59  ;;  %v5735_v55 = vld [vmem:[%s6047_s10 + $0x1a0] sm:$0xff]   ;;  %v5738_v59 = vld [vmem:[%s6047_s10 + $0x1e8] sm:$0xff]  }
 0x402   : > { %5371 = vmatpush3.bf16.xpose.msra.mxu1 %v5728_v1  ;;  %5352 = vmatprep.subr.bf16.mxu0 %v5892_v0  ;;  %v5737_v57 = vld [vmem:[%s6047_s10 + $0x1a8] sm:$0xff]   ;;  %v5739_v1 = vld [vmem:[%s6047_s10 + $0x1b0] sm:$0xff]  }
 0x403   : > { %5372 = vmatprep.subr.bf16.mxu1 %v5892_v0  ;;  %5366 = vmatprep.mubr.msk.bf16.mxu0 %vm5893_vm0, %v5892_v0 }
 0x404   : > { %5386 = vmatprep.mubr.msk.bf16.mxu1 %vm5893_vm0, %v5892_v0 }
 0x406   : > { %v3190_v6 = vpop.permute.xlu0 %3189 }
 0x407   : > { %v7110_v13 = vadd.f32 %v3190_v6, %v6676_v14  ;;  %v5740_v6 = vld [vmem:[%s6047_s10 + $0x1f0] sm:$0xff]  }
 0x408   : > { %v3192_v15 = vpop.permute.xlu1 %3191 }
 0x409   : > { %v7113_v20 = vadd.f32 %v3192_v15, %v6681_v19  ;;  %3575 = vrot.lane.b32.xlu0 %v7110_v13, %s5895_s27  ;;  %5353 = vmatpush3.bf16.xpose.msra.mxu0 %v5729_v21  ;;  %v5741_v15 = vld [vmem:[%s6047_s10 + $0x1b8] sm:$0xff]  }
 0x40a   : > { %v3194_v9 = vpop.permute.xlu0 %3193  ;;  %5373 = vmatpush3.bf16.xpose.msra.mxu1 %v5730_v23  ;;  %5354 = vmatprep.subr.bf16.mxu0 %v5892_v0  ;;  %v5742_v21 = vld [vmem:[%s6047_s10 + $0x1f8] sm:$0xff]   ;;  %v5673_v23 = vld [vmem:[%s7695_s1 + $0xf0] sm:$0xff]  }
 0x40b   : > { %v7121_v24 = vadd.f32 %v3194_v9, %v6679_v16  ;;  %3577 = vrot.lane.b32.xlu1 %v7113_v20, %s5895_s27  ;;  %5374 = vmatprep.subr.bf16.mxu1 %v5892_v0 }
 0x40c   : > { %v3196_v26 = vpop.permute.xlu1 %3195 }
 0x40d   : > { %v7127_v29 = vadd.f32 %v3196_v26, %v6683_v22  ;;  %3579 = vrot.lane.b32.xlu0 %v7121_v24, %s5895_s27 }
 0x40f   : > { %3581 = vrot.lane.b32.xlu1 %v7127_v29, %s5895_s27 }
 0x411   : > { %5355 = vmatpush3.bf16.xpose.msra.mxu0 %v5731_v30  ;;  %v5674_v30 = vld [vmem:[%s7695_s1 + $0xf8] sm:$0xff]  }
 0x412   : > { %5375 = vmatpush3.bf16.xpose.msra.mxu1 %v5732_v12  ;;  %5356 = vmatprep.subr.bf16.mxu0 %v5892_v0 }
 0x413   : > { %v2180_v36 = vpop.f32.mrb[44].mxu0  ;;  %5376 = vmatprep.subr.bf16.mxu1 %v5892_v0  ;;  %v2227_v54 = vpop.f32.mrb[44].mxu1 }
 0x414   : > { %3205 = vrot.lane.b32.xlu0 %v2180_v36, %s5894_s12  ;;  %v5208_v8 = vpop.f32.mrb[45].mxu0  ;;  %v5228_v11 = vpop.f32.mrb[45].mxu1 }
 0x415   : > { %v2183_v18 = vpop.f32.mrb[46].mxu0  ;;  %v2230_v33 = vpop.f32.mrb[46].mxu1  ;;  %v5743_v8 = vld [vmem:[%s6047_s10 + $0x200] sm:$0xff]  }
 0x416   : > { %3207 = vrot.lane.b32.xlu1 %v2183_v18, %s5894_s12  ;;  %v5209_v32 = vpop.f32.mrb[47].mxu0  ;;  %v5229_v34 = vpop.f32.mrb[47].mxu1 }
 0x417   : > { %v5745_v34 = vld [vmem:[%s6047_s10 + $0x208] sm:$0xff]  }
 0x418   : > { %3209 = vrot.lane.b32.xlu0 %v2227_v54, %s5894_s12  ;;  %v5744_v54 = vld [vmem:[%s6047_s10 + $0x240] sm:$0xff]  }
 0x419   : > { %5357 = vmatpush3.bf16.xpose.msra.mxu0 %v5733_v42 }
 0x41a   : > { %3211 = vrot.lane.b32.xlu1 %v2230_v33, %s5894_s12  ;;  %5377 = vmatpush3.bf16.xpose.msra.mxu1 %v5734_v48  ;;  %v5746_v48 = vld [vmem:[%s6047_s10 + $0x248] sm:$0xff]  }
 0x41b   : > { %5358 = vmatprep.subr.bf16.mxu0 %v5892_v0  ;;  %5378 = vmatprep.subr.bf16.mxu1 %v5892_v0 }
 0x421   : > { %5359 = vmatpush3.bf16.xpose.msra.mxu0 %v5735_v55 }
 0x422   : > { %5379 = vmatpush3.bf16.xpose.msra.mxu1 %v5736_v56  ;;  %5360 = vmatprep.subr.bf16.mxu0 %v5892_v0 }
 0x423   : > { %5380 = vmatprep.subr.bf16.mxu1 %v5892_v0 }
 0x429   : > { %5361 = vmatpush3.bf16.xpose.msra.mxu0 %v5737_v57 }
 0x42a   : > { %5381 = vmatpush3.bf16.xpose.msra.mxu1 %v5738_v59  ;;  %5362 = vmatprep.subr.bf16.mxu0 %v5892_v0  ;;  %v5747_v59 = vld [vmem:[%s6047_s10 + $0x210] sm:$0xff]  }
 0x42b   : > { %5382 = vmatprep.subr.bf16.mxu1 %v5892_v0 }
 0x431   : > { %5363 = vmatpush3.bf16.xpose.msra.mxu0 %v5739_v1  ;;  %v5748_v1 = vld [vmem:[%s6047_s10 + $0x250] sm:$0xff]  }
 0x432   : > { %5383 = vmatpush3.bf16.xpose.msra.mxu1 %v5740_v6  ;;  %5364 = vmatprep.subr.bf16.mxu0 %v5892_v0 }
 0x433   : > { %5384 = vmatprep.subr.bf16.mxu1 %v5892_v0 }
 0x439   : > { %5365 = vmatpush3.bf16.xpose.msra.mxu0 %v5741_v15 }
 0x43a   : > { %5385 = vmatpush3.bf16.xpose.msra.mxu1 %v5742_v21  ;;  %5390 = vmatprep.subr.bf16.mxu0 %v5892_v0 }
 0x43b   : > { %v3568_v9 = vpop.permute.xlu0 %3567  ;;  %5410 = vmatprep.subr.bf16.mxu1 %v5892_v0 }
 0x43d   : > { %v3570_v26 = vpop.permute.xlu1 %3569 }
 0x43f   : > { %v3572_v12 = vpop.permute.xlu0 %3571 }
 0x440   : > { %5367 = vmatmul.mubr.bf16.vlgmr.msra.gmra.mrb[60].mxu0 %v5673_v23 }
 0x441   : > { %v3574_v36 = vpop.permute.xlu1 %3573  ;;  %5387 = vmatmul.mubr.bf16.vlgmr.msra.gmra.mrb[60].mxu1 %v5674_v30  ;;  %5391 = vmatpush3.bf16.xpose.msra.mxu0 %v5743_v8  ;;  %v5750_v8 = vld [vmem:[%s6047_s10 + $0x258] sm:$0xff]  }
 0x442   : > { %5411 = vmatpush3.bf16.xpose.msra.mxu1 %v5744_v54  ;;  %5392 = vmatprep.subr.bf16.mxu0 %v5892_v0  ;;  %v5749_v36 = vld [vmem:[%s6047_s10 + $0x218] sm:$0xff]   ;;  %v5751_v54 = vld [vmem:[%s6047_s10 + $0x220] sm:$0xff]  }
 0x443   : > { %5412 = vmatprep.subr.bf16.mxu1 %v5892_v0  ;;  %5406 = vmatprep.mubr.msk.bf16.mxu0 %vm5893_vm0, %v5892_v0 }
 0x444   : > { %5426 = vmatprep.mubr.msk.bf16.mxu1 %vm5893_vm0, %v5892_v0 }
 0x446   : > { %v3198_v18 = vpop.permute.xlu0 %3197 }
 0x447   : > { %v7176_v11 = vadd.f32 %v3198_v18, %v6726_v25  ;;  %v5752_v18 = vld [vmem:[%s6047_s10 + $0x260] sm:$0xff]  }
 0x448   : > { %v3200_v32 = vpop.permute.xlu1 %3199 }
 0x449   : > { %v7179_v33 = vadd.f32 %v3200_v32, %v6731_v28  ;;  %3583 = vrot.lane.b32.xlu0 %v7176_v11, %s5895_s27  ;;  %5393 = vmatpush3.bf16.xpose.msra.mxu0 %v5745_v34  ;;  %v5753_v32 = vld [vmem:[%s6047_s10 + $0x228] sm:$0xff]  }
 0x44a   : > { %v3202_v42 = vpop.permute.xlu0 %3201  ;;  %5413 = vmatpush3.bf16.xpose.msra.mxu1 %v5746_v48  ;;  %5394 = vmatprep.subr.bf16.mxu0 %v5892_v0  ;;  %v5754_v34 = vld [vmem:[%s6047_s10 + $0x268] sm:$0xff]   ;;  %v5756_v48 = vld [vmem:[%s6047_s10 + $0x270] sm:$0xff]  }
 0x44b   : > { %v7187_v55 = vadd.f32 %v3202_v42, %v6729_v27  ;;  %3585 = vrot.lane.b32.xlu1 %v7179_v33, %s5895_s27  ;;  %5414 = vmatprep.subr.bf16.mxu1 %v5892_v0  ;;  %v5755_v42 = vld [vmem:[%s6047_s10 + $0x230] sm:$0xff]  }
 0x44c   : > { %v3204_v56 = vpop.permute.xlu1 %3203 }
 0x44d   : > { %v7193_v57 = vadd.f32 %v3204_v56, %v6733_v31  ;;  %3587 = vrot.lane.b32.xlu0 %v7187_v55, %s5895_s27  ;;  %v5757_v56 = vld [vmem:[%s6047_s10 + $0x238] sm:$0xff]  }
 0x44f   : > { %3589 = vrot.lane.b32.xlu1 %v7193_v57, %s5895_s27 }
 0x451   : > { %5395 = vmatpush3.bf16.xpose.msra.mxu0 %v5747_v59  ;;  %v5758_v59 = vld [vmem:[%s6047_s10 + $0x278] sm:$0xff]  }
 0x452   : > { %5415 = vmatpush3.bf16.xpose.msra.mxu1 %v5748_v1  ;;  %5396 = vmatprep.subr.bf16.mxu0 %v5892_v0 }
 0x453   : > { %v2299_v6 = vpop.f32.mrb[48].mxu0  ;;  %5416 = vmatprep.subr.bf16.mxu1 %v5892_v0 }
 0x454   : > { %3285 = vrot.lane.b32.xlu0 %v2299_v6, %s5896_s17  ;;  %v5248_v15 = vpop.f32.mrb[49].mxu0  ;;  %v2346_v21 = vpop.f32.mrb[48].mxu1  ;;  %v5675_v6 = vld [vmem:[%s7695_s1 + $0x100] sm:$0xff]  }
 0x455   : > { %v2302_v9 = vpop.f32.mrb[50].mxu0  ;;  %v5268_v23 = vpop.f32.mrb[49].mxu1 }
 0x456   : > { %3287 = vrot.lane.b32.xlu1 %v2302_v9, %s5896_s17  ;;  %v5249_v26 = vpop.f32.mrb[51].mxu0  ;;  %v2349_v30 = vpop.f32.mrb[50].mxu1 }
 0x457   : > { %v5269_v12 = vpop.f32.mrb[51].mxu1  ;;  %v5759_v26 = vld [vmem:[%s6047_s10 + $0x280] sm:$0xff]  }
 0x458   : > { %3289 = vrot.lane.b32.xlu0 %v2346_v21, %s5896_s17  ;;  %v5676_v21 = vld [vmem:[%s7695_s1 + $0x108] sm:$0xff]  }
 0x459   : > { %5397 = vmatpush3.bf16.xpose.msra.mxu0 %v5749_v36 }
 0x45a   : > { %3291 = vrot.lane.b32.xlu1 %v2349_v30, %s5896_s17  ;;  %5417 = vmatpush3.bf16.xpose.msra.mxu1 %v5750_v8  ;;  %v5760_v30 = vld [vmem:[%s6047_s10 + $0x2c0] sm:$0xff]  }
 0x45b   : > { %5398 = vmatprep.subr.bf16.mxu0 %v5892_v0  ;;  %5418 = vmatprep.subr.bf16.mxu1 %v5892_v0 }
 0x461   : > { %5399 = vmatpush3.bf16.xpose.msra.mxu0 %v5751_v54 }
 0x462   : > { %5419 = vmatpush3.bf16.xpose.msra.mxu1 %v5752_v18  ;;  %5400 = vmatprep.subr.bf16.mxu0 %v5892_v0  ;;  %v5761_v18 = vld [vmem:[%s6047_s10 + $0x288] sm:$0xff]  }
 0x463   : > { %5420 = vmatprep.subr.bf16.mxu1 %v5892_v0 }
 0x469   : > { %5401 = vmatpush3.bf16.xpose.msra.mxu0 %v5753_v32 }
 0x46a   : > { %5421 = vmatpush3.bf16.xpose.msra.mxu1 %v5754_v34  ;;  %5402 = vmatprep.subr.bf16.mxu0 %v5892_v0  ;;  %v5762_v34 = vld [vmem:[%s6047_s10 + $0x2c8] sm:$0xff]  }
 0x46b   : > { %5422 = vmatprep.subr.bf16.mxu1 %v5892_v0 }
 0x471   : > { %5403 = vmatpush3.bf16.xpose.msra.mxu0 %v5755_v42 }
 0x472   : > { %5423 = vmatpush3.bf16.xpose.msra.mxu1 %v5756_v48  ;;  %5404 = vmatprep.subr.bf16.mxu0 %v5892_v0 }
 0x473   : > { %5424 = vmatprep.subr.bf16.mxu1 %v5892_v0 }
 0x479   : > { %5405 = vmatpush3.bf16.xpose.msra.mxu0 %v5757_v56 }
 0x47a   : > { %5425 = vmatpush3.bf16.xpose.msra.mxu1 %v5758_v59  ;;  %5430 = vmatprep.subr.bf16.mxu0 %v5892_v0  ;;  %v5763_v59 = vld [vmem:[%s6047_s10 + $0x290] sm:$0xff]  }
 0x47b   : > { %v3576_v1 = vpop.permute.xlu0 %3575  ;;  %5450 = vmatprep.subr.bf16.mxu1 %v5892_v0 }
 0x47c   : > { %v5764_v1 = vld [vmem:[%s6047_s10 + $0x2d0] sm:$0xff]  }
 0x47d   : > { %v3578_v15 = vpop.permute.xlu1 %3577 }
 0x47f   : > { %v3580_v9 = vpop.permute.xlu0 %3579 }
 0x480   : > { %5407 = vmatmul.mubr.bf16.vlgmr.msra.gmra.mrb[64].mxu0 %v5675_v6 }
 0x481   : > { %v3582_v23 = vpop.permute.xlu1 %3581  ;;  %5431 = vmatpush3.bf16.xpose.msra.mxu0 %v5759_v26  ;;  %5427 = vmatmul.mubr.bf16.vlgmr.msra.gmra.mrb[64].mxu1 %v5676_v21 }
 0x482   : > { %5451 = vmatpush3.bf16.xpose.msra.mxu1 %v5760_v30  ;;  %5432 = vmatprep.subr.bf16.mxu0 %v5892_v0 }
 0x483   : > { %5452 = vmatprep.subr.bf16.mxu1 %v5892_v0  ;;  %5446 = vmatprep.mubr.msk.bf16.mxu0 %vm5893_vm0, %v5892_v0 }
 0x484   : > { %5466 = vmatprep.mubr.msk.bf16.mxu1 %vm5893_vm0, %v5892_v0 }
 0x486   : > { %v3206_v12 = vpop.permute.xlu0 %3205 }
 0x487   : > { %v7242_v36 = vadd.f32 %v3206_v12, %v6776_v37 }
 0x488   : > { %v3208_v8 = vpop.permute.xlu1 %3207 }
 0x489   : > { %v7245_v54 = vadd.f32 %v3208_v8, %v6781_v40  ;;  %3591 = vrot.lane.b32.xlu0 %v7242_v36, %s5895_s27  ;;  %5433 = vmatpush3.bf16.xpose.msra.mxu0 %v5761_v18  ;;  %v5765_v8 = vld [vmem:[%s6047_s10 + $0x298] sm:$0xff]  }
 0x48a   : > { %v3210_v32 = vpop.permute.xlu0 %3209  ;;  %5453 = vmatpush3.bf16.xpose.msra.mxu1 %v5762_v34  ;;  %5434 = vmatprep.subr.bf16.mxu0 %v5892_v0  ;;  %v5766_v18 = vld [vmem:[%s6047_s10 + $0x2d8] sm:$0xff]   ;;  %v5768_v34 = vld [vmem:[%s6047_s10 + $0x2e0] sm:$0xff]  }
 0x48b   : > { %v7253_v42 = vadd.f32 %v3210_v32, %v6779_v39  ;;  %3593 = vrot.lane.b32.xlu1 %v7245_v54, %s5895_s27  ;;  %5454 = vmatprep.subr.bf16.mxu1 %v5892_v0  ;;  %v5767_v32 = vld [vmem:[%s6047_s10 + $0x2a0] sm:$0xff]  }
 0x48c   : > { %v3212_v48 = vpop.permute.xlu1 %3211 }
 0x48d   : > { %v7259_v56 = vadd.f32 %v3212_v48, %v6783_v43  ;;  %3595 = vrot.lane.b32.xlu0 %v7253_v42, %s5895_s27  ;;  %v5769_v48 = vld [vmem:[%s6047_s10 + $0x2a8] sm:$0xff]  }
 0x48f   : > { %3597 = vrot.lane.b32.xlu1 %v7259_v56, %s5895_s27  ;;  %s4148_s27 = scalar_lea.sflag [#allocation6], %s6043_s28 }
 0x491   : > { %5435 = vmatpush3.bf16.xpose.msra.mxu0 %v5763_v59  ;;  %v5770_v59 = vld [vmem:[%s6047_s10 + $0x2e8] sm:$0xff]  }
 0x492   : > { %5455 = vmatpush3.bf16.xpose.msra.mxu1 %v5764_v1  ;;  %5436 = vmatprep.subr.bf16.mxu0 %v5892_v0  ;;  %v5897_v1 = vmov -inf  }
 0x493   : > { %v2393_v6 = vpop.f32.mrb[52].mxu0  ;;  %5456 = vmatprep.subr.bf16.mxu1 %v5892_v0  ;;  %457 = vst.msk [vmem:[#allocation2] sm:$0xff] %vm456_vm1, %v5897_v1  ;;  %458 = vst.msk [vmem:[#allocation2 + $0x8] sm:$0xff] %vm456_vm1, %v5897_v1 }
 0x494   : > { %v2440_v15 = vpop.f32.mrb[52].mxu1  ;;  %3293 = vrot.lane.b32.xlu0 %v2393_v6, %s5896_s17  ;;  %v5288_v21 = vpop.f32.mrb[53].mxu0  ;;  %459 = vst.msk [vmem:[#allocation2 + $0x10] sm:$0xff] %vm456_vm1, %v5897_v1  ;;  %460 = vst.msk [vmem:[#allocation2 + $0x18] sm:$0xff] %vm456_vm1, %v5897_v1  ;;  %v5771_v6 = vld [vmem:[%s6047_s10 + $0x2b0] sm:$0xff]  }
 0x495   : > { %v2396_v9 = vpop.f32.mrb[54].mxu0  ;;  %v5308_v23 = vpop.f32.mrb[53].mxu1  ;;  %461 = vst.msk [vmem:[#allocation2 + $0x20] sm:$0xff] %vm456_vm1, %v5897_v1  ;;  %462 = vst.msk [vmem:[#allocation2 + $0x28] sm:$0xff] %vm456_vm1, %v5897_v1  ;;  %v5773_v21 = vld [vmem:[%s6047_s10 + $0x2b8] sm:$0xff]  }
 0x496   : > { %v2443_v26 = vpop.f32.mrb[54].mxu1  ;;  %3295 = vrot.lane.b32.xlu1 %v2396_v9, %s5896_s17  ;;  %v5289_v30 = vpop.f32.mrb[55].mxu0  ;;  %463 = vst.msk [vmem:[#allocation2 + $0x30] sm:$0xff] %vm456_vm1, %v5897_v1  ;;  %464 = vst.msk [vmem:[#allocation2 + $0x38] sm:$0xff] %vm456_vm1, %v5897_v1  ;;  %v5774_v9 = vld [vmem:[%s6047_s10 + $0x2f8] sm:$0xff]  }
 0x497   : > { %v5309_v12 = vpop.f32.mrb[55].mxu1  ;;  %465 = vst.msk [vmem:[#allocation2 + $0x40] sm:$0xff] %vm456_vm1, %v5897_v1  ;;  %466 = vst.msk [vmem:[#allocation2 + $0x48] sm:$0xff] %vm456_vm1, %v5897_v1 }
 0x498   : > { %3297 = vrot.lane.b32.xlu0 %v2440_v15, %s5896_s17  ;;  %467 = vst.msk [vmem:[#allocation2 + $0x50] sm:$0xff] %vm456_vm1, %v5897_v1  ;;  %468 = vst.msk [vmem:[#allocation2 + $0x58] sm:$0xff] %vm456_vm1, %v5897_v1  ;;  %v5772_v15 = vld [vmem:[%s6047_s10 + $0x2f0] sm:$0xff]   ;;  %v5678_v12 = vld [vmem:[%s7695_s1 + $0x118] sm:$0xff]   ;;  %s5898_s10 = smov 1  }
 0x499   : > { %5437 = vmatpush3.bf16.xpose.msra.mxu0 %v5765_v8  ;;  %469 = vst.msk [vmem:[#allocation2 + $0x60] sm:$0xff] %vm456_vm1, %v5897_v1  ;;  %470 = vst.msk [vmem:[#allocation2 + $0x68] sm:$0xff] %vm456_vm1, %v5897_v1 }
 0x49a   : > { %3299 = vrot.lane.b32.xlu1 %v2443_v26, %s5896_s17  ;;  %5457 = vmatpush3.bf16.xpose.msra.mxu1 %v5766_v18  ;;  %471 = vst.msk [vmem:[#allocation2 + $0x70] sm:$0xff] %vm456_vm1, %v5897_v1  ;;  %472 = vst.msk [vmem:[#allocation2 + $0x78] sm:$0xff] %vm456_vm1, %v5897_v1  ;;  %v5677_v26 = vld [vmem:[%s7695_s1 + $0x110] sm:$0xff]  }
 0x49b   : > { %5438 = vmatprep.subr.bf16.mxu0 %v5892_v0  ;;  %5458 = vmatprep.subr.bf16.mxu1 %v5892_v0  ;;  %473 = vst.msk [vmem:[#allocation2 + $0x80] sm:$0xff] %vm456_vm1, %v5897_v1  ;;  %474 = vst.msk [vmem:[#allocation2 + $0x88] sm:$0xff] %vm456_vm1, %v5897_v1 }
 0x49c   : > { %475 = vst.msk [vmem:[#allocation2 + $0x90] sm:$0xff] %vm456_vm1, %v5897_v1  ;;  %476 = vst.msk [vmem:[#allocation2 + $0x98] sm:$0xff] %vm456_vm1, %v5897_v1 }
 0x49d   : > { %477 = vst.msk [vmem:[#allocation2 + $0xa0] sm:$0xff] %vm456_vm1, %v5897_v1  ;;  %478 = vst.msk [vmem:[#allocation2 + $0xa8] sm:$0xff] %vm456_vm1, %v5897_v1 }
 0x49e   : > { %479 = vst.msk [vmem:[#allocation2 + $0xb0] sm:$0xff] %vm456_vm1, %v5897_v1  ;;  %480 = vst.msk [vmem:[#allocation2 + $0xb8] sm:$0xff] %vm456_vm1, %v5897_v1 }
 0x4a1   : > { %5439 = vmatpush3.bf16.xpose.msra.mxu0 %v5767_v32 }
 0x4a2   : > { %5459 = vmatpush3.bf16.xpose.msra.mxu1 %v5768_v34  ;;  %5440 = vmatprep.subr.bf16.mxu0 %v5892_v0 }
 0x4a3   : > { %5460 = vmatprep.subr.bf16.mxu1 %v5892_v0 }
 0x4a9   : > { %5441 = vmatpush3.bf16.xpose.msra.mxu0 %v5769_v48 }
 0x4aa   : > { %5461 = vmatpush3.bf16.xpose.msra.mxu1 %v5770_v59  ;;  %5442 = vmatprep.subr.bf16.mxu0 %v5892_v0 }
 0x4ab   : > { %5462 = vmatprep.subr.bf16.mxu1 %v5892_v0 }
 0x4b1   : > { %5443 = vmatpush3.bf16.xpose.msra.mxu0 %v5771_v6 }
 0x4b2   : > { %5463 = vmatpush3.bf16.xpose.msra.mxu1 %v5772_v15  ;;  %5444 = vmatprep.subr.bf16.mxu0 %v5892_v0 }
 0x4b3   : > { %5464 = vmatprep.subr.bf16.mxu1 %v5892_v0 }
 0x4b9   : > { %5445 = vmatpush3.bf16.xpose.msra.mxu0 %v5773_v21 }
 0x4ba   : > { %5465 = vmatpush3.bf16.xpose.msra.mxu1 %v5774_v9 }
 0x4bb   : > { %v3584_v23 = vpop.permute.xlu0 %3583 }
 0x4bd   : > { %v3586_v30 = vpop.permute.xlu1 %3585 }
 0x4bf   : > { %v3588_v8 = vpop.permute.xlu0 %3587 }
 0x4c0   : > { %5447 = vmatmul.mubr.bf16.vlgmr.msra.gmra.mrb[68].mxu0 %v5677_v26 }
 0x4c1   : > { %v3590_v18 = vpop.permute.xlu1 %3589  ;;  %5467 = vmatmul.mubr.bf16.vlgmr.msra.gmra.mrb[68].mxu1 %v5678_v12 }
 0x4c6   : > { %v3286_v32 = vpop.permute.xlu0 %3285 }
 0x4c7   : > { %v3357_v0 = vadd.f32 %v3286_v32, %v6912_v61 }
 0x4c8   : > { %v3288_v34 = vpop.permute.xlu1 %3287 }
 0x4c9   : > { %v3358_v48 = vadd.f32 %v3288_v34, %v6923_v5  ;;  %v3406_v59 = vsel %vm3405_vm2, %v3357_v0, -inf }
 0x4ca   : > { %v3290_v1 = vpop.permute.xlu0 %3289  ;;  %3407 = vmax.xlane.f32.xlu0 %v3406_v59 }
 0x4cb   : > { %v3359_v6 = vadd.f32 %v3290_v1, %v6920_v3  ;;  %v3409_v15 = vsel %vm3405_vm2, %v3358_v48, -inf }
 0x4cc   : > { %v3292_v21 = vpop.permute.xlu1 %3291  ;;  %3410 = vmax.xlane.f32.xlu1 %v3409_v15 }
 0x4cd   : > { %v3360_v9 = vadd.f32 %v3292_v21, %v6931_v10  ;;  %v3412_v23 = vsel %vm3405_vm2, %v3359_v6, -inf }
 0x4ce   : > { %3413 = vmax.xlane.f32.xlu0 %v3412_v23 }
 0x4cf   : > { %v3415_v61 = vsel %vm3405_vm2, %v3360_v9, -inf }
 0x4d2   : > { %3416 = vmax.xlane.f32.xlu0 %v3415_v61 }
 0x4d3   : > { %v2487_v26 = vpop.f32.mrb[56].mxu0 }
 0x4d4   : > { %v5328_v5 = vpop.f32.mrb[57].mxu0  ;;  %v2534_v30 = vpop.f32.mrb[56].mxu1 }
 0x4d5   : > { %v2490_v12 = vpop.f32.mrb[58].mxu0  ;;  %v5348_v8 = vpop.f32.mrb[57].mxu1 }
 0x4d6   : > { %v5329_v18 = vpop.f32.mrb[59].mxu0  ;;  %v2537_v32 = vpop.f32.mrb[58].mxu1 }
 0x4d7   : > { %v5349_v3 = vpop.f32.mrb[59].mxu1 }
 0x4dd   : > { %3303 = vrot.lane.b32.xlu1 %v2490_v12, %s5896_s17 }
 0x4e1   : > { %3307 = vrot.lane.b32.xlu1 %v2537_v32, %s5896_s17 }
 0x4e8   : > { %3301 = vrot.lane.b32.xlu0 %v2487_v26, %s5896_s17 }
 0x4ec   : > { %3305 = vrot.lane.b32.xlu0 %v2534_v30, %s5896_s17 }
 0x4fb   : > { %v3592_v10 = vpop.permute.xlu0 %3591 }
 0x4fd   : > { %v3594_v0 = vpop.permute.xlu1 %3593 }
 0x4ff   : > { %v3596_v34 = vpop.permute.xlu0 %3595 }
 0x501   : > { %v3598_v48 = vpop.permute.xlu1 %3597 }
 0x502   : > { %v3381_v48 = vld [vmem:[#allocation2] sm:$0xff] }
 0x506   : > { %v3294_v59 = vpop.permute.xlu0 %3293 }
 0x507   : > { %v3361_v1 = vadd.f32 %v3294_v59, %v6978_v41 }
 0x508   : > { %v3296_v6 = vpop.permute.xlu1 %3295 }
 0x509   : > { %v3362_v15 = vadd.f32 %v3296_v6, %v6981_v45  ;;  %v3418_v21 = vsel %vm3405_vm2, %v3361_v1, -inf }
 0x50a   : > { %v3298_v9 = vpop.permute.xlu0 %3297  ;;  %3419 = vmax.xlane.f32.xlu1 %v3418_v21 }
 0x50b   : > { %v3363_v23 = vadd.f32 %v3298_v9, %v6989_v49  ;;  %v3421_v61 = vsel %vm3405_vm2, %v3362_v15, -inf  ;;  %v3382_v9 = vld [vmem:[#allocation2 + $0x8] sm:$0xff] }
 0x50c   : > { %v3300_v26 = vpop.permute.xlu1 %3299  ;;  %3422 = vmax.xlane.f32.xlu0 %v3421_v61 }
 0x50d   : > { %v3364_v5 = vadd.f32 %v3300_v26, %v6995_v52  ;;  %v3424_v30 = vsel %vm3405_vm2, %v3363_v23, -inf }
 0x50e   : > { %3425 = vmax.xlane.f32.xlu1 %v3424_v30 }
 0x50f   : > { %v3427_v41 = vsel %vm3405_vm2, %v3364_v5, -inf  ;;  %v3383_v5 = vld [vmem:[#allocation2 + $0x10] sm:$0xff] }
 0x510   : > { %3428 = vmax.xlane.f32.xlu0 %v3427_v41 }
 0x513   : > { %v2581_v12 = vpop.f32.mrb[60].mxu0 }
 0x514   : > { %v5368_v45 = vpop.f32.mrb[61].mxu0  ;;  %v2628_v8 = vpop.f32.mrb[60].mxu1 }
 0x515   : > { %v2584_v18 = vpop.f32.mrb[62].mxu0  ;;  %v5388_v32 = vpop.f32.mrb[61].mxu1 }
 0x516   : > { %v5369_v3 = vpop.f32.mrb[63].mxu0  ;;  %v2631_v10 = vpop.f32.mrb[62].mxu1 }
 0x517   : > { %v5389_v49 = vpop.f32.mrb[63].mxu1 }
 0x51f   : > { %3311 = vrot.lane.b32.xlu1 %v2584_v18, %s5896_s17 }
 0x523   : > { %3315 = vrot.lane.b32.xlu1 %v2631_v10, %s5896_s17 }
 0x526   : > { %3309 = vrot.lane.b32.xlu0 %v2581_v12, %s5896_s17 }
 0x52a   : > { %3313 = vrot.lane.b32.xlu0 %v2628_v8, %s5896_s17  ;;  %v3384_v8 = vld [vmem:[#allocation2 + $0x18] sm:$0xff] }
 0x553   : > { %v2675_v52 = vpop.f32.mrb[64].mxu0 }
 0x554   : > { %v5408_v0 = vpop.f32.mrb[65].mxu0  ;;  %v2722_v34 = vpop.f32.mrb[64].mxu1 }
 0x555   : > { %v2678_v59 = vpop.f32.mrb[66].mxu0  ;;  %v5428_v1 = vpop.f32.mrb[65].mxu1 }
 0x556   : > { %v5409_v6 = vpop.f32.mrb[67].mxu0  ;;  %v2725_v15 = vpop.f32.mrb[66].mxu1 }
 0x557   : > { %v3408_v21 = vpop.xlane.xlu0 %3407  ;;  %v5429_v23 = vpop.f32.mrb[67].mxu1 }
 0x558   : > { %v3478_v61 = vmax.f32 %v3381_v48, %v3408_v21 }
 0x559   : > { %v3411_v26 = vpop.xlane.xlu1 %3410 }
 0x55a   : > { %3503 = vst.msk [vmem:[#allocation2] sm:$0xff] %vm456_vm1, %v3478_v61  ;;  %v3479_v30 = vmax.f32 %v3382_v9, %v3411_v26  ;;  %v3385_v26 = vld [vmem:[#allocation2 + $0x20] sm:$0xff] }
 0x55b   : > { %v3414_v41 = vpop.xlane.xlu0 %3413 }
 0x55c   : > { %3504 = vst.msk [vmem:[#allocation2 + $0x8] sm:$0xff] %vm456_vm1, %v3479_v30  ;;  %v3480_v12 = vmax.f32 %v3383_v5, %v3414_v41 }
 0x55d   : > { %v3304_v45 = vpop.permute.xlu1 %3303 }
 0x55e   : > { %3505 = vst.msk [vmem:[#allocation2 + $0x10] sm:$0xff] %vm456_vm1, %v3480_v12  ;;  %v3366_v18 = vadd.f32 %v3304_v45, %v7047_v50  ;;  %v3386_v45 = vld [vmem:[#allocation2 + $0x28] sm:$0xff] }
 0x55f   : > { %v3417_v32 = vpop.xlane.xlu0 %3416 }
 0x560   : > { %v3481_v3 = vmax.f32 %v3384_v8, %v3417_v32  ;;  %v3433_v10 = vsel %vm3405_vm2, %v3366_v18, -inf }
 0x561   : > { %v3308_v49 = vpop.permute.xlu1 %3307  ;;  %3434 = vmax.xlane.f32.xlu0 %v3433_v10 }
 0x562   : > { %3506 = vst.msk [vmem:[#allocation2 + $0x18] sm:$0xff] %vm456_vm1, %v3481_v3  ;;  %v3368_v0 = vadd.f32 %v3308_v49, %v7061_v63  ;;  %v3388_v3 = vld [vmem:[#allocation2 + $0x38] sm:$0xff] }
 0x563   : > { %v3302_v48 = vpop.permute.xlu0 %3301 }
 0x564   : > { %v3365_v1 = vadd.f32 %v3302_v48, %v7044_v47  ;;  %v3439_v6 = vsel %vm3405_vm2, %v3368_v0, -inf }
 0x565   : > { %3440 = vmax.xlane.f32.xlu0 %v3439_v6 }
 0x566   : > { %v3430_v21 = vsel %vm3405_vm2, %v3365_v1, -inf }
 0x567   : > { %v3306_v9 = vpop.permute.xlu0 %3305  ;;  %3431 = vmax.xlane.f32.xlu1 %v3430_v21 }
 0x568   : > { %v3367_v50 = vadd.f32 %v3306_v9, %v7055_v58 }
 0x56a   : > { %v3436_v23 = vsel %vm3405_vm2, %v3367_v50, -inf }
 0x56b   : > { %3437 = vmax.xlane.f32.xlu1 %v3436_v23 }
 0x57b   : > { %3317 = vrot.lane.b32.xlu0 %v2675_v52, %s5896_s17  ;;  %v3387_v52 = vld [vmem:[#allocation2 + $0x30] sm:$0xff] }
 0x57c   : > { %3319 = vrot.lane.b32.xlu1 %v2678_v59, %s5896_s17 }
 0x57f   : > { %3321 = vrot.lane.b32.xlu0 %v2722_v34, %s5896_s17 }
 0x580   : > { %3323 = vrot.lane.b32.xlu1 %v2725_v15, %s5896_s17 }
 0x593   : > { %v2769_v47 = vpop.f32.mrb[68].mxu0 }
 0x594   : > { %v5448_v63 = vpop.f32.mrb[69].mxu0  ;;  %v2816_v61 = vpop.f32.mrb[68].mxu1 }
 0x595   : > { %v2772_v5 = vpop.f32.mrb[70].mxu0  ;;  %v5468_v30 = vpop.f32.mrb[69].mxu1 }
 0x596   : > { %v2819_v41 = vpop.f32.mrb[70].mxu1  ;;  %v5449_v12 = vpop.f32.mrb[71].mxu0 }
 0x597   : > { %v3420_v58 = vpop.xlane.xlu1 %3419  ;;  %v5469_v8 = vpop.f32.mrb[71].mxu1 }
 0x598   : > { %v3482_v18 = vmax.f32 %v3385_v26, %v3420_v58 }
 0x599   : > { %v3423_v32 = vpop.xlane.xlu0 %3422 }
 0x59a   : > { %3507 = vst.msk [vmem:[#allocation2 + $0x20] sm:$0xff] %vm456_vm1, %v3482_v18  ;;  %v3483_v59 = vmax.f32 %v3386_v45, %v3423_v32  ;;  %v3394_v32 = vld [vmem:[#allocation2 + $0x68] sm:$0xff] }
 0x59b   : > { %v3426_v34 = vpop.xlane.xlu1 %3425 }
 0x59c   : > { %3508 = vst.msk [vmem:[#allocation2 + $0x28] sm:$0xff] %vm456_vm1, %v3483_v59  ;;  %v3484_v15 = vmax.f32 %v3387_v52, %v3426_v34  ;;  %v3393_v59 = vld [vmem:[#allocation2 + $0x60] sm:$0xff] }
 0x59d   : > { %v3429_v10 = vpop.xlane.xlu0 %3428 }
 0x59e   : > { %3509 = vst.msk [vmem:[#allocation2 + $0x30] sm:$0xff] %vm456_vm1, %v3484_v15  ;;  %v3485_v49 = vmax.f32 %v3388_v3, %v3429_v10  ;;  %v3396_v3 = vld [vmem:[#allocation2 + $0x78] sm:$0xff]  ;;  %v3395_v10 = vld [vmem:[#allocation2 + $0x70] sm:$0xff] }
 0x59f   : > { %v3312_v0 = vpop.permute.xlu1 %3311 }
 0x5a0   : > { %3510 = vst.msk [vmem:[#allocation2 + $0x38] sm:$0xff] %vm456_vm1, %v3485_v49  ;;  %v3370_v48 = vadd.f32 %v3312_v0, %v7113_v20 }
 0x5a1   : > { %v3310_v1 = vpop.permute.xlu0 %3309 }
 0x5a2   : > { %v3369_v6 = vadd.f32 %v3310_v1, %v7110_v13  ;;  %v3445_v21 = vsel %vm3405_vm2, %v3370_v48, -inf  ;;  %v3391_v13 = vld [vmem:[#allocation2 + $0x50] sm:$0xff] }
 0x5a3   : > { %v3316_v9 = vpop.permute.xlu1 %3315  ;;  %3446 = vmax.xlane.f32.xlu0 %v3445_v21 }
 0x5a4   : > { %v3372_v50 = vadd.f32 %v3316_v9, %v7127_v29  ;;  %v3442_v23 = vsel %vm3405_vm2, %v3369_v6, -inf }
 0x5a5   : > { %v3314_v63 = vpop.permute.xlu0 %3313  ;;  %3443 = vmax.xlane.f32.xlu1 %v3442_v23 }
 0x5a6   : > { %v3371_v26 = vadd.f32 %v3314_v63, %v7121_v24  ;;  %v3451_v30 = vsel %vm3405_vm2, %v3372_v50, -inf }
 0x5a7   : > { %3452 = vmax.xlane.f32.xlu0 %v3451_v30 }
 0x5a8   : > { %v3448_v20 = vsel %vm3405_vm2, %v3371_v26, -inf }
 0x5a9   : > { %3449 = vmax.xlane.f32.xlu1 %v3448_v20 }
 0x5ba   : > { %3327 = vrot.lane.b32.xlu1 %v2772_v5, %s5896_s17 }
 0x5bd   : > { %3325 = vrot.lane.b32.xlu0 %v2769_v47, %s5896_s17 }
 0x5be   : > { %3331 = vrot.lane.b32.xlu1 %v2819_v41, %s5896_s17 }
 0x5c1   : > { %3329 = vrot.lane.b32.xlu0 %v2816_v61, %s5896_s17  ;;  %s257_s17 = scalar_lea.vmem [#allocation7], %s6043_s28 }
 0x5c2   : > { %3673 = vrot.lane.b32.xlu1 %v7835_v4, %s5898_s10  ;;  %s4160_s24 = sshll.u32 %s257_s17, 4  ;;  %s7647_s24 = int_to_ptr.vmem [resolvable:$true] %s4160_s24 }
 0x5c3   : > { %s5805_s16 = scalar_lea.vmem %s7647_s24, 16  ;;  %p5812_p5 = scmp.lt.s32.totalorder %s7647_s24, %s5810_s25 }
 0x5c4   : > { %p5806_p8 = scmp.ne.s32.totalorder %s7647_s24, %s5805_s16  ;;  %p5813_p13 = scmp.lt.s32.totalorder %s5811_s29, %s5805_s16 }
 0x5c5   : > { %3671 = vrot.lane.b32.xlu0 %v7831_v60, %s5898_s10  ;;  %v5899_v60 = vmov 0  }
 0x5c6   : > { %3677 = vrot.lane.b32.xlu1 %v7836_v7, %s5898_s10  ;;  %5545 = vset.pattern.permute.xlu0 %v5899_v60  ;;  %p5807_p11 = pnand %p5806_p8, %p7845_p9  ;;  %p5814_p2 = por %p5813_p13, %p5812_p5 }
 0x5c7   : > { %5546 = vset.pattern.permute.xlu1 %v5899_v60 }
 0x5c8   : > { %p5808_p0 = pneg %p5807_p11 }
 0x5c9   : > { %3675 = vrot.lane.b32.xlu0 %v7834_v2, %s5898_s10  ;;  %v3390_v2 = vld [vmem:[#allocation2 + $0x48] sm:$0xff] }
 0x5ca   : > { %3681 = vrot.lane.b32.xlu1 %v7840_v44, %s5898_s10  ;;  %p5815_p4 = pnand %p5814_p2, %p5808_p0 }
 0x5cd   : > { %3679 = vrot.lane.b32.xlu0 %v7839_v38, %s5898_s10  ;;  %v3392_v38 = vld [vmem:[#allocation2 + $0x58] sm:$0xff] }
 0x5ce   : > { %3685 = vrot.lane.b32.xlu1 %v7842_v51, %s5898_s10 }
 0x5d1   : > { %3683 = vrot.lane.b32.xlu0 %v7841_v53, %s5898_s10 }
 0x5d2   : > { %3689 = vrot.lane.b32.xlu1 %v6613_v17, %s5898_s10  ;;  %v3389_v17 = vld [vmem:[#allocation2 + $0x40] sm:$0xff] }
 0x5d5   : > { %3687 = vrot.lane.b32.xlu0 %v7843_v46, %s5898_s10 }
 0x5d6   : > { %3693 = vrot.lane.b32.xlu1 %v7844_v62, %s5898_s10 }
 0x5d9   : > { %3691 = vrot.lane.b32.xlu0 %v6611_v35, %s5898_s10 }
 0x5ee   : > { %v3435_v4 = vpop.xlane.xlu0 %3434 }
 0x5ef   : > { %v3487_v7 = vmax.f32 %v3390_v2, %v3435_v4 }
 0x5f1   : > { %3512 = vst.msk [vmem:[#allocation2 + $0x48] sm:$0xff] %vm456_vm1, %v3487_v7 }
 0x5f2   : > { %v3441_v44 = vpop.xlane.xlu0 %3440 }
 0x5f3   : > { %v3489_v53 = vmax.f32 %v3392_v38, %v3441_v44 }
 0x5f4   : > { %v3432_v51 = vpop.xlane.xlu1 %3431 }
 0x5f5   : > { %3514 = vst.msk [vmem:[#allocation2 + $0x58] sm:$0xff] %vm456_vm1, %v3489_v53  ;;  %v3486_v46 = vmax.f32 %v3389_v17, %v3432_v51 }
 0x5f6   : > { %v3318_v62 = vpop.permute.xlu0 %3317 }
 0x5f7   : > { %3511 = vst.msk [vmem:[#allocation2 + $0x40] sm:$0xff] %vm456_vm1, %v3486_v46  ;;  %v3373_v35 = vadd.f32 %v3318_v62, %v7176_v11  ;;  %v3772_v46 = vld [vmem:[#allocation2 + $0x8] sm:$0xff] }
 0x5f8   : > { %v3438_v24 = vpop.xlane.xlu1 %3437  ;;  %v3796_v62 = vld [vmem:[%s7696_s2 + $0x8] sm:$0xff] }
 0x5f9   : > { %v3488_v29 = vmax.f32 %v3391_v13, %v3438_v24  ;;  %v3454_v47 = vsel %vm3405_vm2, %v3373_v35, -inf  ;;  %v3820_v13 = vadd.f32 %v3796_v62, %v3772_v46  ;;  %v3795_v24 = vld [vmem:[%s7696_s2] sm:$0xff] }
 0x5fa   : > { %v3322_v61 = vpop.permute.xlu0 %3321  ;;  %3455 = vmax.xlane.f32.xlu1 %v3454_v47  ;;  %v3811_v46 = vld [vmem:[%s7696_s2 + $0x80] sm:$0xff] }
 0x5fb   : > { %3513 = vst.msk [vmem:[#allocation2 + $0x50] sm:$0xff] %vm456_vm1, %v3488_v29  ;;  %v3375_v5 = vadd.f32 %v3322_v61, %v7187_v55  ;;  %v3774_v61 = vld [vmem:[#allocation2 + $0x18] sm:$0xff] }
 0x5fc   : > { %v3320_v41 = vpop.permute.xlu1 %3319 }
 0x5fd   : > { %v3374_v12 = vadd.f32 %v3320_v41, %v7179_v33  ;;  %v3460_v58 = vsel %vm3405_vm2, %v3375_v5, -inf  ;;  %v3798_v5 = vld [vmem:[%s7696_s2 + $0x18] sm:$0xff]  ;;  %v3777_v41 = vld [vmem:[#allocation2 + $0x30] sm:$0xff] }
 0x5fe   : > { %3461 = vmax.xlane.f32.xlu1 %v3460_v58 }
 0x5ff   : > { %v3457_v45 = vsel %vm3405_vm2, %v3374_v12, -inf  ;;  %v3801_v12 = vld [vmem:[%s7696_s2 + $0x30] sm:$0xff] }
 0x600   : > { %v3324_v8 = vpop.permute.xlu1 %3323  ;;  %3458 = vmax.xlane.f32.xlu0 %v3457_v45  ;;  %v3825_v58 = vadd.f32 %v3801_v12, %v3777_v41  ;;  %v3776_v45 = vld [vmem:[#allocation2 + $0x28] sm:$0xff]  ;;  %v3401_v41 = vld [vmem:[#allocation2 + $0xa0] sm:$0xff] }
 0x601   : > { %v3376_v11 = vadd.f32 %v3324_v8, %v7193_v57  ;;  %v3800_v8 = vld [vmem:[%s7696_s2 + $0x28] sm:$0xff] }
 0x603   : > { %v3463_v18 = vsel %vm3405_vm2, %v3376_v11, -inf  ;;  %v3779_v11 = vld [vmem:[#allocation2 + $0x40] sm:$0xff] }
 0x604   : > { %3464 = vmax.xlane.f32.xlu0 %v3463_v18  ;;  %v3803_v18 = vld [vmem:[%s7696_s2 + $0x40] sm:$0xff] }
 0x630   : > { %v3447_v52 = vpop.xlane.xlu0 %3446 }
 0x631   : > { %v3491_v34 = vmax.f32 %v3394_v32, %v3447_v52  ;;  %v3824_v32 = vadd.f32 %v3800_v8, %v3776_v45  ;;  %v3827_v52 = vadd.f32 %v3803_v18, %v3779_v11  ;;  %v3403_v8 = vld [vmem:[#allocation2 + $0xb0] sm:$0xff] }
 0x632   : > { %v3444_v55 = vpop.xlane.xlu1 %3443 }
 0x633   : > { %3516 = vst.msk [vmem:[#allocation2 + $0x68] sm:$0xff] %vm456_vm1, %v3491_v34  ;;  %v3490_v33 = vmax.f32 %v3393_v59, %v3444_v55  ;;  %v3778_v59 = vld [vmem:[#allocation2 + $0x38] sm:$0xff]  ;;  %v3781_v55 = vld [vmem:[#allocation2 + $0x50] sm:$0xff] }
 0x634   : > { %v3453_v15 = vpop.xlane.xlu0 %3452  ;;  %v3802_v34 = vld [vmem:[%s7696_s2 + $0x38] sm:$0xff] }
 0x635   : > { %3515 = vst.msk [vmem:[#allocation2 + $0x60] sm:$0xff] %vm456_vm1, %v3490_v33  ;;  %v3493_v49 = vmax.f32 %v3396_v3, %v3453_v15  ;;  %v3805_v3 = vld [vmem:[%s7696_s2 + $0x50] sm:$0xff]  ;;  %v3826_v33 = vadd.f32 %v3802_v34, %v3778_v59 }
 0x636   : > { %v3450_v0 = vpop.xlane.xlu1 %3449  ;;  %v3829_v15 = vadd.f32 %v3805_v3, %v3781_v55  ;;  %v3815_v3 = vld [vmem:[%s7696_s2 + $0xa0] sm:$0xff] }
 0x637   : > { %3518 = vst.msk [vmem:[#allocation2 + $0x78] sm:$0xff] %vm456_vm1, %v3493_v49  ;;  %v3492_v57 = vmax.f32 %v3395_v10, %v3450_v0  ;;  %v3780_v10 = vld [vmem:[#allocation2 + $0x48] sm:$0xff] }
 0x638   : > { %v3326_v48 = vpop.permute.xlu0 %3325  ;;  %v3804_v49 = vld [vmem:[%s7696_s2 + $0x48] sm:$0xff] }
 0x639   : > { %3517 = vst.msk [vmem:[#allocation2 + $0x70] sm:$0xff] %vm456_vm1, %v3492_v57  ;;  %v3377_v1 = vadd.f32 %v3326_v48, %v7242_v36  ;;  %v3807_v57 = vld [vmem:[%s7696_s2 + $0x60] sm:$0xff]  ;;  %v3828_v48 = vadd.f32 %v3804_v49, %v3780_v10  ;;  %v3816_v10 = vld [vmem:[%s7696_s2 + $0xa8] sm:$0xff] }
 0x63a   : > { %v3328_v6 = vpop.permute.xlu1 %3327 }
 0x63b   : > { %v3378_v21 = vadd.f32 %v3328_v6, %v7245_v54  ;;  %v3466_v9 = vsel %vm3405_vm2, %v3377_v1, -inf  ;;  %v3782_v6 = vld [vmem:[#allocation2 + $0x58] sm:$0xff] }
 0x63c   : > { %v3330_v50 = vpop.permute.xlu0 %3329  ;;  %3467 = vmax.xlane.f32.xlu1 %v3466_v9  ;;  %v3783_v0 = vld [vmem:[#allocation2 + $0x60] sm:$0xff] }
 0x63d   : > { %v3379_v23 = vadd.f32 %v3330_v50, %v7253_v42  ;;  %v3469_v63 = vsel %vm3405_vm2, %v3378_v21, -inf  ;;  %v3831_v1 = vadd.f32 %v3807_v57, %v3783_v0  ;;  %v3806_v21 = vld [vmem:[%s7696_s2 + $0x58] sm:$0xff]  ;;  %v3809_v50 = vld [vmem:[%s7696_s2 + $0x70] sm:$0xff] }
 0x63e   : > { %3470 = vmax.xlane.f32.xlu0 %v3469_v63  ;;  %v3332_v26 = vpop.permute.xlu1 %3331 }
 0x63f   : > { %v3380_v30 = vadd.f32 %v3332_v26, %v7259_v56  ;;  %v3472_v20 = vsel %vm3405_vm2, %v3379_v23, -inf  ;;  %v3830_v23 = vadd.f32 %v3806_v21, %v3782_v6  ;;  %v3784_v26 = vld [vmem:[#allocation2 + $0x68] sm:$0xff] }
 0x640   : > { %v3672_v60 = vpop.permute.xlu0 %3671  ;;  %3473 = vmax.xlane.f32.xlu1 %v3472_v20  ;;  %v3785_v9 = vld [vmem:[#allocation2 + $0x70] sm:$0xff] }
 0x641   : > { %v3475_v36 = vsel %vm3405_vm2, %v3380_v30, -inf  ;;  %v3833_v63 = vadd.f32 %v3809_v50, %v3785_v9  ;;  %v3808_v30 = vld [vmem:[%s7696_s2 + $0x68] sm:$0xff]  ;;  %v3786_v60 = vld [vmem:[#allocation2 + $0x78] sm:$0xff] }
 0x642   : > { %3476 = vmax.xlane.f32.xlu0 %v3475_v36  ;;  %v3674_v54 = vpop.permute.xlu1 %3673  ;;  %v3832_v20 = vadd.f32 %v3808_v30, %v3784_v26  ;;  %v3810_v36 = vld [vmem:[%s7696_s2 + $0x78] sm:$0xff] }
 0x643   : > { %v3834_v54 = vadd.f32 %v3810_v36, %v3786_v60  ;;  %v3818_v9 = vld [vmem:[%s7696_s2 + $0xb8] sm:$0xff] }
 0x644   : > { %v3676_v2 = vpop.permute.xlu0 %3675 }
 0x645   : > { %v3397_v2 = vld [vmem:[#allocation2 + $0x80] sm:$0xff] }
 0x646   : > { %v3678_v4 = vpop.permute.xlu1 %3677 }
 0x648   : > { %v3680_v7 = vpop.permute.xlu0 %3679 }
 0x64a   : > { %v3682_v38 = vpop.permute.xlu1 %3681 }
 0x64b   : > { %v3399_v38 = vld [vmem:[#allocation2 + $0x90] sm:$0xff] }
 0x64c   : > { %v3684_v44 = vpop.permute.xlu0 %3683 }
 0x64e   : > { %v3686_v42 = vpop.permute.xlu1 %3685 }
 0x64f   : > { %v3398_v42 = vld [vmem:[#allocation2 + $0x88] sm:$0xff] }
 0x650   : > { %v3688_v17 = vpop.permute.xlu0 %3687 }
 0x651   : > { %3697 = vrot.lane.b32.xlu1 %v6681_v19, %s5898_s10  ;;  %v3773_v19 = vld [vmem:[#allocation2 + $0x10] sm:$0xff] }
 0x652   : > { %v3690_v53 = vpop.permute.xlu1 %3689 }
 0x654   : > { %v3692_v56 = vpop.permute.xlu0 %3691 }
 0x655   : > { %3701 = vrot.lane.b32.xlu1 %v6683_v22, %s5898_s10  ;;  %v3797_v22 = vld [vmem:[%s7696_s2 + $0x10] sm:$0xff] }
 0x656   : > { %v3694_v51 = vpop.permute.xlu1 %3693  ;;  %v3821_v35 = vadd.f32 %v3797_v22, %v3773_v19 }
 0x657   : > { %v3400_v51 = vld [vmem:[#allocation2 + $0x98] sm:$0xff] }
 0x658   : > { %3695 = vrot.lane.b32.xlu0 %v6676_v14, %s5898_s10  ;;  %v3771_v14 = vld [vmem:[#allocation2] sm:$0xff] }
 0x659   : > { %3705 = vrot.lane.b32.xlu1 %v6731_v28, %s5898_s10  ;;  %v3775_v28 = vld [vmem:[#allocation2 + $0x20] sm:$0xff]  ;;  %v3819_v29 = vadd.f32 %v3795_v24, %v3771_v14  ;;  %v3812_v24 = vld [vmem:[%s7696_s2 + $0x88] sm:$0xff] }
 0x65c   : > { %3699 = vrot.lane.b32.xlu0 %v6679_v16, %s5898_s10  ;;  %v3799_v16 = vld [vmem:[%s7696_s2 + $0x20] sm:$0xff] }
 0x65d   : > { %3874 = vperm.xlu1 %5546, %v3820_v13   ;;  %v3823_v47 = vadd.f32 %v3799_v16, %v3775_v28 }
 0x660   : > { %3703 = vrot.lane.b32.xlu0 %v6726_v25, %s5898_s10  ;;  %v3822_v25 = vadd.f32 %v3798_v5, %v3774_v61 }
 0x661   : > { %3879 = vperm.xlu1 %5546, %v3821_v35   ;;  %v3813_v35 = vld [vmem:[%s7696_s2 + $0x90] sm:$0xff] }
 0x664   : > { %3869 = vperm.xlu0 %5545, %v3819_v29  }
 0x665   : > { %3889 = vperm.xlu1 %5546, %v3823_v47   ;;  %v3814_v47 = vld [vmem:[%s7696_s2 + $0x98] sm:$0xff] }
 0x668   : > { %3884 = vperm.xlu0 %5545, %v3822_v25   ;;  %v3402_v25 = vld [vmem:[#allocation2 + $0xa8] sm:$0xff] }
 0x669   : > { %3899 = vperm.xlu1 %5546, %v3825_v58  }
 0x66c   : > { %3894 = vperm.xlu0 %5545, %v3824_v32   ;;  %v3404_v32 = vld [vmem:[#allocation2 + $0xb8] sm:$0xff] }
 0x66d   : > { %3909 = vperm.xlu1 %5546, %v3827_v52  }
 0x670   : > { %3904 = vperm.xlu0 %5545, %v3826_v33  }
 0x671   : > { %3919 = vperm.xlu1 %5546, %v3829_v15  }
 0x674   : > { %3914 = vperm.xlu0 %5545, %v3828_v48   ;;  %v3817_v48 = vld [vmem:[%s7696_s2 + $0xb0] sm:$0xff] }
 0x675   : > { %3929 = vperm.xlu1 %5546, %v3831_v1  }
 0x678   : > { %3924 = vperm.xlu0 %5545, %v3830_v23  }
 0x679   : > { %3939 = vperm.xlu1 %5546, %v3833_v63  }
 0x67c   : > { %3934 = vperm.xlu0 %5545, %v3832_v20  }
 0x680   : > { %3944 = vperm.xlu0 %5545, %v3834_v54  }
 0x687   : > { %v3456_v4 = vpop.xlane.xlu1 %3455 }
 0x688   : > { %v3494_v7 = vmax.f32 %v3397_v2, %v3456_v4 }
 0x68a   : > { %3519 = vst.msk [vmem:[#allocation2 + $0x80] sm:$0xff] %vm456_vm1, %v3494_v7 }
 0x68b   : > { %v3462_v44 = vpop.xlane.xlu1 %3461 }
 0x68c   : > { %v3496_v17 = vmax.f32 %v3399_v38, %v3462_v44 }
 0x68d   : > { %v3459_v53 = vpop.xlane.xlu0 %3458 }
 0x68e   : > { %3521 = vst.msk [vmem:[#allocation2 + $0x90] sm:$0xff] %vm456_vm1, %v3496_v17  ;;  %v3495_v56 = vmax.f32 %v3398_v42, %v3459_v53  ;;  %v3843_v42 = vld [vmem:[%s7697_s3] sm:$0xff] }
 0x690   : > { %3520 = vst.msk [vmem:[#allocation2 + $0x88] sm:$0xff] %vm456_vm1, %v3495_v56  ;;  %v3844_v56 = vld [vmem:[%s7697_s3 + $0x8] sm:$0xff] }
 0x691   : > { %v3465_v62 = vpop.xlane.xlu0 %3464  ;;  %v3787_v13 = vld [vmem:[#allocation2 + $0x80] sm:$0xff] }
 0x692   : > { %v3497_v19 = vmax.f32 %v3400_v51, %v3465_v62  ;;  %v3835_v22 = vadd.f32 %v3811_v46, %v3787_v13  ;;  %v3848_v51 = vld [vmem:[%s7697_s3 + $0x28] sm:$0xff] }
 0x694   : > { %3522 = vst.msk [vmem:[#allocation2 + $0x98] sm:$0xff] %vm456_vm1, %v3497_v19  ;;  %3949 = vperm.xlu1 %5546, %v3835_v22   ;;  %v3847_v19 = vld [vmem:[%s7697_s3 + $0x20] sm:$0xff]  ;;  %v3850_v22 = vld [vmem:[%s7697_s3 + $0x38] sm:$0xff] }
 0x695   : > { %v3789_v14 = vld [vmem:[#allocation2 + $0x90] sm:$0xff] }
 0x696   : > { %v3837_v28 = vadd.f32 %v3813_v35, %v3789_v14 }
 0x697   : > { %v3788_v16 = vld [vmem:[#allocation2 + $0x88] sm:$0xff] }
 0x698   : > { %3959 = vperm.xlu1 %5546, %v3837_v28   ;;  %v3836_v29 = vadd.f32 %v3812_v24, %v3788_v16  ;;  %v3849_v16 = vld [vmem:[%s7697_s3 + $0x30] sm:$0xff] }
 0x69a   : > { %3954 = vperm.xlu0 %5545, %v3836_v29   ;;  %v3852_v29 = vld [vmem:[%s7697_s3 + $0x48] sm:$0xff] }
 0x69b   : > { %v3790_v61 = vld [vmem:[#allocation2 + $0x98] sm:$0xff] }
 0x69c   : > { %v3838_v5 = vadd.f32 %v3814_v47, %v3790_v61 }
 0x69e   : > { %3964 = vperm.xlu0 %5545, %v3838_v5  }
 0x6c9   : > { %v3468_v12 = vpop.xlane.xlu1 %3467 }
 0x6ca   : > { %v3498_v58 = vmax.f32 %v3401_v41, %v3468_v12  ;;  %v3854_v12 = vld [vmem:[%s7697_s3 + $0x58] sm:$0xff] }
 0x6cb   : > { %v3471_v45 = vpop.xlane.xlu0 %3470 }
 0x6cc   : > { %3523 = vst.msk [vmem:[#allocation2 + $0xa0] sm:$0xff] %vm456_vm1, %v3498_v58  ;;  %v3499_v11 = vmax.f32 %v3402_v25, %v3471_v45  ;;  %v3851_v25 = vld [vmem:[%s7697_s3 + $0x40] sm:$0xff] }
 0x6cd   : > { %v3474_v18 = vpop.xlane.xlu1 %3473 }
 0x6ce   : > { %3524 = vst.msk [vmem:[#allocation2 + $0xa8] sm:$0xff] %vm456_vm1, %v3499_v11  ;;  %v3500_v52 = vmax.f32 %v3403_v8, %v3474_v18  ;;  %v3853_v18 = vld [vmem:[%s7697_s3 + $0x50] sm:$0xff] }
 0x6cf   : > { %v3477_v59 = vpop.xlane.xlu0 %3476 }
 0x6d0   : > { %3525 = vst.msk [vmem:[#allocation2 + $0xb0] sm:$0xff] %vm456_vm1, %v3500_v52  ;;  %v3501_v34 = vmax.f32 %v3404_v32, %v3477_v59 }
 0x6d1   : > { %v3698_v55 = vpop.permute.xlu1 %3697 }
 0x6d2   : > { %3526 = vst.msk [vmem:[#allocation2 + $0xb8] sm:$0xff] %vm456_vm1, %v3501_v34  ;;  %v3856_v55 = vld [vmem:[%s7697_s3 + $0x68] sm:$0xff] }
 0x6d3   : > { %v3696_v33 = vpop.permute.xlu0 %3695  ;;  %v3791_v15 = vld [vmem:[#allocation2 + $0xa0] sm:$0xff] }
 0x6d4   : > { %v3839_v49 = vadd.f32 %v3815_v3, %v3791_v15 }
 0x6d5   : > { %v3702_v0 = vpop.permute.xlu1 %3701  ;;  %v3792_v57 = vld [vmem:[#allocation2 + $0xa8] sm:$0xff] }
 0x6d6   : > { %3969 = vperm.xlu1 %5546, %v3839_v49   ;;  %v3840_v1 = vadd.f32 %v3816_v10, %v3792_v57  ;;  %v3855_v57 = vld [vmem:[%s7697_s3 + $0x60] sm:$0xff] }
 0x6d7   : > { %v3700_v6 = vpop.permute.xlu0 %3699  ;;  %v3793_v21 = vld [vmem:[#allocation2 + $0xb0] sm:$0xff] }
 0x6d8   : > { %3974 = vperm.xlu0 %5545, %v3840_v1   ;;  %v3841_v50 = vadd.f32 %v3817_v48, %v3793_v21  ;;  %v3858_v48 = vld [vmem:[%s7697_s3 + $0x78] sm:$0xff] }
 0x6d9   : > { %v3706_v23 = vpop.permute.xlu1 %3705  ;;  %v3794_v63 = vld [vmem:[#allocation2 + $0xb8] sm:$0xff] }
 0x6da   : > { %3979 = vperm.xlu1 %5546, %v3841_v50   ;;  %v3842_v26 = vadd.f32 %v3818_v9, %v3794_v63 }
 0x6db   : > { %v3704_v30 = vpop.permute.xlu0 %3703 }
 0x6dc   : > { %3984 = vperm.xlu0 %5545, %v3842_v26   ;;  %v3857_v30 = vld [vmem:[%s7697_s3 + $0x70] sm:$0xff] }
 0x6dd   : > { %v3875_v60 = vpop.permute.xlu1 %3874 }
 0x6de   : > { %3707 = vrot.lane.b32.xlu1 %v6729_v27, %s5898_s10  ;;  %v3988_v35 = vmul.f32 %v3875_v60, %v3844_v56 }
 0x6e0   : > { %3709 = vrot.lane.b32.xlu0 %v6733_v31, %s5898_s10  ;;  %v4013_v45 = vsel %vm4011_vm3, %v3988_v35, 0.0 }
 0x6e1   : > { %v3880_v54 = vpop.permute.xlu1 %3879 }
 0x6e2   : > { %3711 = vrot.lane.b32.xlu1 %v6776_v37, %s5898_s10 }
 0x6e3   : > { %v3870_v20 = vpop.permute.xlu0 %3869 }
 0x6e4   : > { %3713 = vrot.lane.b32.xlu0 %v6781_v40, %s5898_s10  ;;  %v3846_v40 = vld [vmem:[%s7697_s3 + $0x18] sm:$0xff]  ;;  %v3987_v62 = vmul.f32 %v3870_v20, %v3843_v42  ;;  %v3860_v20 = vld [vmem:[%s7697_s3 + $0x88] sm:$0xff] }
 0x6e5   : > { %v3890_v2 = vpop.permute.xlu1 %3889 }
 0x6e6   : > { %3715 = vrot.lane.b32.xlu1 %v6779_v39, %s5898_s10  ;;  %v3845_v39 = vld [vmem:[%s7697_s3 + $0x10] sm:$0xff]  ;;  %v4012_v61 = vsel %vm4011_vm3, %v3987_v62, 0.0  ;;  %v3991_v5 = vmul.f32 %v3890_v2, %v3847_v19 }
 0x6e7   : > { %v3885_v36 = vpop.permute.xlu0 %3884  ;;  %v3989_v53 = vmul.f32 %v3880_v54, %v3845_v39  ;;  %v4014_v52 = vadd.f32 %v4013_v45, %v4012_v61 }
 0x6e8   : > { %3717 = vrot.lane.b32.xlu0 %v6783_v43, %s5898_s10  ;;  %v3990_v43 = vmul.f32 %v3885_v36, %v3846_v40  ;;  %v4030_v33 = vsel %vm4011_vm3, %v3991_v5, 0.0 }
 0x6e9   : > { %v3900_v31 = vpop.permute.xlu1 %3899  ;;  %v4021_v14 = vsel %vm4011_vm3, %v3989_v53, 0.0  ;;  %v4015_v50 = vrot.slane %v4014_v52, 4  ;;  %v3861_v53 = vld [vmem:[%s7697_s3 + $0x90] sm:$0xff] }
 0x6ea   : > { %v4022_v13 = vsel %vm4011_vm3, %v3990_v43, 0.0  ;;  %v3993_v8 = vmul.f32 %v3900_v31, %v3849_v16  ;;  %v3859_v31 = vld [vmem:[%s7697_s3 + $0x80] sm:$0xff] }
 0x6eb   : > { %v3895_v27 = vpop.permute.xlu0 %3894  ;;  %v4023_v28 = vadd.f32 %v4022_v13, %v4021_v14  ;;  %v4016_v43 = vadd.f32 %v4015_v50, %v4014_v52 }
 0x6ec   : > { %v3992_v24 = vmul.f32 %v3895_v27, %v3848_v51  ;;  %v4039_v6 = vsel %vm4011_vm3, %v3993_v8, 0.0 }
 0x6ed   : > { %v3910_v38 = vpop.permute.xlu1 %3909  ;;  %v4024_v59 = vrot.slane %v4023_v28, 4 }
 0x6ee   : > { %v4031_v11 = vsel %vm4011_vm3, %v3992_v24, 0.0  ;;  %v3995_v15 = vmul.f32 %v3910_v38, %v3851_v25 }
 0x6ef   : > { %v3905_v4 = vpop.permute.xlu0 %3904  ;;  %v4032_v49 = vadd.f32 %v4031_v11, %v4030_v33  ;;  %v4025_v23 = vadd.f32 %v4024_v59, %v4023_v28 }
 0x6f0   : > { %v3994_v41 = vmul.f32 %v3905_v4, %v3850_v22  ;;  %v4048_v60 = vsel %vm4011_vm3, %v3995_v15, 0.0 }
 0x6f1   : > { %v3920_v44 = vpop.permute.xlu1 %3919  ;;  %v4033_v27 = vrot.slane %v4032_v49, 4  ;;  %v4026_v42 = vrot.slane %v4025_v23, 2 }
 0x6f2   : > { %v4040_v10 = vsel %vm4011_vm3, %v3994_v41, 0.0  ;;  %v3997_v0 = vmul.f32 %v3920_v44, %v3853_v18 }
 0x6f3   : > { %v3915_v7 = vpop.permute.xlu0 %3914  ;;  %v4041_v63 = vadd.f32 %v4040_v10, %v4039_v6  ;;  %v4034_v19 = vadd.f32 %v4033_v27, %v4032_v49  ;;  %v4027_v5 = vadd.f32 %v4026_v42, %v4025_v23 }
 0x6f4   : > { %v3996_v32 = vmul.f32 %v3915_v7, %v3852_v29  ;;  %v4057_v2 = vsel %vm4011_vm3, %v3997_v0, 0.0  ;;  %v3862_v7 = vld [vmem:[%s7697_s3 + $0x98] sm:$0xff]  ;;  %v4017_v29 = vrot.slane %v4016_v43, 2 }
 0x6f5   : > { %v3930_v46 = vpop.permute.xlu1 %3929  ;;  %v4035_v25 = vrot.slane %v4034_v19, 2 }
 0x6f6   : > { %v4049_v21 = vsel %vm4011_vm3, %v3996_v32, 0.0  ;;  %v3999_v36 = vmul.f32 %v3930_v46, %v3855_v57  ;;  %v4018_v32 = vadd.f32 %v4017_v29, %v4016_v43 }
 0x6f7   : > { %v3925_v37 = vpop.permute.xlu0 %3924  ;;  %v4050_v4 = vadd.f32 %v4049_v21, %v4048_v60 }
 0x6f8   : > { %v3998_v34 = vmul.f32 %v3925_v37, %v3854_v12  ;;  %v4066_v51 = vsel %vm4011_vm3, %v3999_v36, 0.0  ;;  %v4019_v0 = vrot.slane %v4018_v32, 1  ;;  %v3863_v36 = vld [vmem:[%s7697_s3 + $0xa0] sm:$0xff] }
 0x6f9   : > { %v3940_v58 = vpop.permute.xlu1 %3939  ;;  %v4051_v22 = vrot.slane %v4050_v4, 4 }
 0x6fa   : > { %v4058_v26 = vsel %vm4011_vm3, %v3998_v34, 0.0  ;;  %v4001_v40 = vmul.f32 %v3940_v58, %v3857_v30 }
 0x6fb   : > { %v3935_v17 = vpop.permute.xlu0 %3934  ;;  %v4059_v37 = vadd.f32 %v4058_v26, %v4057_v2  ;;  %v4052_v58 = vadd.f32 %v4051_v22, %v4050_v4  ;;  %v4020_v26 = vadd.f32 %v4019_v0, %v4018_v32 }
 0x6fc   : > { %v4000_v9 = vmul.f32 %v3935_v17, %v3856_v55  ;;  %v4042_v17 = vrot.slane %v4041_v63, 4  ;;  %v4075_v24 = vsel %vm4011_vm3, %v4001_v40, 0.0  ;;  %v4028_v55 = vrot.slane %v4027_v5, 1 }
 0x6fd   : > { %v4060_v14 = vrot.slane %v4059_v37, 4  ;;  %v4053_v33 = vrot.slane %v4052_v58, 2 }
 0x6fe   : > { %v4067_v44 = vsel %vm4011_vm3, %v4000_v9, 0.0  ;;  %v4029_v6 = vadd.f32 %v4028_v55, %v4027_v5 }
 0x6ff   : > { %v3945_v47 = vpop.permute.xlu0 %3944  ;;  %v4068_v35 = vadd.f32 %v4067_v44, %v4066_v51  ;;  %v4061_v11 = vadd.f32 %v4060_v14, %v4059_v37  ;;  %v4054_v9 = vadd.f32 %v4053_v33, %v4052_v58  ;;  %v4120_v44 = vsel %vm4011_vm3, %v4020_v26, 0.0 }
 0x700   : > { %v4002_v54 = vmul.f32 %v3945_v47, %v3858_v48  ;;  %v4043_v47 = vadd.f32 %v4042_v17, %v4041_v63 }
 0x701   : > { %v4069_v45 = vrot.slane %v4068_v35, 4  ;;  %v4062_v49 = vrot.slane %v4061_v11, 2  ;;  %v4055_v2 = vrot.slane %v4054_v9, 1 }
 0x702   : > { %v4076_v46 = vsel %vm4011_vm3, %v4002_v54, 0.0  ;;  %v4044_v52 = vrot.slane %v4043_v47, 2  ;;  %v4121_v54 = vsel %vm4011_vm3, %v4029_v6, 0.0 }
 0x703   : > { %v4077_v61 = vadd.f32 %v4076_v46, %v4075_v24  ;;  %v4070_v15 = vadd.f32 %v4069_v45, %v4068_v35  ;;  %v4063_v63 = vadd.f32 %v4062_v49, %v4061_v11  ;;  %v3866_v35 = vld [vmem:[%s7697_s3 + $0xb8] sm:$0xff] }
 0x704   : > { %v4045_v57 = vadd.f32 %v4044_v52, %v4043_v47 }
 0x705   : > { %v4078_v59 = vrot.slane %v4077_v61, 4  ;;  %v4071_v50 = vrot.slane %v4070_v15, 2  ;;  %v4064_v37 = vrot.slane %v4063_v63, 1 }
 0x706   : > { %v4046_v30 = vrot.slane %v4045_v57, 1 }
 0x707   : > { %v4079_v48 = vadd.f32 %v4078_v59, %v4077_v61  ;;  %v4072_v4 = vadd.f32 %v4071_v50, %v4070_v15  ;;  %v4065_v14 = vadd.f32 %v4064_v37, %v4063_v63 }
 0x709   : > { %v4129_v52 = vsel %vm4011_vm3, %v4065_v14, 0.0 }
 0x713   : > { %v3950_v1 = vpop.permute.xlu1 %3949 }
 0x714   : > { %v4003_v62 = vmul.f32 %v3950_v1, %v3859_v31 }
 0x716   : > { %v4084_v41 = vsel %vm4011_vm3, %v4003_v62, 0.0  ;;  %v4056_v62 = vadd.f32 %v4055_v2, %v4054_v9 }
 0x717   : > { %v3960_v56 = vpop.permute.xlu1 %3959 }
 0x718   : > { %v4005_v28 = vmul.f32 %v3960_v56, %v3861_v53  ;;  %v3865_v53 = vld [vmem:[%s7697_s3 + $0xb0] sm:$0xff]  ;;  %v4122_v56 = vadd.f32 %v4121_v54, %v4120_v44  ;;  %v4127_v58 = vsel %vm4011_vm3, %v4056_v62, 0.0 }
 0x719   : > { %v3955_v3 = vpop.permute.xlu0 %3954 }
 0x71a   : > { %v4004_v39 = vmul.f32 %v3955_v3, %v3860_v20  ;;  %v4093_v18 = vsel %vm4011_vm3, %v4005_v28, 0.0  ;;  %v4036_v3 = vadd.f32 %v4035_v25, %v4034_v19  ;;  %v4080_v20 = vrot.slane %v4079_v48, 2 }
 0x71c   : > { %v4085_v16 = vsel %vm4011_vm3, %v4004_v39, 0.0  ;;  %v4037_v21 = vrot.slane %v4036_v3, 1  ;;  %v4047_v39 = vadd.f32 %v4046_v30, %v4045_v57  ;;  %v4081_v43 = vadd.f32 %v4080_v20, %v4079_v48 }
 0x71d   : > { %v3965_v38 = vpop.permute.xlu0 %3964  ;;  %v4086_v8 = vadd.f32 %v4085_v16, %v4084_v41 }
 0x71e   : > { %v4006_v13 = vmul.f32 %v3965_v38, %v3862_v7  ;;  %v4038_v27 = vadd.f32 %v4037_v21, %v4036_v3  ;;  %v3864_v38 = vld [vmem:[%s7697_s3 + $0xa8] sm:$0xff]  ;;  %v4125_v29 = vsel %vm4011_vm3, %v4047_v39, 0.0  ;;  %v4082_v47 = vrot.slane %v4081_v43, 1 }
 0x71f   : > { %v4087_v10 = vrot.slane %v4086_v8, 4 }
 0x720   : > { %v4094_v12 = vsel %vm4011_vm3, %v4006_v13, 0.0  ;;  %v4123_v46 = vsel %vm4011_vm3, %v4038_v27, 0.0  ;;  %v4073_v13 = vrot.slane %v4072_v4, 1  ;;  %v4083_v55 = vadd.f32 %v4082_v47, %v4081_v43 }
 0x721   : > { %v4095_v34 = vadd.f32 %v4094_v12, %v4093_v18  ;;  %v4088_v23 = vadd.f32 %v4087_v10, %v4086_v8  ;;  %v4124_v12 = vadd.f32 %v4123_v46, %v4122_v56 }
 0x722   : > { %v4074_v45 = vadd.f32 %v4073_v13, %v4072_v4  ;;  %v4133_v9 = vsel %vm4011_vm3, %v4083_v55, 0.0 }
 0x723   : > { %v4096_v1 = vrot.slane %v4095_v34, 4  ;;  %v4089_v31 = vrot.slane %v4088_v23, 2  ;;  %v4126_v32 = vadd.f32 %v4125_v29, %v4124_v12 }
 0x724   : > { %v4131_v0 = vsel %vm4011_vm3, %v4074_v45, 0.0 }
 0x725   : > { %v4097_v60 = vadd.f32 %v4096_v1, %v4095_v34  ;;  %v4090_v19 = vadd.f32 %v4089_v31, %v4088_v23  ;;  %v4128_v49 = vadd.f32 %v4127_v58, %v4126_v32 }
 0x727   : > { %v4098_v42 = vrot.slane %v4097_v60, 2  ;;  %v4091_v8 = vrot.slane %v4090_v19, 1  ;;  %v4130_v21 = vadd.f32 %v4129_v52, %v4128_v49 }
 0x729   : > { %v4099_v61 = vadd.f32 %v4098_v42, %v4097_v60  ;;  %v4092_v57 = vadd.f32 %v4091_v8, %v4090_v19  ;;  %v4132_v30 = vadd.f32 %v4131_v0, %v4130_v21 }
 0x72b   : > { %v4100_v3 = vrot.slane %v4099_v61, 1  ;;  %v4135_v20 = vsel %vm4011_vm3, %v4092_v57, 0.0  ;;  %v4134_v27 = vadd.f32 %v4133_v9, %v4132_v30 }
 0x72d   : > { %v4101_v50 = vadd.f32 %v4100_v3, %v4099_v61 }
 0x72f   : > { %v4137_v2 = vsel %vm4011_vm3, %v4101_v50, 0.0 }
 0x755   : > { %v3970_v7 = vpop.permute.xlu1 %3969 }
 0x756   : > { %v4007_v40 = vmul.f32 %v3970_v7, %v3863_v36 }
 0x757   : > { %v3975_v17 = vpop.permute.xlu0 %3974 }
 0x758   : > { %v4008_v51 = vmul.f32 %v3975_v17, %v3864_v38  ;;  %v4102_v24 = vsel %vm4011_vm3, %v4007_v40, 0.0  ;;  %v4136_v38 = vadd.f32 %v4135_v20, %v4134_v27  ;;  %v4143_v17 = vld [vmem:[%s7698_s4] sm:$0x1] }
 0x759   : > { %v3980_v22 = vpop.permute.xlu1 %3979 }
 0x75a   : > { %v4103_v28 = vsel %vm4011_vm3, %v4008_v51, 0.0  ;;  %v4009_v16 = vmul.f32 %v3980_v22, %v3865_v53  ;;  %v4138_v44 = vadd.f32 %v4137_v2, %v4136_v38 }
 0x75b   : > { %v4104_v5 = vadd.f32 %v4103_v28, %v4102_v24  ;;  %v3985_v41 = vpop.permute.xlu0 %3984 }
 0x75c   : > { %v4010_v25 = vmul.f32 %v3985_v41, %v3866_v35  ;;  %v4111_v59 = vsel %vm4011_vm3, %v4009_v16, 0.0 }
 0x75d   : > { %v4105_v11 = vrot.slane %v4104_v5, 4  ;;  %v3708_v18 = vpop.permute.xlu1 %3707 }
 0x75e   : > { %v4112_v34 = vsel %vm4011_vm3, %v4010_v25, 0.0 }
 0x75f   : > { %v4106_v33 = vadd.f32 %v4105_v11, %v4104_v5  ;;  %v4113_v15 = vadd.f32 %v4112_v34, %v4111_v59  ;;  %v3710_v10 = vpop.permute.xlu0 %3709 }
 0x761   : > { %v4107_v48 = vrot.slane %v4106_v33, 2  ;;  %v4114_v1 = vrot.slane %v4113_v15, 4  ;;  %v3712_v6 = vpop.permute.xlu1 %3711 }
 0x763   : > { %v4108_v23 = vadd.f32 %v4107_v48, %v4106_v33  ;;  %v4115_v63 = vadd.f32 %v4114_v1, %v4113_v15  ;;  %v3714_v26 = vpop.permute.xlu0 %3713 }
 0x765   : > { %v4109_v60 = vrot.slane %v4108_v23, 1  ;;  %v4116_v36 = vrot.slane %v4115_v63, 2  ;;  %v3716_v54 = vpop.permute.xlu1 %3715 }
 0x767   : > { %v4110_v4 = vadd.f32 %v4109_v60, %v4108_v23  ;;  %v4117_v31 = vadd.f32 %v4116_v36, %v4115_v63  ;;  %v3718_v7 = vpop.permute.xlu0 %3717 }
 0x769   : > { %v4139_v37 = vsel %vm4011_vm3, %v4110_v4, 0.0  ;;  %v4118_v40 = vrot.slane %v4117_v31, 1 }
 0x76a   : > { %v4140_v43 = vadd.f32 %v4139_v37, %v4138_v44 }
 0x76b   : > { %v4119_v39 = vadd.f32 %v4118_v40, %v4117_v31 }
 0x76d   : > { %v4141_v42 = vsel %vm4011_vm3, %v4119_v39, 0.0 }
 0x76e   : > { %v4142_v53 = vadd.f32 %v4141_v42, %v4140_v43 }
 0x770   : > { %v4144_v56 = vadd.f32 %v4143_v17, %v4142_v53 }
 0x772   : > { %4146 = vst.msk [vmem:[%s257_s17] sm:$0x1] %vm4145_vm4, %v4144_v56 }
 0x773   : > { %5818 = shalt.err (!%p5815_p4)
}
 0x774   : > { %s5819_s28 = scalar_lea.hbm %s7645_s14, 16  ;;  %s5823_s11 = scalar_lea.hbm %s7699_s5, 32 }
 0x775   : > { %p5820_p6 = scmp.ne.s32.totalorder %s7645_s14, %s5819_s28  ;;  %p5824_p12 = scmp.lt.u32.totalorder %s7645_s14, %s7699_s5 }
 0x776   : > { %p5825_p1 = scmp.lt.u32.totalorder %s5823_s11, %s5819_s28  ;;  %p5827_p8 = scmp.lt.u32.totalorder %s5819_s28, %s7645_s14 }
 0x777   : > { %p5821_p7 = pnand %p5820_p6, %p7845_p9 }
 0x778   : > { %p5826_p3 = por %p5825_p1, %p5824_p12 }
 0x779   : > { %p5822_p10 = pneg %p5821_p7 }
 0x77a   : > { %p5828_p11 = por %p5827_p8, %p5826_p3 }
 0x77c   : > { %p5829_p0 = pnand %p5828_p11, %p5822_p10 }
 0x77e   : > { %5832 = shalt.err (!%p5829_p0)
}
 0x77f   : > { %5475 = dma.vmem_to_hbm [thread:$0]  (%p7845_p9), %s7647_s24, 16, %s7645_s14, %s4148_s27  }
 0x780 PF: > { %s4172_s17 = sand.u32 1, %s5867_s18   ;;  %p7846_p5 = scmp.ne.s32.totalorder %s7750_s8, 0 }
 0x781   : > { %p7847_p13 = scmp.ge.s32.totalorder %s5887_s23, 2  ;;  %s4173_s9 = scalar_lea.sflag [#allocation6], %s4172_s17 }
 0x783   : > { %p5482_p2 = pnand %p7847_p13, %p7846_p5 }
 0x785   : > { %5862 = dma.done.wait (!%p5482_p2), %s4173_s9, 16  }
 0x786   : > { %5864 = vsyncadd (!%p5482_p2), %s4173_s9, 4294967280  ;;  %s21_s23 = sadd.s32 1, %s5887_s23   ;;  %s7848_s18 = smov %s5871_s19 }
 0x787   : > { %p18_p4 = scmp.ge.s32.totalorder %s21_s23, 4   ;;  %s7849_s19 = smov %s5875_s20 }
 0x788   : > { %s7850_s20 = smov %s5987_s7  ;;  %s7851_s21 = smov %s5883_s22 }
 0x789   : > { %s7852_s22 = smov %s7854_s26  ;;  %20 = sbr.rel (!%p18_p4) target bundleno = 6 (0x6), region = 101 }
 0x790   :  { %4177 = vsyncpa [#allocation5], 1 }
 0x791   :  { %4179 = vsyncpa [#allocation5 + $0x1], 1 }
 0x792   :  { %4180 = vsyncpa [#allocation6], 1 }
 0x793   :  { %4182 = vsyncpa [#allocation6 + $0x1], 1 }

</bundles_post_ra>
